<compile_context>
chip_gen: v6e
topology: v6e:2x2x1
jax: 0.10.0
libtpu: 0.0.40
codegen_flags: <defaults>
</compile_context>

<pallas_src>
import functools
import math

import jax
import jax.numpy as jnp
from jax.experimental import pallas as pl
from jax.experimental.pallas import tpu as pltpu


# ----------------------------- kernels --------------------------------------


def _siren_kernel(x_ref, w_ref, b_ref, out_ref, gauss_ref, *, w0):
    # x: (tm, Din_p) compute dtype; w: (Din_p, Dout_p) pre-transposed.
    pre = jnp.dot(x_ref[...], w_ref[...], preferred_element_type=jnp.float32)
    pre = pre + b_ref[...]                       # (1, Dout_p) f32, row broadcast
    if gauss_ref is not None:
        gauss_ref[...] = pre.astype(gauss_ref.dtype)
    if w0 != 1.0:                                # skipped when folded / w0 == 1
        pre = pre * jnp.float32(w0)
    out_ref[...] = jnp.sin(pre).astype(out_ref.dtype)


def _siren_kernel_no_gauss(x_ref, w_ref, b_ref, out_ref, *, w0):
    _siren_kernel(x_ref, w_ref, b_ref, out_ref, None, w0=w0)


# ----------------------------- helpers ---------------------------------------


def _round_up(v, m):
    return ((v + m - 1) // m) * m


def _vmem_capacity_bytes():
    try:
        return int(pltpu.get_tpu_info().vmem_capacity_bytes)
    except Exception:
        return 64 << 20  # conservative (v7x per-TC)


def _row_align(*dtypes):
    """Sublane alignment for the batch (second-minor) dim: 8 f32 / 16 bf16 / 32 int8."""
    a = 8
    for dt in dtypes:
        a = max(a, 32 // max(jnp.dtype(dt).itemsize, 1))
    return a


def _choose_block_rows(batch, per_row_bytes, resident_bytes, row_align):
    """Largest batch tile whose pipelined buffers fit a generation-aware budget."""
    cap = _vmem_capacity_bytes()
    # ~20 MiB pipelined buffers on 128 MiB-VMEM parts (v5e/v6e), ~10 MiB on v7x,
    # minus the VMEM-resident weight and headroom.
    budget = (20 << 20) if cap >= (100 << 20) else (10 << 20)
    avail = min(budget, cap - resident_bytes - (8 << 20))
    rows = max(row_align, min(int(avail // max(per_row_bytes, 1)), 2048))
    # Keep >= 4 grid steps: v7x megacore sharding + DMA/compute overlap.
    if batch >= 4 * row_align:
        rows = min(rows, max(row_align, (batch // 4 // row_align) * row_align))
    rows = max(row_align, (rows // row_align) * row_align)
    return batch if rows >= batch else rows


# ----------------------------- wrapper ---------------------------------------


def siren_forward(
    x,
    weight,
    bias=None,
    *,
    w0=1.0,
    block_rows=None,
    compute_dtype=jnp.bfloat16,
    out_dtype=None,
    gaussian_dtype=None,
    return_gaussian=True,
):
    """Pallas Siren.forward (default flags).

    x:      (B, dim_in)
    weight: (dim_out, dim_in)   (PyTorch F.linear convention, not transposed)
    bias:   (dim_out,) or None
    Returns (out, gaussian) like the PyTorch module, or just `out` when
    return_gaussian=False.
    """
    B, dim_in = x.shape
    dim_out, dim_in_w = weight.shape
    assert dim_in_w == dim_in, "weight must be (dim_out, dim_in)"

    out_dtype = out_dtype or x.dtype
    gaussian_dtype = gaussian_dtype or x.dtype
    cd = compute_dtype or x.dtype

    if bias is None:
        bias = jnp.zeros((dim_out,), jnp.float32)

    # Fold w0 into the parameters when the pre-activation is not returned:
    # the kernel epilogue then avoids one (tm, Dout) vmul per tile.
    kernel_w0 = float(w0)
    if (not return_gaussian) and kernel_w0 != 1.0:
        weight = weight * kernel_w0
        bias = bias * kernel_w0
        kernel_w0 = 1.0

    # --- pad feature dims to lane-dense multiples of 128 (zero padding is exact)
    dim_in_p = _round_up(dim_in, 128)
    dim_out_p = _round_up(dim_out, 128)

    x_p = x.astype(cd)
    if dim_in_p != dim_in:
        x_p = jnp.pad(x_p, ((0, 0), (0, dim_in_p - dim_in)))

    # One-time wrapper-side transpose to (Din, Dout): no per-grid-step weight
    # transpose inside the kernel (weight is reused across every batch tile).
    w_t = weight.T.astype(cd)
    if (dim_in_p, dim_out_p) != (dim_in, dim_out):
        w_t = jnp.pad(w_t, ((0, dim_in_p - dim_in), (0, dim_out_p - dim_out)))

    b2d = bias.reshape(1, dim_out).astype(jnp.float32)
    if dim_out_p != dim_out:
        b2d = jnp.pad(b2d, ((0, 0), (0, dim_out_p - dim_out)))

    # --- batch tiling ---------------------------------------------------------
    x_it = jnp.dtype(cd).itemsize
    out_it = jnp.dtype(out_dtype).itemsize
    g_it = jnp.dtype(gaussian_dtype).itemsize if return_gaussian else 0
    align_dts = (cd, out_dtype) + ((gaussian_dtype,) if return_gaussian else ())
    row_align = _row_align(*align_dts)
    # Double-buffered x tile + double-buffered output tile(s).
    per_row = 2 * (dim_in_p * x_it + dim_out_p * (out_it + g_it))
    # Weight (+bias) stays VMEM-resident; budget conservatively for 2 buffers in
    # case the single-buffer request below is not honored.
    resident = 2 * (dim_in_p * dim_out_p * x_it + dim_out_p * 4)

    if block_rows is None:
        tm = _choose_block_rows(B, per_row, resident, row_align)
    else:
        tm = min(int(block_rows), B)
        if tm < B:
            tm = max(row_align, (tm // row_align) * row_align)
            tm = min(tm, B)
    grid = (pl.cdiv(B, tm),)

    footprint = tm * per_row + resident
    vmem_limit = int(
        min(_vmem_capacity_bytes(), max(32 << 20, footprint * 5 // 4 + (4 << 20)))
    )

    if return_gaussian:
        kernel = functools.partial(_siren_kernel, w0=kernel_w0)
        out_shape = (
            jax.ShapeDtypeStruct((B, dim_out_p), out_dtype),
            jax.ShapeDtypeStruct((B, dim_out_p), gaussian_dtype),
        )
    else:
        kernel = functools.partial(_siren_kernel_no_gauss, w0=kernel_w0)
        out_shape = jax.ShapeDtypeStruct((B, dim_out_p), out_dtype)

    def _call(single_buffer_params):
        const_kw = {}
        if single_buffer_params:
            # Constant-index blocks are DMA'd once; one VMEM buffer is enough.
            const_kw = dict(pipeline_mode=pl.Buffered(1))
        x_spec = pl.BlockSpec((tm, dim_in_p), lambda i: (i, 0))
        w_spec = pl.BlockSpec((dim_in_p, dim_out_p), lambda i: (0, 0), **const_kw)
        b_spec = pl.BlockSpec((1, dim_out_p), lambda i: (0, 0), **const_kw)
        o_spec = pl.BlockSpec((tm, dim_out_p), lambda i: (i, 0))
        out_specs = [o_spec, o_spec] if return_gaussian else o_spec
        return pl.pallas_call(
            kernel,
            out_shape=out_shape,
            grid_spec=pltpu.PrefetchScalarGridSpec(
                num_scalar_prefetch=0,
                grid=grid,
                in_specs=[x_spec, w_spec, b_spec],
                out_specs=out_specs,
            ),
            compiler_params=pltpu.CompilerParams(
                dimension_semantics=("parallel",),  # rows are independent
                vmem_limit_bytes=vmem_limit,
            ),
        )(x_p, w_t, b2d)

    try:
        res = _call(True)
    except Exception:
        # Pallas versions without pipeline_mode / Buffered(1) support: fall back
        # to default double-buffered constant blocks (already in the budget).
        res = _call(False)

    def _trim(a):
        return a[:, :dim_out] if dim_out_p != dim_out else a

    if return_gaussian:
        out, gauss = res
        return _trim(out), _trim(gauss)
    return _trim(res)


def init_siren_params(key, dim_in, dim_out, *, w0=1.0, c=6.0, is_first=False):
    """Matches Siren.init_ (uniform(-w_std, w_std)) in PyTorch layout."""
    w_std = (1.0 / dim_in) if is_first else (math.sqrt(c / dim_in) / w0)
    k_w, k_b = jax.random.split(key)
    weight = jax.random.uniform(
        k_w, (dim_out, dim_in), dtype=jnp.float32, minval=-w_std, maxval=w_std
    )
    bias = jax.random.uniform(
        k_b, (dim_out,), dtype=jnp.float32, minval=-w_std, maxval=w_std
    )
    return weight, bias


if __name__ == "__main__":
    key = jax.random.PRNGKey(0)
    k1, k2, k3, k4 = jax.random.split(key, 4)

    # --- Test 1: lane-dense shapes, 4 batch tiles, default bf16 MXU path -----
    B, din, dout = 384, 128, 128
    w0 = 1.0
    x = jax.random.normal(k1, (B, din), dtype=jnp.float32)
    weight, bias = init_siren_params(k2, din, dout, w0=w0)

    out, gauss = siren_forward(x, weight, bias, w0=w0)
    jax.block_until_ready((out, gauss))

    # bf16-consistent reference (operands rounded to bf16, f32 accumulation).
    xb = x.astype(jnp.bfloat16).astype(jnp.float32)
    wb = weight.astype(jnp.bfloat16).astype(jnp.float32)
    ref_g = xb @ wb.T + bias
    ref_o = jnp.sin(w0 * ref_g)
    assert jnp.allclose(gauss, ref_g, atol=2e-3, rtol=2e-3), "gaussian mismatch (bf16)"
    assert jnp.allclose(out, ref_o, atol=2e-3, rtol=2e-3), "out mismatch (bf16)"

    # --- Test 2: non-128 features (padding), partial tiles, w0 != 1, f32 path -
    # Inputs pre-rounded to bf16-representable f32 values so any matmul precision
    # mode on either side yields exact products (tight tolerances stay valid).
    B2, din2, dout2 = 100, 96, 80
    w02 = 2.0
    x2 = jax.random.normal(k3, (B2, din2), dtype=jnp.float32)
    x2 = x2.astype(jnp.bfloat16).astype(jnp.float32)
    weight2, bias2 = init_siren_params(k4, din2, dout2, w0=w02)
    weight2 = weight2.astype(jnp.bfloat16).astype(jnp.float32)

    out2, gauss2 = siren_forward(
        x2, weight2, bias2, w0=w02, compute_dtype=jnp.float32
    )
    jax.block_until_ready((out2, gauss2))
    assert out2.shape == (B2, dout2) and gauss2.shape == (B2, dout2)
    ref_g2 = x2 @ weight2.T + bias2
    ref_o2 = jnp.sin(w02 * ref_g2)
    assert jnp.allclose(gauss2, ref_g2, atol=2e-3, rtol=2e-3), "gaussian mismatch (f32)"
    assert jnp.allclose(out2, ref_o2, atol=2e-3, rtol=2e-3), "out mismatch (f32)"

    # --- Test 3: single-output fast path (gaussian dropped, w0 folded) -------
    out_only = siren_forward(
        x2, weight2, bias2, w0=w02, compute_dtype=jnp.float32, return_gaussian=False
    )
    jax.block_until_ready(out_only)
    assert jnp.allclose(out_only, ref_o2, atol=2e-3, rtol=2e-3), "out mismatch (folded)"

    # --- Test 4: tiny batch (< sublane alignment) lowers as a full block -----
    x4 = jax.random.normal(k1, (4, 32), dtype=jnp.float32)
    w4, b4 = init_siren_params(k2, 32, 48, w0=1.0)
    out4, gauss4 = siren_forward(x4, w4, b4, w0=1.0)
    jax.block_until_ready((out4, gauss4))
    xb4 = x4.astype(jnp.bfloat16).astype(jnp.float32)
    wb4 = w4.astype(jnp.bfloat16).astype(jnp.float32)
    ref_g4 = xb4 @ wb4.T + b4
    assert jnp.allclose(gauss4, ref_g4, atol=2e-3, rtol=2e-3), "gaussian mismatch (tiny)"
    assert jnp.allclose(out4, jnp.sin(ref_g4), atol=2e-3, rtol=2e-3), "out mismatch (tiny)"

    print("KERNEL_OK")
</pallas_src>

<mosaic_0001>
module attributes {stable_mosaic.version = 11 : i64} {
  func.func @_siren_kernel(%arg0: i32, %arg1: memref<96x128xbf16, #tpu.memory_space<vmem>>, %arg2: memref<128x128xbf16, #tpu.memory_space<vmem>>, %arg3: memref<1x128xf32, #tpu.memory_space<vmem>>, %arg4: memref<96x128xf32, #tpu.memory_space<vmem>>, %arg5: memref<96x128xf32, #tpu.memory_space<vmem>>) attributes {dimension_semantics = [#tpu.dimension_semantics<parallel>], iteration_bounds = array<i64: 4>, scalar_prefetch = 0 : i64, scratch_operands = 0 : i64, tpu.core_type = #tpu.core_type<tc>, window_params = [{transform_indices = @transform_0, window_bounds = array<i64: 96, 128>}, {pipeline_mode = #tpu.pipeline_mode<synchronous>, transform_indices = @transform_1, window_bounds = array<i64: 128, 128>}, {pipeline_mode = #tpu.pipeline_mode<synchronous>, transform_indices = @transform_2, window_bounds = array<i64: 1, 128>}, {transform_indices = @transform_3, window_bounds = array<i64: 96, 128>}, {transform_indices = @transform_4, window_bounds = array<i64: 96, 128>}]} {
    %c0 = arith.constant 0 : index
    %c0_0 = arith.constant 0 : index
    %0 = vector.load %arg1[%c0, %c0_0] : memref<96x128xbf16, #tpu.memory_space<vmem>>, vector<96x128xbf16>
    %c0_1 = arith.constant 0 : index
    %c0_2 = arith.constant 0 : index
    %1 = vector.load %arg2[%c0_1, %c0_2] : memref<128x128xbf16, #tpu.memory_space<vmem>>, vector<128x128xbf16>
    %cst = arith.constant dense<0.000000e+00> : vector<96x128xf32>
    %2 = tpu.matmul %0, %1, %cst {dimension_numbers = #tpu.dot_dimension_numbers<[1], [0], [0], [1], [0, 0, 1, 1], [], []>} : vector<96x128xbf16>, vector<128x128xbf16>, vector<96x128xf32> -> vector<96x128xf32>
    %c0_3 = arith.constant 0 : index
    %c0_4 = arith.constant 0 : index
    %3 = vector.load %arg3[%c0_3, %c0_4] : memref<1x128xf32, #tpu.memory_space<vmem>>, vector<1x128xf32>
    %4 = vector.broadcast %3 : vector<1x128xf32> to vector<96x128xf32>
    %5 = arith.addf %2, %4 : vector<96x128xf32>
    %c0_5 = arith.constant 0 : index
    %c0_6 = arith.constant 0 : index
    %6 = vector.load %arg5[%c0_5, %c0_6] : memref<96x128xf32, #tpu.memory_space<vmem>>, vector<96x128xf32>
    tpu.vector_store %arg5[%c0_5, %c0_6], %5 {strides = array<i32>} : memref<96x128xf32, #tpu.memory_space<vmem>>, vector<96x128xf32>,
    %7 = math.sin %5 : vector<96x128xf32>
    %c0_7 = arith.constant 0 : index
    %c0_8 = arith.constant 0 : index
    %8 = vector.load %arg4[%c0_7, %c0_8] : memref<96x128xf32, #tpu.memory_space<vmem>>, vector<96x128xf32>
    tpu.vector_store %arg4[%c0_7, %c0_8], %7 {strides = array<i32>} : memref<96x128xf32, #tpu.memory_space<vmem>>, vector<96x128xf32>,
    return
  }
  func.func @transform_0(%arg0: i32) -> (i32, i32) {
    %c0_i32 = arith.constant 0 : i32
    %c0_i32_0 = arith.constant 0 : i32
    return %arg0, %c0_i32 : i32, i32
  }
  func.func @transform_1(%arg0: i32) -> (i32, i32) {
    %c0_i32 = arith.constant 0 : i32
    %c0_i32_0 = arith.constant 0 : i32
    %c0_i32_1 = arith.constant 0 : i32
    return %c0_i32, %c0_i32_0 : i32, i32
  }
  func.func @transform_2(%arg0: i32) -> (i32, i32) {
    %c0_i32 = arith.constant 0 : i32
    %c0_i32_0 = arith.constant 0 : i32
    %c0_i32_1 = arith.constant 0 : i32
    return %c0_i32, %c0_i32_0 : i32, i32
  }
  func.func @transform_3(%arg0: i32) -> (i32, i32) {
    %c0_i32 = arith.constant 0 : i32
    %c0_i32_0 = arith.constant 0 : i32
    return %arg0, %c0_i32 : i32, i32
  }
  func.func @transform_4(%arg0: i32) -> (i32, i32) {
    %c0_i32 = arith.constant 0 : i32
    %c0_i32_0 = arith.constant 0 : i32
    return %arg0, %c0_i32 : i32, i32
  }
}

module attributes {stable_mosaic.version = 11 : i64} {
  func.func @_siren_kernel(%arg0: i32, %arg1: memref<96x128xbf16, #tpu.memory_space<vmem>>, %arg2: memref<128x128xbf16, #tpu.memory_space<vmem>>, %arg3: memref<1x128xf32, #tpu.memory_space<vmem>>, %arg4: memref<96x128xf32, #tpu.memory_space<vmem>>, %arg5: memref<96x128xf32, #tpu.memory_space<vmem>>) attributes {dimension_semantics = [#tpu.dimension_semantics<parallel>], iteration_bounds = array<i64: 4>, scalar_prefetch = 0 : i64, scratch_operands = 0 : i64, tpu.core_type = #tpu.core_type<tc>, window_params = [{transform_indices = @transform_0, window_bounds = array<i64: 96, 128>}, {pipeline_mode = #tpu.pipeline_mode<synchronous>, transform_indices = @transform_1, window_bounds = array<i64: 128, 128>}, {pipeline_mode = #tpu.pipeline_mode<synchronous>, transform_indices = @transform_2, window_bounds = array<i64: 1, 128>}, {transform_indices = @transform_3, window_bounds = array<i64: 96, 128>}, {transform_indices = @transform_4, window_bounds = array<i64: 96, 128>}]} {
    %c0 = arith.constant 0 : index
    %c0_0 = arith.constant 0 : index
    %0 = vector.load %arg1[%c0, %c0_0] : memref<96x128xbf16, #tpu.memory_space<vmem>>, vector<96x128xbf16>
    %c0_1 = arith.constant 0 : index
    %c0_2 = arith.constant 0 : index
    %1 = vector.load %arg2[%c0_1, %c0_2] : memref<128x128xbf16, #tpu.memory_space<vmem>>, vector<128x128xbf16>
    %cst = arith.constant dense<0.000000e+00> : vector<96x128xf32>
    %2 = tpu.matmul %0, %1, %cst {dimension_numbers = #tpu.dot_dimension_numbers<[1], [0], [0], [1], [0, 0, 1, 1], [], []>} : vector<96x128xbf16>, vector<128x128xbf16>, vector<96x128xf32> -> vector<96x128xf32>
    %c0_3 = arith.constant 0 : index
    %c0_4 = arith.constant 0 : index
    %3 = vector.load %arg3[%c0_3, %c0_4] : memref<1x128xf32, #tpu.memory_space<vmem>>, vector<1x128xf32>
    %4 = vector.broadcast %3 : vector<1x128xf32> to vector<96x128xf32>
    %5 = arith.addf %2, %4 : vector<96x128xf32>
    %c0_5 = arith.constant 0 : index
    %c0_6 = arith.constant 0 : index
    %6 = vector.load %arg5[%c0_5, %c0_6] : memref<96x128xf32, #tpu.memory_space<vmem>>, vector<96x128xf32>
    tpu.vector_store %arg5[%c0_5, %c0_6], %5 {strides = array<i32>} : memref<96x128xf32, #tpu.memory_space<vmem>>, vector<96x128xf32>,
    %7 = math.sin %5 : vector<96x128xf32>
    %c0_7 = arith.constant 0 : index
    %c0_8 = arith.constant 0 : index
    %8 = vector.load %arg4[%c0_7, %c0_8] : memref<96x128xf32, #tpu.memory_space<vmem>>, vector<96x128xf32>
    tpu.vector_store %arg4[%c0_7, %c0_8], %7 {strides = array<i32>} : memref<96x128xf32, #tpu.memory_space<vmem>>, vector<96x128xf32>,
    return
  }
  func.func @transform_0(%arg0: i32) -> (i32, i32) {
    %c0_i32 = arith.constant 0 : i32
    %c0_i32_0 = arith.constant 0 : i32
    return %arg0, %c0_i32 : i32, i32
  }
  func.func @transform_1(%arg0: i32) -> (i32, i32) {
    %c0_i32 = arith.constant 0 : i32
    %c0_i32_0 = arith.constant 0 : i32
    %c0_i32_1 = arith.constant 0 : i32
    return %c0_i32, %c0_i32_0 : i32, i32
  }
  func.func @transform_2(%arg0: i32) -> (i32, i32) {
    %c0_i32 = arith.constant 0 : i32
    %c0_i32_0 = arith.constant 0 : i32
    %c0_i32_1 = arith.constant 0 : i32
    return %c0_i32, %c0_i32_0 : i32, i32
  }
  func.func @transform_3(%arg0: i32) -> (i32, i32) {
    %c0_i32 = arith.constant 0 : i32
    %c0_i32_0 = arith.constant 0 : i32
    return %arg0, %c0_i32 : i32, i32
  }
  func.func @transform_4(%arg0: i32) -> (i32, i32) {
    %c0_i32 = arith.constant 0 : i32
    %c0_i32_0 = arith.constant 0 : i32
    return %arg0, %c0_i32 : i32, i32
  }
}

</mosaic_0001>

<bundles_post_ra>
// kernel: tpu_custom_call.1
= control target key start
LH: loop header
LB: loop body
LE: loop exit
PB: predicated region body
PF: predicated region fallthrough
CT: control target
= control target key end

     0   :  { %10 = vsyncpa [#allocation3], 0  ;;  %s3513_s0 = inlined_call_operand.hbm [shape: bf16[384,128], index: 0, kind: input, shape index: {}]   ;;  %s3514_s1 = inlined_call_operand.hbm [shape: bf16[128,128], index: 1, kind: input, shape index: {}]   ;;  %s3515_s2 = inlined_call_operand.vmem [shape: f32[1,128], index: 2, kind: input, shape index: {}]   ;;  %s3516_s3 = inlined_call_operand.hbm [shape: f32[384,128], index: 3, kind: output, shape index: {0}]   ;;  %s3517_s4 = inlined_call_operand.hbm [shape: f32[384,128], index: 4, kind: output, shape index: {1}]  }
   0x1   :  { %12 = vsyncpa [#allocation3 + $0x1], 0 }
   0x2   :  { %13 = vsyncpa [#allocation6], 0 }
   0x3   :  { %14 = vsyncpa [#allocation4], 0 }
   0x4   :  { %16 = vsyncpa [#allocation4 + $0x1], 0 }
   0x5   :  { %17 = vsyncpa [#allocation9], 0 }
   0x6   :  { %19 = vsyncpa [#allocation9 + $0x1], 0  ;;  %s2385_s15 = smov 0   ;;  %s2387_s16 = smov 0  }
   0x7   :  { %s2389_s17 = smov 0   ;;  %s2391_s18 = smov 0  }
   0x8 LB: > { %s2406_s19 = sadd.s32 4294967295, %s2344_s18   ;;  %s1868_s20 = sadd.s32 4294967294, %s2344_s18   ;;  %s2344_s18 = sphi %s2391_s18, %s3558_s18   ;;  %s2340_s17 = sphi %s2389_s17, %s3557_s17   ;;  %s2336_s16 = sphi %s2387_s16, %s3556_s16   ;;  %s2332_s15 = sphi %s2385_s15, %s3555_s15  }
   0x9   : > { %p45_p0 = scmp.ne.s32.totalorder %s2336_s16, %s2332_s15  ;;  %p3518_p1 = scmp.eq.s32.totalorder %s2406_s19, 0 }
   0xa   : > { %p117_p3 = scmp.eq.s32.totalorder %s1868_s20, 3  ;;  %p1869_p5 = scmp.ge.s32.totalorder %s2344_s18, 1 }
   0xb   : > { %p2415_p4 = por %p3518_p1, %p45_p0  ;;  %p150_p7 = scmp.lt.s32.totalorder %s2344_s18, 5 }
   0xc   : > { %p2420_p6 = por %p117_p3, %p45_p0  ;;  %s2346_s24 = smov [#allocation5]  }
   0xd   : > { %s3522_s21 = scalar_select %p2415_p4, 1, 0 }
   0xe   : > { %s3523_s22 = scalar_select %p2420_p6, 1, 0 }
   0xf   : > { %p2425_p8 = pnand %p1869_p5, %p150_p7  ;;  %s162_s25 = sshll.u32 %s2346_s24, 4  ;;  %s163_s25 = int_to_ptr.vmem [resolvable:$true] %s162_s25 }
  0x10   : > { %s2438_s27 = sadd.s32 1, %s2344_s18   ;;  %s32_s28 = sadd.s32 1, %s2340_s17 }
  0x11   : > { %s3524_s23 = scalar_select %p2425_p8, 1, 0 }
  0x12   : > { %p2064_p9 = pneg %p2425_p8  ;;  %s29_s29 = ssub.s32 %s2344_s18, %s2438_s27 }
  0x13   : > { %s2203_s30 = scalar_lea.vmem %s163_s25, 1024  ;;  %p2211_p3 = scmp.lt.s32.totalorder %s163_s25, %s163_s25 }
  0x14   : > { %p2433_p10 = pnand %p2064_p9, %p3518_p1  ;;  %p2204_p12 = scmp.ne.s32.totalorder %s163_s25, %s2203_s30 }
  0x15   : > { %p2212_p5 = scmp.lt.s32.totalorder %s2203_s30, %s2203_s30 }
  0x16   : > { %p2194_p11 = pneg %p2433_p10 }
  0x17   : > { %p2213_p7 = por %p2212_p5, %p2211_p3 }
  0x18   : > { %p2206_p13 = pnand %p2204_p12, %p2194_p11 }
  0x1a   : > { %p2207_p0 = pneg %p2206_p13 }
  0x1c   : > { %p2214_p2 = pnand %p2213_p7, %p2207_p0 }
  0x1e   : > { %2217 = shalt.err (!%p2214_p2)
}
  0x1f   : > { %s2347_s5 = smov 64   ;;  %s2348_s6 = smov 4  }
  0x20   : > { %2067 = dma.hbm_to_vmem [thread:$0]  (!%p2433_p10), %s3514_s1, 1024, %s163_s25, [#allocation6], %s2347_s5, %s2347_s5, %s2348_s6  }
  0x21   : > { %p30_p2 = scmp.eq.s32.totalorder %s29_s29, 0  ;;  %p39_p9 = scmp.ne.s32.totalorder %s2340_s17, %s2336_s16 }
  0x22   : > { %p40_p11 = scmp.eq.s32.totalorder %s2344_s18, 0  ;;  %p2080_p12 = scmp.lt.s32.totalorder %s2344_s18, 4 }
  0x23   : > { %s2458_s9 = scalar_select %p30_p2, %s2340_s17, %s32_s28  }
  0x24   : > { %p41_p13 = por %p40_p11, %p39_p9  ;;  %p3526_p0 = scmp.eq.s32.totalorder %s2406_s19, 3 }
  0x25   : > { %s179_s11 = sand.u32 1, %s2340_s17   ;;  %s1942_s12 = smul.u32 768, %s2344_s18 }
  0x26   : > { %p2462_p3 = por %p3526_p0, %p39_p9  ;;  %s2003_s13 = smul.u32 48, %s179_s11 }
  0x27   : > { %p2468_p5 = pnand %p2080_p12, %p41_p13  ;;  %s2475_s25 = scalar_lea.hbm %s3513_s0, %s1942_s12 }
  0x28   : > { %s3527_s10 = scalar_select %p2462_p3, 1, 0 }
  0x29   : > { %s183_s26 = scalar_lea.vmem [#allocation2], %s2003_s13  ;;  %s2479_s29 = scalar_lea.sflag [#allocation3], %s179_s11 }
  0x2a   : > { %s190_s28 = sshll.u32 %s183_s26, 4  ;;  %s2218_s30 = scalar_lea.hbm %s2475_s25, 768  ;;  %s2477_s28 = int_to_ptr.vmem [resolvable:$true] %s190_s28 }
  0x2b   : > { %p2219_p10 = scmp.ne.s32.totalorder %s2475_s25, %s2218_s30  ;;  %p2220_p7 = pneg %p2468_p5 }
  0x2c   : > { %s2223_s12 = scalar_lea.hbm %s3513_s0, 3072  ;;  %p2224_p11 = scmp.lt.s32.totalorder %s2475_s25, %s3513_s0 }
  0x2d   : > { %p2221_p2 = pnand %p2220_p7, %p2219_p10  ;;  %p2225_p12 = scmp.lt.s32.totalorder %s2223_s12, %s2218_s30 }
  0x2f   : > { %p2222_p9 = pneg %p2221_p2  ;;  %p2226_p13 = por %p2225_p12, %p2224_p11 }
  0x31   : > { %p2227_p0 = pnand %p2226_p13, %p2222_p9 }
  0x33   : > { %2230 = shalt.err (!%p2227_p0)
}
  0x34   : > { %s2231_s11 = scalar_lea.vmem %s2477_s28, 768  ;;  %s2349_s13 = smov [#allocation2]  }
  0x35   : > { %p2232_p1 = scmp.ne.s32.totalorder %s2477_s28, %s2231_s11  ;;  %s2236_s26 = sshll.u32 %s2349_s13, 4  ;;  %s2237_s26 = int_to_ptr.vmem [resolvable:$false] %s2236_s26 }
  0x36   : > { %s2238_s7 = scalar_lea.vmem %s2237_s26, 1536  ;;  %p2239_p2 = scmp.lt.s32.totalorder %s2477_s28, %s2237_s26 }
  0x37   : > { %p2234_p6 = pnand %p2232_p1, %p2220_p7  ;;  %p2240_p3 = scmp.lt.s32.totalorder %s2238_s7, %s2231_s11 }
  0x39   : > { %p2235_p10 = pneg %p2234_p6  ;;  %p2241_p4 = por %p2240_p3, %p2239_p2 }
  0x3b   : > { %p2242_p8 = pnand %p2241_p4, %p2235_p10 }
  0x3d   : > { %2245 = shalt.err (!%p2242_p8)
}
  0x3e   : > { %2071 = dma.hbm_to_vmem [thread:$0]  (!%p2468_p5), %s2475_s25, 768, %s2477_s28, %s2479_s29, %s2347_s5, %s2347_s5, %s2348_s6  }
  0x3f   : > { %p3529_p1 = scmp.ne.s32.totalorder %s3524_s23, 0 }
  0x40   : > { %s2506_s30 = sand.u32 (!%p3529_p1), 1, %s2336_s16   ;;  %p3530_p4 = scmp.ne.s32.totalorder (!%p3529_p1), %s3522_s21, 0 }
  0x41   : > { %202 = sbr.rel (%p3529_p1) target bundleno = 662 (0x296), region = 32  ;;  %s205_s12 = scalar_lea.sflag (!%p3529_p1), [#allocation3], %s2506_s30 }
  0x42   : > { %s2004_s8 = smul.u32 (!%p3529_p1), 48, %s2506_s30 }
  0x44   : > { %s2510_s20 = scalar_lea.vmem (!%p3529_p1), [#allocation2], %s2004_s8 }
  0x46   : > { %2315 = dma.done.wait (%p3530_p4), %s205_s12, 768  }
  0x47   : > { %2317 = vsyncadd (%p3530_p4), %s205_s12, 4294966528  ;;  %p3531_p6 = scmp.eq.s32.totalorder %s2406_s19, 0 }
  0x49   : > { %2319 = dma.done.wait (%p3531_p6), [#allocation6], 1024   ;;  %p3532_p8 = pmov %p3531_p6 }
  0x4a   : > { %v2126_v0 = vld [vmem:[#allocation5 + $0x38] sm:$0xff]   ;;  %v2127_v1 = vld [vmem:[#allocation5 + $0x30] sm:$0xff]   ;;  %v2128_v2 = vld [vmem:[#allocation5 + $0x28] sm:$0xff]   ;;  %s2005_s21 = smul.u32 96, %s2506_s30  ;;  %v2350_v49 = vmov 683565275  }
  0x4b   : > { %2321 = vsyncadd (%p3532_p8), [#allocation6], 4294966272  ;;  %1959 = vmatprep.subr.bf16.mxu0 %v2126_v0  ;;  %1987 = vmatprep.subr.bf16.mxu1 %v2126_v0  ;;  %v2129_v3 = vld [vmem:[#allocation5 + $0x20] sm:$0xff]   ;;  %v2130_v6 = vld [vmem:[#allocation5 + $0x18] sm:$0xff]   ;;  %v2351_v51 = vmov 2475754826  }
  0x4c   : > { %1960 = vmatpush3.bf16.msra.mxu0 %v2126_v0  ;;  %1995 = vmatpush3.bf16.msra.mxu1 %v2126_v0  ;;  %v2134_v4 = vld [vmem:[%s2510_s20] sm:$0xff]   ;;  %v2135_v5 = vld [vmem:[%s2510_s20 + $0x10] sm:$0xff]   ;;  %v2132_v8 = vld [vmem:[#allocation5 + $0x8] sm:$0xff]   ;;  %s2540_s6 = scalar_lea.vmem [#allocation8], %s2005_s21  ;;  %v2352_v53 = vmov 2131351028  }
  0x4d   : > { %1961 = vmatprep.subr.bf16.mxu0 %v2127_v1  ;;  %1988 = vmatprep.subr.bf16.mxu1 %v2127_v1  ;;  %v2131_v7 = vld [vmem:[#allocation5 + $0x10] sm:$0xff]   ;;  %v2133_v9 = vld [vmem:[#allocation5] sm:$0xff]   ;;  %v2136_v10 = vld [vmem:[%s2510_s20 + $0x8] sm:$0xff]   ;;  %v2353_v55 = vmov 2102212464   ;;  %s2858_s14 = scalar_lea.vmem [#allocation7], %s2005_s21 }
  0x4e   : > { %1975 = vmatprep.mubr.bf16.mxu0 %v2134_v4  ;;  %1979 = vmatprep.mubr.bf16.mxu1 %v2135_v5  ;;  %v2137_v11 = vld [vmem:[%s2510_s20 + $0x18] sm:$0xff]   ;;  %v2138_v12 = vld [vmem:[%s2510_s20 + $0x20] sm:$0xff]   ;;  %v2139_v13 = vld [vmem:[%s2510_s20 + $0x28] sm:$0xff]   ;;  %v2354_v57 = vmov 920167782   ;;  %s1943_s29 = smul.u32 1536, %s2406_s19 }
  0x4f   : > { %v2530_v14 = vld [vmem:[%s3515_s2] ss:$0 sm:$0xff]  ;;  %s1753_s24 = sshll.u32 %s2540_s6, 4  ;;  %s1724_s7 = scalar_lea.sflag [#allocation9], %s2506_s30  ;;  %s3287_s24 = int_to_ptr.vmem [resolvable:$true] %s1753_s24 }
  0x50   : > { %1962 = vmatpush3.bf16.msra.mxu0 %v2127_v1  ;;  %1996 = vmatpush3.bf16.msra.mxu1 %v2127_v1  ;;  %v2355_v1 = vmov 1326507024   ;;  %s3285_s26 = scalar_lea.hbm %s3517_s4, %s1943_s29  ;;  %s2246_s8 = scalar_lea.vmem %s3287_s24, 1536 }
  0x51   : > { %1963 = vmatprep.subr.bf16.mxu0 %v2128_v2  ;;  %1989 = vmatprep.subr.bf16.mxu1 %v2128_v2  ;;  %p2247_p3 = scmp.ne.s32.totalorder %s3287_s24, %s2246_s8  ;;  %p3549_p5 = scmp.ne.s32.totalorder %s3527_s10, 0 }
  0x52   : > { %s2356_s12 = smov [#allocation8]  }
  0x53   : > { %p2248_p7 = pnand %p2247_p3, %p3549_p5  ;;  %s2250_s20 = sshll.u32 %s2356_s12, 4  ;;  %s2251_s20 = int_to_ptr.vmem [resolvable:$false] %s2250_s20 }
  0x54   : > { %1964 = vmatpush3.bf16.msra.mxu0 %v2128_v2  ;;  %1997 = vmatpush3.bf16.msra.mxu1 %v2128_v2  ;;  %s2252_s21 = scalar_lea.vmem %s2251_s20, 3072  ;;  %p2253_p11 = scmp.lt.s32.totalorder %s3287_s24, %s2251_s20 }
  0x55   : > { %1965 = vmatprep.subr.bf16.mxu0 %v2129_v3  ;;  %1990 = vmatprep.subr.bf16.mxu1 %v2129_v3  ;;  %p2249_p9 = pneg %p2248_p7  ;;  %p2254_p12 = scmp.lt.s32.totalorder %s2252_s21, %s2246_s8 }
  0x57   : > { %p2255_p13 = por %p2254_p12, %p2253_p11 }
  0x58   : > { %1966 = vmatpush3.bf16.msra.mxu0 %v2129_v3  ;;  %1998 = vmatpush3.bf16.msra.mxu1 %v2129_v3 }
  0x59   : > { %1967 = vmatprep.subr.bf16.mxu0 %v2130_v6  ;;  %1991 = vmatprep.subr.bf16.mxu1 %v2130_v6  ;;  %p2256_p0 = pnand %p2255_p13, %p2249_p9 }
  0x5c   : > { %1968 = vmatpush3.bf16.msra.mxu0 %v2130_v6  ;;  %1999 = vmatpush3.bf16.msra.mxu1 %v2130_v6 }
  0x5d   : > { %1969 = vmatprep.subr.bf16.mxu0 %v2131_v7  ;;  %1992 = vmatprep.subr.bf16.mxu1 %v2131_v7 }
  0x60   : > { %1970 = vmatpush3.bf16.msra.mxu0 %v2131_v7  ;;  %2000 = vmatpush3.bf16.msra.mxu1 %v2131_v7 }
  0x61   : > { %1971 = vmatprep.subr.bf16.mxu0 %v2132_v8  ;;  %1993 = vmatprep.subr.bf16.mxu1 %v2132_v8 }
  0x64   : > { %1972 = vmatpush3.bf16.msra.mxu0 %v2132_v8  ;;  %2001 = vmatpush3.bf16.msra.mxu1 %v2132_v8 }
  0x65   : > { %1973 = vmatprep.subr.bf16.mxu0 %v2133_v9  ;;  %1994 = vmatprep.subr.bf16.mxu1 %v2133_v9 }
  0x68   : > { %1974 = vmatpush3.bf16.msra.mxu0 %v2133_v9  ;;  %2002 = vmatpush3.bf16.msra.mxu1 %v2133_v9 }
  0x6b   : > { %1976 = vmatmul.mubr.bf16.vlgmr.msra.gmra.mxu0 %v2136_v10  ;;  %1980 = vmatmul.mubr.bf16.vlgmr.msra.gmra.mxu1 %v2137_v11 }
  0x6c   : > { %1983 = vmatprep.mubr.bf16.mxu1 %v2138_v12 }
  0x73   : > { %1984 = vmatmul.mubr.bf16.gmra.mxu1 %v2139_v13 }
 0x12b   : > { %v1977_v15 = vpop.f32.mrf.mxu0  ;;  %v1981_v16 = vpop.f32.mrf.mxu1 }
 0x12c   : > { %v2533_v17 = vadd.f32 %v1977_v15, %v2530_v14  ;;  %v2536_v18 = vadd.f32 %v1981_v16, %v2530_v14 }
 0x12d   : > { %v399_v19 = vpop.f32.mrf.mxu0  ;;  %v415_v22 = vpop.f32.mrf.mxu1 }
 0x12e   : > { %448 = vst [vmem:[%s2540_s6 + $0x10] sm:$0xff] %v2533_v17  ;;  %v666_v20 = vand.u32 2147483647, %v2533_v17  ;;  %v669_v21 = vand.u32 2139095040, %v2533_v17  ;;  %452 = vst [vmem:[%s2540_s6 + $0x30] sm:$0xff] %v2536_v18  ;;  %v1085_v24 = vand.u32 2139095040, %v2536_v18  ;;  %v2551_v26 = vadd.f32 %v2530_v14, %v399_v19 }
 0x12f   : > { %v1082_v23 = vand.u32 2147483647, %v2536_v18  ;;  %v2558_v30 = vadd.f32 %v2530_v14, %v415_v22  ;;  %vm668_vm13 = vcmp.lt.s32.totalorder %v2533_v17, 0 }
 0x130   : > { %v670_v25 = vshrl.u32 %v669_v21, 23  ;;  %v673_v27 = vand.u32 8388607, %v666_v20  ;;  %v1086_v28 = vshrl.u32 %v1085_v24, 23  ;;  %446 = vst [vmem:[%s2540_s6] sm:$0xff] %v2551_v26  ;;  %v461_v33 = vand.u32 2139095040, %v2551_v26 }
 0x131   : > { %v1089_v29 = vand.u32 8388607, %v1082_v23  ;;  %450 = vst [vmem:[%s2540_s6 + $0x20] sm:$0xff] %v2558_v30  ;;  %v458_v43 = vand.u32 2147483647, %v2551_v26 }
 0x132   : > { %v1898_v31 = vadd.s32 4294967169, %v670_v25  ;;  %v1914_v32 = vadd.s32 4294967169, %v1086_v28  ;;  %v674_v35 = vor.u32 8388608, %v673_v27  ;;  %v462_v38 = vshrl.u32 %v461_v33, 23 }
 0x133   : > { %v1090_v36 = vor.u32 8388608, %v1089_v29  ;;  %vm2686_vm14 = vcmp.le.f32.partialorder %v666_v20, 0.7853982 }
 0x134   : > { %v676_v34 = vadd.s32 1, %v1898_v31  ;;  %v1092_v37 = vadd.s32 1, %v1914_v32  ;;  %v2566_v44 = vshll.u32 %v674_v35, 8  ;;  %v1890_v47 = vadd.s32 4294967169, %v462_v38 }
 0x135   : > { %v2570_v46 = vshll.u32 %v1090_v36, 8 }
 0x136   : > { %vm677_vm0 = vcmp.gt.s32.totalorder %v676_v34, 0  ;;  %vm1093_vm1 = vcmp.gt.s32.totalorder %v1092_v37, 0  ;;  %v468_v9 = vadd.s32 1, %v1890_v47 }
 0x137   : > { %v678_v39 = vsel %vm677_vm0, %v676_v34, 0  ;;  %v1094_v42 = vsel %vm1093_vm1, %v1092_v37, 0 }
 0x138   : > { %v679_v40 = vshrl.u32 %v678_v39, 5  ;;  %v680_v41 = vand.u32 31, %v678_v39  ;;  %v2568_v45 = vand.u32 31, %v1094_v42  ;;  %v2577_v59 = vshrl.u32 %v1094_v42, 5 }
 0x139   : > { %vm469_vm11 = vcmp.gt.s32.totalorder %v468_v9, 0 }
 0x13a   : > { %v681_v48 = vsub.s32 32, %v680_v41  ;;  %v683_v50 = vshll.u32 %v2350_v49, %v680_v41  ;;  %v686_v52 = vshll.u32 %v2351_v51, %v680_v41  ;;  %v689_v54 = vshll.u32 %v2352_v53, %v680_v41 }
 0x13b   : > { %v692_v56 = vshll.u32 %v2353_v55, %v680_v41  ;;  %v695_v58 = vshll.u32 %v2354_v57, %v680_v41  ;;  %vm698_vm2 = vcmp.lt.s32.totalorder %v679_v40, 1  ;;  %vm700_vm3 = vcmp.lt.s32.totalorder %v679_v40, 3 }
 0x13c   : > { %v682_v60 = vshrl.u32 %v2350_v49, %v681_v48  ;;  %v684_v61 = vshrl.u32 %v2351_v51, %v681_v48  ;;  %v687_v62 = vshrl.u32 %v2352_v53, %v681_v48  ;;  %v690_v63 = vshrl.u32 %v2353_v55, %v681_v48 }
 0x13d   : > { %v693_v0 = vshrl.u32 %v2354_v57, %v681_v48  ;;  %v696_v2 = vshrl.u32 %v2355_v1, %v681_v48  ;;  %vm701_vm4 = vcmp.lt.s32.totalorder %v679_v40, 4  ;;  %v1097_v6 = vsub.s32 32, %v2568_v45 }
 0x13e   : > { %v685_v3 = vor.u32 %v684_v61, %v683_v50  ;;  %v688_v4 = vor.u32 %v687_v62, %v686_v52  ;;  %v691_v5 = vor.u32 %v690_v63, %v689_v54  ;;  %vm699_vm5 = vcmp.lt.s32.totalorder %v679_v40, 2 }
 0x13f   : > { %v694_v7 = vor.u32 %v693_v0, %v692_v56  ;;  %v697_v8 = vor.u32 %v696_v2, %v695_v58  ;;  %v1099_v21 = vshll.u32 %v2350_v49, %v2568_v45  ;;  %v1100_v25 = vshrl.u32 %v2351_v51, %v1097_v6 }
 0x140   : > { %v702_v10 = vsel %vm698_vm2, %v682_v60, %v685_v3  ;;  %v703_v11 = vsel %vm701_vm4, %v691_v5, 2102212464  ;;  %v706_v12 = vsel %vm698_vm2, %v685_v3, %v688_v4  ;;  %v710_v13 = vsel %vm698_vm2, %v688_v4, %v691_v5 }
 0x141   : > { %v704_v15 = vsel %vm700_vm3, %v688_v4, %v703_v11  ;;  %v707_v16 = vsel %vm701_vm4, %v694_v7, 920167782  ;;  %v711_v19 = vsel %vm701_vm4, %v697_v8, 1326507024  ;;  %v1102_v27 = vshll.u32 %v2351_v51, %v2568_v45 }
 0x142   : > { %v708_v22 = vsel %vm700_vm3, %v691_v5, %v707_v16  ;;  %v712_v24 = vsel %vm700_vm3, %v694_v7, %v711_v19  ;;  %v705_v28 = vsel %vm699_vm5, %v702_v10, %v704_v15  ;;  %v1103_v32 = vshrl.u32 %v2352_v53, %v1097_v6  ;;  %v1982_v15 = vpop.f32.mrf.mxu1 }
 0x143   : > { %v709_v29 = vsel %vm699_vm5, %v706_v12, %v708_v22  ;;  %v713_v31 = vsel %vm699_vm5, %v710_v13, %v712_v24  ;;  %v1101_v37 = vor.u32 %v1100_v25, %v1099_v21  ;;  %v1105_v39 = vshll.u32 %v2352_v53, %v2568_v45  ;;  %v1978_v13 = vpop.f32.mrf.mxu0 }
 0x144   : > { %v2602_v33 = vmul.u32.u64.low %v2566_v44, %v713_v31  ;;  %v2603_v34 = vmul.u32.u64.high %v2566_v44, %v713_v31, %v2602_v33  ;;  %v2606_v35 = vmul.u32.u64.low %v2566_v44, %v709_v29  ;;  %v2607_v36 = vmul.u32.u64.high %v2566_v44, %v709_v29, %v2606_v35 }
 0x145   : > { %v1104_v38 = vor.u32 %v1103_v32, %v1102_v27  ;;  %v1106_v41 = vshrl.u32 %v2353_v55, %v1097_v6  ;;  %v1098_v40 = vshrl.u32 %v2350_v49, %v1097_v6  ;;  %v1108_v42 = vshll.u32 %v2353_v55, %v2568_v45 }
 0x146   : > { %v1109_v47 = vshrl.u32 %v2354_v57, %v1097_v6  ;;  %v1112_v48 = vshrl.u32 %v2355_v1, %v1097_v6  ;;  %v721_v50 = vmul.u32 %v2566_v44, %v705_v28  ;;  %v1111_v54 = vshll.u32 %v2354_v57, %v2568_v45 }
 0x147   : > { %v1107_v52 = vor.u32 %v1106_v41, %v1105_v39  ;;  %vm1114_vm6 = vcmp.lt.s32.totalorder %v2577_v59, 1  ;;  %vm723_vm7 = vc.u32 %v2603_v34, %v2606_v35  ;;  %v724_v56 = vadd.s32 1, %v2607_v36 }
 0x148   : > { %v1110_v58 = vor.u32 %v1109_v47, %v1108_v42  ;;  %vm1115_vm8 = vcmp.lt.s32.totalorder %v2577_v59, 2  ;;  %v1113_v60 = vor.u32 %v1112_v48, %v1111_v54  ;;  %vm1116_vm9 = vcmp.lt.s32.totalorder %v2577_v59, 3 }
 0x149   : > { %vm1117_vm10 = vcmp.lt.s32.totalorder %v2577_v59, 4  ;;  %v1122_v44 = vsel %vm1114_vm6, %v1101_v37, %v1104_v38  ;;  %v725_v61 = vsel %vm723_vm7, %v724_v56, %v2607_v36  ;;  %v1126_v63 = vsel %vm1114_vm6, %v1104_v38, %v1107_v52 }
 0x14a   : > { %v1119_v62 = vsel %vm1117_vm10, %v1107_v52, 2102212464  ;;  %v1123_v45 = vsel %vm1117_vm10, %v1110_v58, 920167782  ;;  %v726_v0 = vadd.s32 %v725_v61, %v721_v50  ;;  %v1118_v2 = vsel %vm1114_vm6, %v1098_v40, %v1101_v37 }
 0x14b   : > { %v1124_v3 = vsel %vm1116_vm9, %v1107_v52, %v1123_v45  ;;  %v1127_v4 = vsel %vm1117_vm10, %v1113_v60, 1326507024  ;;  %v1120_v5 = vsel %vm1116_vm9, %v1104_v38, %v1119_v62  ;;  %v470_v21 = vsel %vm469_vm11, %v468_v9, 0 }
 0x14c   : > { %v1125_v6 = vsel %vm1115_vm8, %v1122_v44, %v1124_v3  ;;  %v1128_v7 = vsel %vm1116_vm9, %v1110_v58, %v1127_v4  ;;  %v727_v8 = vadd.s32 536870912, %v726_v0  ;;  %v1121_v24 = vsel %vm1115_vm8, %v1118_v2, %v1120_v5 }
 0x14d   : > { %v1129_v10 = vsel %vm1115_vm8, %v1126_v63, %v1128_v7  ;;  %v2634_v11 = vmul.u32.u64.low %v2570_v46, %v1125_v6  ;;  %v2635_v12 = vmul.u32.u64.high %v2570_v46, %v1125_v6, %v2634_v11  ;;  %v472_v25 = vand.u32 31, %v470_v21 }
 0x14e   : > { %v2639_v16 = vmul.u32.u64.low %v2570_v46, %v1129_v10  ;;  %v2640_v19 = vmul.u32.u64.high %v2570_v46, %v1129_v10, %v2639_v16  ;;  %v728_v22 = vshrl.u32 %v727_v8, 30  ;;  %v465_v27 = vand.u32 8388607, %v458_v43 }
 0x14f   : > { %v2647_v28 = vadd.f32 %v1978_v13, %v2530_v14  ;;  %v2650_v29 = vadd.f32 %v1982_v15, %v2530_v14  ;;  %v1140_v32 = vadd.s32 1, %v2635_v12  ;;  %v1137_v33 = vmul.u32 %v2570_v46, %v1121_v24 }
 0x150   : > { %v729_v31 = vshll.u32 %v728_v22, 30  ;;  %vm1139_vm12 = vc.u32 %v2640_v19, %v2634_v11  ;;  %v473_v59 = vsub.s32 32, %v472_v25  ;;  %v466_v38 = vor.u32 8388608, %v465_v27 }
 0x151   : > { %449 = vst [vmem:[%s2540_s6 + $0x18] sm:$0xff] %v2647_v28  ;;  %453 = vst [vmem:[%s2540_s6 + $0x38] sm:$0xff] %v2650_v29  ;;  %v1141_v36 = vsel %vm1139_vm12, %v1140_v32, %v2635_v12  ;;  %v877_v39 = vand.u32 2139095040, %v2558_v30  ;;  %v2666_v41 = vshrl.u32 %v470_v21, 5  ;;  %v475_v40 = vshll.u32 %v2350_v49, %v472_v25 }
 0x152   : > { %v2660_v9 = vsub.s32 %v726_v0, %v729_v31  ;;  %v1142_v37 = vadd.s32 %v1141_v36, %v1137_v33  ;;  %v478_v42 = vshll.u32 %v2351_v51, %v472_v25  ;;  %v476_v48 = vshrl.u32 %v2351_v51, %v473_v59 }
 0x153   : > { %v479_v50 = vshrl.u32 %v2352_v53, %v473_v59  ;;  %v481_v52 = vshll.u32 %v2352_v53, %v472_v25  ;;  %v482_v56 = vshrl.u32 %v2353_v55, %v473_v59  ;;  %v484_v58 = vshll.u32 %v2353_v55, %v472_v25 }
 0x154   : > { %v732_v46 = vsub.s32 0, %v2660_v9  ;;  %v1143_v47 = vadd.s32 536870912, %v1142_v37  ;;  %v485_v60 = vshrl.u32 %v2354_v57, %v473_v59  ;;  %v752_v44 = vsub.s32 4, %v728_v22 }
 0x155   : > { %v874_v62 = vand.u32 2147483647, %v2558_v30  ;;  %v878_v45 = vshrl.u32 %v877_v39, 23  ;;  %v487_v0 = vshll.u32 %v2354_v57, %v472_v25  ;;  %v488_v2 = vshrl.u32 %v2355_v1, %v473_v59 }
 0x156   : > { %v1899_v54 = vmin.u32 %v732_v46, %v2660_v9  ;;  %v2677_v61 = vshrl.u32 %v1143_v47, 30  ;;  %v2682_v3 = vshll.u32 %v466_v38, 8  ;;  %v722_v5 = vadd.s32 %v2606_v35, %v2603_v34 }
 0x157   : > { %v477_v7 = vor.u32 %v476_v48, %v475_v40  ;;  %v480_v8 = vor.u32 %v479_v50, %v478_v42  ;;  %v483_v12 = vor.u32 %v482_v56, %v481_v52  ;;  %v486_v13 = vor.u32 %v485_v60, %v484_v58 }
 0x158   : > { %v734_v63 = vclz %v1899_v54  ;;  %v1145_v6 = vshll.u32 %v2677_v61, 30  ;;  %vm490_vm15 = vcmp.lt.s32.totalorder %v2666_v41, 1  ;;  %v753_v15 = vsel %vm668_vm13, %v752_v44, %v728_v22 }
 0x159   : > { %vm493_vm0 = vcmp.lt.s32.totalorder %v2666_v41, 4  ;;  %v1906_v20 = vadd.s32 4294967169, %v878_v45  ;;  %v474_v34 = vshrl.u32 %v2350_v49, %v473_v59  ;;  %v489_v35 = vor.u32 %v488_v2, %v487_v0 }
 0x15a   : > { %v1900_v10 = vadd.s32 4294967294, %v734_v63  ;;  %v2696_v16 = vsub.s32 %v1142_v37, %v1145_v6  ;;  %vm492_vm2 = vcmp.lt.s32.totalorder %v2666_v41, 3  ;;  %vm491_vm3 = vcmp.lt.s32.totalorder %v2666_v41, 2 }
 0x15b   : > { %v498_v25 = vsel %vm490_vm15, %v477_v7, %v480_v8  ;;  %v495_v31 = vsel %vm493_vm0, %v483_v12, 2102212464  ;;  %v499_v32 = vsel %vm493_vm0, %v486_v13, 920167782  ;;  %v502_v37 = vsel %vm490_vm15, %v480_v8, %v483_v12 }
 0x15c   : > { %vm1901_vm1 = vcmp.lt.s32.totalorder %v1900_v10, 0  ;;  %v1148_v24 = vsub.s32 0, %v2696_v16  ;;  %v500_v36 = vsel %vm492_vm2, %v483_v12, %v499_v32  ;;  %v503_v40 = vsel %vm493_vm0, %v489_v35, 1326507024 }
 0x15d   : > { %v737_v21 = vsel %vm1901_vm1, 0, %v1900_v10  ;;  %v501_v46 = vsel %vm491_vm3, %v498_v25, %v500_v36  ;;  %vm1084_vm4 = vcmp.lt.s32.totalorder %v2536_v18, 0  ;;  %v496_v47 = vsel %vm492_vm2, %v480_v8, %v495_v31 }
 0x15e   : > { %v738_v22 = vsub.s32 32, %v737_v21  ;;  %v742_v27 = vsub.s32 4294967266, %v737_v21  ;;  %v739_v33 = vshll.u32 %v2660_v9, %v737_v21  ;;  %v1915_v59 = vmin.u32 %v1148_v24, %v2696_v16 }
 0x15f   : > { %v494_v9 = vsel %vm490_vm15, %v474_v34, %v477_v7  ;;  %v2726_v48 = vand.u32 8388607, %v874_v62  ;;  %v755_v54 = vsel %vm2686_vm14, 0, %v753_v15  ;;  %v504_v56 = vsel %vm492_vm2, %v486_v13, %v503_v40 }
 0x160   : > { %v740_v38 = vshrl.u32 %v722_v5, %v738_v22  ;;  %v743_v39 = vadd.s32 127, %v742_v27  ;;  %v1150_v42 = vclz %v1915_v59  ;;  %v505_v60 = vsel %vm491_vm3, %v502_v37, %v504_v56 }
 0x161   : > { %v2735_v44 = vmul.u32.u64.low %v2682_v3, %v501_v46  ;;  %v2736_v45 = vmul.u32.u64.high %v2682_v3, %v501_v46, %v2735_v44  ;;  %v497_v0 = vsel %vm491_vm3, %v494_v9, %v496_v47  ;;  %v759_v6 = vadd.s32 3, %v755_v54 }
 0x162   : > { %v741_v50 = vor.u32 %v740_v38, %v739_v33  ;;  %v744_v52 = vshll.u32 %v743_v39, 23  ;;  %v1916_v58 = vadd.s32 4294967294, %v1150_v42  ;;  %v1138_v7 = vadd.s32 %v2634_v11, %v2640_v19 }
 0x163   : > { %v2742_v2 = vmul.u32.u64.low %v2682_v3, %v505_v60  ;;  %v2743_v5 = vmul.u32.u64.high %v2682_v3, %v505_v60, %v2742_v2  ;;  %v884_v8 = vadd.s32 1, %v1906_v20  ;;  %v1168_v15 = vsub.s32 4, %v2677_v61 }
 0x164   : > { %v745_v63 = vor.u32 4788187, %v744_v52  ;;  %vm1917_vm5 = vcmp.lt.s32.totalorder %v1916_v58, 0  ;;  %v748_v12 = vcvt.s32.f32 %v741_v50  ;;  %v513_v41 = vmul.u32 %v2682_v3, %v497_v0 }
 0x165   : > { %v1153_v13 = vsel %vm1917_vm5, 0, %v1916_v58  ;;  %v516_v21 = vadd.s32 1, %v2736_v45  ;;  %vm515_vm6 = vc.u32 %v2743_v5, %v2735_v44  ;;  %vm885_vm7 = vcmp.gt.s32.totalorder %v884_v8, 0 }
 0x166   : > { %v746_v10 = vand.u32 2147483647, %v745_v63  ;;  %v1154_v34 = vsub.s32 32, %v1153_v13  ;;  %v1158_v35 = vsub.s32 4294967266, %v1153_v13  ;;  %v1155_v25 = vshll.u32 %v2696_v16, %v1153_v13 }
 0x167   : > { %v517_v20 = vsel %vm515_vm6, %v516_v21, %v2736_v45  ;;  %v886_v22 = vsel %vm885_vm7, %v884_v8, 0  ;;  %v1169_v31 = vsel %vm1084_vm4, %v1168_v15, %v2677_v61  ;;  %vm2761_vm8 = vcmp.le.f32.partialorder %v1082_v23, 0.7853982 }
 0x168   : > { %v749_v24 = vmul.f32 %v748_v12, %v746_v10  ;;  %v1156_v11 = vshrl.u32 %v1138_v7, %v1154_v34  ;;  %v1159_v19 = vadd.s32 127, %v1158_v35  ;;  %v518_v3 = vadd.s32 %v517_v20, %v513_v41 }
 0x169   : > { %v888_v32 = vand.u32 31, %v886_v22  ;;  %v2768_v61 = vand.u32 3, %v759_v6  ;;  %v1171_v40 = vsel %vm2761_vm8, 0, %v1169_v31  ;;  %v882_v23 = vor.u32 8388608, %v2726_v48 }
 0x16a   : > { %v750_v27 = vxor.u32 2147483648, %v749_v24  ;;  %v1157_v33 = vor.u32 %v1156_v11, %v1155_v25  ;;  %v1160_v59 = vshll.u32 %v1159_v19, 23  ;;  %v519_v37 = vadd.s32 536870912, %v518_v3 }
 0x16b   : > { %v889_v38 = vsub.s32 32, %v888_v32  ;;  %v2778_v54 = vshrl.u32 %v886_v22, 5  ;;  %v891_v56 = vshll.u32 %v2350_v49, %v888_v32  ;;  %v894_v45 = vshll.u32 %v2351_v51, %v888_v32 }
 0x16c   : > { %v751_v16 = vsel %vm668_vm13, %v750_v27, %v749_v24  ;;  %v1161_v46 = vor.u32 4788187, %v1160_v59  ;;  %v2772_v42 = vshrl.u32 %v519_v37, 30  ;;  %v1164_v50 = vcvt.s32.f32 %v1157_v33 }
 0x16d   : > { %v754_v39 = vsel %vm2686_vm14, %v2533_v17, %v751_v16  ;;  %v892_v9 = vshrl.u32 %v2351_v51, %v889_v38  ;;  %v895_v52 = vshrl.u32 %v2352_v53, %v889_v38  ;;  %v898_v58 = vshrl.u32 %v2353_v55, %v889_v38 }
 0x16e   : > { %2140 = vcosq.f32 %v754_v39  ;;  %v1162_v47 = vand.u32 2147483647, %v1161_v46  ;;  %v521_v4 = vshll.u32 %v2772_v42, 30  ;;  %v900_v48 = vshll.u32 %v2353_v55, %v888_v32 }
 0x16f   : > { %2142 = vsinq.f32 %v754_v39  ;;  %v901_v63 = vshrl.u32 %v2354_v57, %v889_v38  ;;  %v1175_v0 = vadd.s32 3, %v1171_v40  ;;  %v893_v6 = vor.u32 %v892_v9, %v891_v56 }
 0x170   : > { %v1165_v60 = vmul.f32 %v1164_v50, %v1162_v47  ;;  %v2785_v2 = vsub.s32 %v518_v3, %v521_v4  ;;  %v897_v7 = vshll.u32 %v2352_v53, %v888_v32  ;;  %v896_v10 = vor.u32 %v895_v52, %v894_v45 }
 0x171   : > { %v902_v12 = vor.u32 %v901_v63, %v900_v48  ;;  %v904_v13 = vshrl.u32 %v2355_v1, %v889_v38  ;;  %v903_v35 = vshll.u32 %v2354_v57, %v888_v32  ;;  %v773_v41 = vand.u32 2139095040, %v2647_v28 }
 0x172   : > { %v1166_v8 = vxor.u32 2147483648, %v1165_v60  ;;  %v524_v15 = vsub.s32 0, %v2785_v2  ;;  %v899_v34 = vor.u32 %v898_v58, %v897_v7  ;;  %vm765_vm9 = vcmp.eq.s32.totalorder %v2768_v61, 2 }
 0x173   : > { %v514_v24 = vadd.s32 %v2735_v44, %v2743_v5  ;;  %vm906_vm10 = vcmp.lt.s32.totalorder %v2778_v54, 1  ;;  %v2798_v25 = vshll.u32 %v882_v23, 8  ;;  %vm762_vm11 = vcmp.eq.s32.totalorder %v2768_v61, 0 }
 0x174   : > { %v1167_v21 = vsel %vm1084_vm4, %v1166_v8, %v1165_v60  ;;  %v1891_v19 = vmin.u32 %v524_v15, %v2785_v2  ;;  %v905_v20 = vor.u32 %v904_v13, %v903_v35  ;;  %vm909_vm12 = vcmp.lt.s32.totalorder %v2778_v54, 4 }
 0x175   : > { %v1170_v11 = vsel %vm2761_vm8, %v2536_v18, %v1167_v21  ;;  %vm761_vm13 = vcmp.lt.s32.totalorder %v2768_v61, 2  ;;  %v890_v44 = vshrl.u32 %v2350_v49, %v889_v38  ;;  %v914_v5 = vsel %vm906_vm10, %v893_v6, %v896_v10 }
 0x176   : > { %2144 = vcosq.f32 %v1170_v11  ;;  %v915_v22 = vsel %vm909_vm12, %v902_v12, 920167782  ;;  %vm758_vm14 = vweird.f32 %v2533_v17  ;;  %vm460_vm15 = vcmp.lt.s32.totalorder %v2551_v26, 0 }
 0x177   : > { %2146 = vsinq.f32 %v1170_v11  ;;  %v526_v27 = vclz %v1891_v19  ;;  %vm908_vm0 = vcmp.lt.s32.totalorder %v2778_v54, 3  ;;  %v911_v31 = vsel %vm909_vm12, %v899_v34, 2102212464 }
 0x178   : > { %v544_v3 = vsub.s32 4, %v2772_v42  ;;  %vm907_vm1 = vcmp.lt.s32.totalorder %v2778_v54, 2  ;;  %v916_v32 = vsel %vm908_vm0, %v899_v34, %v915_v22  ;;  %v918_v33 = vsel %vm906_vm10, %v896_v10, %v899_v34 }
 0x179   : > { %v1892_v59 = vadd.s32 4294967294, %v526_v27  ;;  %v910_v16 = vsel %vm906_vm10, %v890_v44, %v893_v6  ;;  %v917_v36 = vsel %vm907_vm1, %v914_v5, %v916_v32  ;;  %v919_v37 = vsel %vm909_vm12, %v905_v20, 1326507024 }
 0x17a   : > { %v912_v39 = vsel %vm908_vm0, %v896_v10, %v911_v31  ;;  %v920_v46 = vsel %vm908_vm0, %v902_v12, %v919_v37  ;;  %v2828_v40 = vmul.u32.u64.low %v2798_v25, %v917_v36  ;;  %v2829_v23 = vmul.u32.u64.high %v2798_v25, %v917_v36, %v2828_v40 }
 0x17b   : > { %v2141_v38 = vpop.eup %2140  ;;  %vm1893_vm2 = vcmp.lt.s32.totalorder %v1892_v59, 0  ;;  %v921_v50 = vsel %vm907_vm1, %v918_v33, %v920_v46  ;;  %v774_v52 = vshrl.u32 %v773_v41, 23  ;;  %v913_v6 = vsel %vm907_vm1, %v910_v16, %v912_v39 }
 0x17c   : > { %v2143_v9 = vpop.eup %2142  ;;  %v766_v47 = vxor.u32 2147483648, %v2141_v38  ;;  %v529_v56 = vsel %vm1893_vm2, 0, %v1892_v59  ;;  %v2835_v58 = vmul.u32.u64.low %v2798_v25, %v921_v50  ;;  %v2836_v60 = vmul.u32.u64.high %v2798_v25, %v921_v50, %v2835_v58 }
 0x17d   : > { %v763_v4 = vxor.u32 2147483648, %v2143_v9  ;;  %v530_v48 = vsub.s32 32, %v529_v56  ;;  %v534_v63 = vsub.s32 4294967266, %v529_v56  ;;  %v1176_v8 = vand.u32 3, %v1175_v0 }
 0x17e   : > { %v767_v45 = vsel %vm765_vm9, %v766_v47, %v2143_v9  ;;  %v932_v10 = vadd.s32 1, %v2829_v23  ;;  %v1902_v12 = vadd.s32 4294967169, %v774_v52  ;;  %v531_v15 = vshll.u32 %v2785_v2, %v529_v56 }
 0x17f   : > { %v764_v7 = vsel %vm762_vm11, %v2141_v38, %v763_v4  ;;  %v532_v34 = vshrl.u32 %v514_v24, %v530_v48  ;;  %v535_v35 = vadd.s32 127, %v534_v63  ;;  %v545_v54 = vsel %vm460_vm15, %v544_v3, %v2772_v42 }
 0x180   : > { %v768_v13 = vsel %vm761_vm13, %v764_v7, %v767_v45  ;;  %v929_v21 = vmul.u32 %v2798_v25, %v913_v6  ;;  %vm931_vm3 = vc.u32 %v2836_v60, %v2828_v40  ;;  %v780_v17 = vadd.s32 1, %v1902_v12 }
 0x181   : > { %v769_v41 = vsel %vm758_vm14, nan, %v768_v13  ;;  %v533_v61 = vor.u32 %v532_v34, %v531_v15  ;;  %v536_v0 = vshll.u32 %v535_v35, 23  ;;  %v933_v2 = vsel %vm931_vm3, %v932_v10, %v2829_v23 }
 0x182   : > { %1708 = vst [vmem:[%s2858_s14 + $0x10] sm:$0xff] %v769_v41  ;;  %vm1177_vm4 = vcmp.lt.s32.totalorder %v1176_v8, 2  ;;  %vm2864_vm5 = vcmp.le.f32.partialorder %v458_v43, 0.7853982  ;;  %v934_v24 = vadd.s32 %v933_v2, %v929_v21  ;;  %v770_v20 = vand.u32 2147483647, %v2647_v28 }
 0x183   : > { %v2145_v25 = vpop.eup %2144  ;;  %v537_v11 = vor.u32 4788187, %v536_v0  ;;  %v547_v19 = vsel %vm2864_vm5, 0, %v545_v54  ;;  %vm781_vm6 = vcmp.gt.s32.totalorder %v780_v17, 0  ;;  %vm1181_vm7 = vcmp.eq.s32.totalorder %v1176_v8, 2 }
 0x184   : > { %v2147_v44 = vpop.eup %2146  ;;  %v1182_v5 = vxor.u32 2147483648, %v2145_v25  ;;  %v935_v22 = vadd.s32 536870912, %v934_v24  ;;  %v782_v27 = vsel %vm781_vm6, %v780_v17, 0  ;;  %v540_v43 = vcvt.s32.f32 %v533_v61 }
 0x185   : > { %v1179_v31 = vxor.u32 2147483648, %v2147_v44  ;;  %v538_v3 = vand.u32 2147483647, %v537_v11  ;;  %v784_v32 = vand.u32 31, %v782_v27  ;;  %vm1178_vm8 = vcmp.eq.s32.totalorder %v1176_v8, 0 }
 0x186   : > { %v1183_v33 = vsel %vm1181_vm7, %v1182_v5, %v2147_v44  ;;  %v551_v59 = vadd.s32 3, %v547_v19  ;;  %v2871_v16 = vshrl.u32 %v935_v22, 30  ;;  %v777_v38 = vand.u32 8388607, %v770_v20 }
 0x187   : > { %v1180_v36 = vsel %vm1178_vm8, %v2145_v25, %v1179_v31  ;;  %v541_v37 = vmul.f32 %v540_v43, %v538_v3  ;;  %v785_v39 = vsub.s32 32, %v784_v32  ;;  %vm1174_vm9 = vweird.f32 %v2536_v18 }
 0x188   : > { %v1184_v46 = vsel %vm1177_vm4, %v1180_v36, %v1183_v33  ;;  %v937_v23 = vshll.u32 %v2871_v16, 30  ;;  %v787_v9 = vshll.u32 %v2350_v49, %v784_v32  ;;  %v790_v4 = vshll.u32 %v2351_v51, %v784_v32 }
 0x189   : > { %v1185_v47 = vsel %vm1174_vm9, nan, %v1184_v46  ;;  %v542_v50 = vxor.u32 2147483648, %v541_v37  ;;  %v788_v52 = vshrl.u32 %v2351_v51, %v785_v39  ;;  %v2882_v56 = vand.u32 3, %v551_v59 }
 0x18a   : > { %1712 = vst [vmem:[%s2858_s14 + $0x30] sm:$0xff] %v1185_v47  ;;  %v2884_v58 = vsub.s32 %v934_v24, %v937_v23  ;;  %v791_v45 = vshrl.u32 %v2352_v53, %v785_v39  ;;  %v793_v18 = vshll.u32 %v2352_v53, %v784_v32  ;;  %v778_v63 = vor.u32 8388608, %v777_v38  ;;  %v418_v47 = vpop.f32.mrf.mxu1 }
 0x18b   : > { %v543_v48 = vsel %vm460_vm15, %v542_v50, %v541_v37  ;;  %v794_v6 = vshrl.u32 %v2353_v55, %v785_v39  ;;  %v1189_v7 = vand.u32 2139095040, %v2650_v29  ;;  %v783_v12 = vshrl.u32 %v782_v27, 5 }
 0x18c   : > { %v546_v8 = vsel %vm2864_vm5, %v2551_v26, %v543_v48  ;;  %v940_v10 = vsub.s32 0, %v2884_v58  ;;  %v789_v13 = vor.u32 %v788_v52, %v787_v9  ;;  %v792_v15 = vor.u32 %v791_v45, %v790_v4 }
 0x18d   : > { %2148 = vcosq.f32 %v546_v8  ;;  %v796_v34 = vshll.u32 %v2353_v55, %v784_v32  ;;  %v797_v35 = vshrl.u32 %v2354_v57, %v785_v39  ;;  %v795_v54 = vor.u32 %v794_v6, %v793_v18 }
 0x18e   : > { %2150 = vsinq.f32 %v546_v8  ;;  %v1907_v41 = vmin.u32 %v940_v10, %v2884_v58  ;;  %v799_v21 = vshll.u32 %v2354_v57, %v784_v32  ;;  %v930_v61 = vadd.s32 %v2828_v40, %v2836_v60 }
 0x18f   : > { %v786_v0 = vshrl.u32 %v2350_v49, %v785_v39  ;;  %v798_v2 = vor.u32 %v797_v35, %v796_v34  ;;  %v800_v17 = vshrl.u32 %v2355_v1, %v785_v39  ;;  %vm802_vm10 = vcmp.lt.s32.totalorder %v783_v12, 1  ;;  %v402_v39 = vpop.f32.mrf.mxu0 }
 0x190   : > { %v942_v42 = vclz %v1907_v41  ;;  %v818_v24 = vshll.u32 %v778_v63, 8  ;;  %v1190_v25 = vshrl.u32 %v1189_v7, 23  ;;  %vm876_vm11 = vcmp.lt.s32.totalorder %v2558_v30, 0 }
 0x191   : > { %v801_v11 = vor.u32 %v800_v17, %v799_v21  ;;  %vm803_vm12 = vcmp.lt.s32.totalorder %v783_v12, 2  ;;  %vm804_vm13 = vcmp.lt.s32.totalorder %v783_v12, 3  ;;  %vm805_vm14 = vcmp.lt.s32.totalorder %v783_v12, 4 }
 0x192   : > { %v1908_v19 = vadd.s32 4294967294, %v942_v42  ;;  %v807_v44 = vsel %vm805_vm14, %v795_v54, 2102212464  ;;  %v810_v5 = vsel %vm802_vm10, %v789_v13, %v792_v15  ;;  %v811_v22 = vsel %vm805_vm14, %v798_v2, 920167782 }
 0x193   : > { %v806_v40 = vsel %vm802_vm10, %v786_v0, %v789_v13  ;;  %v812_v60 = vsel %vm804_vm13, %v795_v54, %v811_v22  ;;  %v814_v27 = vsel %vm802_vm10, %v792_v15, %v795_v54  ;;  %v815_v31 = vsel %vm805_vm14, %v801_v11, 1326507024 }
 0x194   : > { %vm2907_vm15 = vcmp.le.f32.partialorder %v874_v62, 0.7853982  ;;  %vm1909_vm0 = vcmp.lt.s32.totalorder %v1908_v19, 0  ;;  %v808_v43 = vsel %vm804_vm13, %v792_v15, %v807_v44  ;;  %v813_v32 = vsel %vm803_vm12, %v810_v5, %v812_v60 }
 0x195   : > { %v816_v33 = vsel %vm804_vm13, %v798_v2, %v815_v31  ;;  %v945_v59 = vsel %vm1909_vm0, 0, %v1908_v19  ;;  %v2913_v37 = vmul.u32.u64.low %v818_v24, %v813_v32  ;;  %v2914_v38 = vmul.u32.u64.high %v818_v24, %v813_v32, %v2913_v37 }
 0x196   : > { %v817_v36 = vsel %vm803_vm12, %v814_v27, %v816_v33  ;;  %vm553_vm1 = vcmp.lt.s32.totalorder %v2882_v56, 2  ;;  %v946_v46 = vsub.s32 32, %v945_v59  ;;  %v950_v62 = vsub.s32 4294967266, %v945_v59 }
 0x197   : > { %v960_v23 = vsub.s32 4, %v2871_v16  ;;  %v1186_v9 = vand.u32 2147483647, %v2650_v29  ;;  %v809_v50 = vsel %vm803_vm12, %v806_v40, %v808_v43  ;;  %v1918_v45 = vadd.s32 4294967169, %v1190_v25 }
 0x198   : > { %v2921_v52 = vmul.u32.u64.low %v818_v24, %v817_v36  ;;  %v2922_v4 = vmul.u32.u64.high %v818_v24, %v817_v36, %v2921_v52  ;;  %v947_v18 = vshll.u32 %v2884_v58, %v945_v59  ;;  %v948_v48 = vshrl.u32 %v930_v61, %v946_v46 }
 0x199   : > { %v951_v63 = vadd.s32 127, %v950_v62  ;;  %v2926_v6 = vadd.f32 %v2530_v14, %v402_v39  ;;  %vm554_vm2 = vcmp.eq.s32.totalorder %v2882_v56, 0  ;;  %v828_v7 = vadd.s32 1, %v2914_v38 }
 0x19a   : > { %v1196_v8 = vadd.s32 1, %v1918_v45  ;;  %v2931_v10 = vadd.f32 %v2530_v14, %v418_v47  ;;  %v2149_v12 = vpop.eup %2148  ;;  %vm557_vm3 = vcmp.eq.s32.totalorder %v2882_v56, 2  ;;  %v949_v13 = vor.u32 %v948_v48, %v947_v18 }
 0x19b   : > { %v952_v15 = vshll.u32 %v951_v63, 23  ;;  %v961_v58 = vsel %vm876_vm11, %v960_v23, %v2871_v16  ;;  %447 = vst [vmem:[%s2540_s6 + $0x8] sm:$0xff] %v2926_v6  ;;  %v2151_v34 = vpop.eup %2150  ;;  %v558_v35 = vxor.u32 2147483648, %v2149_v12  ;;  %v825_v41 = vmul.u32 %v818_v24, %v809_v50 }
 0x19c   : > { %vm827_vm4 = vc.u32 %v2922_v4, %v2913_v37  ;;  %vm1197_vm5 = vcmp.gt.s32.totalorder %v1196_v8, 0  ;;  %451 = vst [vmem:[%s2540_s6 + $0x28] sm:$0xff] %v2931_v10  ;;  %v555_v14 = vxor.u32 2147483648, %v2151_v34  ;;  %v1193_v61 = vand.u32 8388607, %v1186_v9 }
 0x19d   : > { %v953_v54 = vor.u32 4788187, %v952_v15  ;;  %v829_v21 = vsel %vm827_vm4, %v828_v7, %v2914_v38  ;;  %v559_v16 = vsel %vm557_vm3, %v558_v35, %v2151_v34  ;;  %v963_v0 = vsel %vm2907_vm15, 0, %v961_v58 }
 0x19e   : > { %v830_v2 = vadd.s32 %v829_v21, %v825_v41  ;;  %v1198_v17 = vsel %vm1197_vm5, %v1196_v8, 0  ;;  %v556_v42 = vsel %vm554_vm2, %v2149_v12, %v555_v14  ;;  %v956_v25 = vcvt.s32.f32 %v949_v13 }
 0x19f   : > { %v954_v24 = vand.u32 2147483647, %v953_v54  ;;  %v1200_v11 = vand.u32 31, %v1198_v17  ;;  %vm550_vm6 = vweird.f32 %v2551_v26  ;;  %v560_v19 = vsel %vm553_vm1, %v556_v42, %v559_v16 }
 0x1a0   : > { %v831_v44 = vadd.s32 536870912, %v830_v2  ;;  %v561_v5 = vsel %vm550_vm6, nan, %v560_v19  ;;  %v967_v60 = vadd.s32 3, %v963_v0  ;;  %v1194_v31 = vor.u32 8388608, %v1193_v61 }
 0x1a1   : > { %v957_v22 = vmul.f32 %v956_v25, %v954_v24  ;;  %v1201_v40 = vsub.s32 32, %v1200_v11  ;;  %1706 = vst [vmem:[%s2858_s14] sm:$0xff] %v561_v5  ;;  %v1203_v43 = vshll.u32 %v2350_v49, %v1200_v11  ;;  %v1206_v59 = vshll.u32 %v2351_v51, %v1200_v11 }
 0x1a2   : > { %v2954_v27 = vshrl.u32 %v831_v44, 30  ;;  %v1209_v36 = vshll.u32 %v2352_v53, %v1200_v11  ;;  %v1199_v62 = vshrl.u32 %v1198_v17, 5  ;;  %v1212_v47 = vshll.u32 %v2353_v55, %v1200_v11 }
 0x1a3   : > { %v958_v32 = vxor.u32 2147483648, %v957_v22  ;;  %v1204_v33 = vshrl.u32 %v2351_v51, %v1201_v40  ;;  %v1207_v26 = vshrl.u32 %v2352_v53, %v1201_v40  ;;  %v1210_v38 = vshrl.u32 %v2353_v55, %v1201_v40 }
 0x1a4   : > { %v833_v56 = vshll.u32 %v2954_v27, 30  ;;  %v1213_v39 = vshrl.u32 %v2354_v57, %v1201_v40  ;;  %v1215_v63 = vshll.u32 %v2354_v57, %v1200_v11  ;;  %v1216_v7 = vshrl.u32 %v2355_v1, %v1201_v40 }
 0x1a5   : > { %v959_v46 = vsel %vm876_vm11, %v958_v32, %v957_v22  ;;  %v1205_v23 = vor.u32 %v1204_v33, %v1203_v43  ;;  %v1208_v45 = vor.u32 %v1207_v26, %v1206_v59  ;;  %v1211_v18 = vor.u32 %v1210_v38, %v1209_v36 }
 0x1a6   : > { %v962_v50 = vsel %vm2907_vm15, %v2558_v30, %v959_v46  ;;  %v2970_v52 = vsub.s32 %v830_v2, %v833_v56  ;;  %v1214_v48 = vor.u32 %v1213_v39, %v1212_v47  ;;  %v2975_v12 = vand.u32 3, %v967_v60 }
 0x1a7   : > { %2152 = vcosq.f32 %v962_v50  ;;  %v1217_v13 = vor.u32 %v1216_v7, %v1215_v63  ;;  %vm1221_vm7 = vcmp.lt.s32.totalorder %v1199_v62, 4  ;;  %v565_v3 = vand.u32 2139095040, %v2926_v6 }
 0x1a8   : > { %2154 = vsinq.f32 %v962_v50  ;;  %v836_v8 = vsub.s32 0, %v2970_v52  ;;  %v1202_v15 = vshrl.u32 %v2350_v49, %v1201_v40  ;;  %vm1218_vm8 = vcmp.lt.s32.totalorder %v1199_v62, 1 }
 0x1a9   : > { %v1223_v58 = vsel %vm1221_vm7, %v1211_v18, 2102212464  ;;  %vm1219_vm9 = vcmp.lt.s32.totalorder %v1199_v62, 2  ;;  %v1226_v34 = vsel %vm1218_vm8, %v1205_v23, %v1208_v45  ;;  %v1227_v35 = vsel %vm1221_vm7, %v1214_v48, 920167782 }
 0x1aa   : > { %v1903_v30 = vmin.u32 %v836_v8, %v2970_v52  ;;  %v1234_v41 = vshll.u32 %v1194_v31, 8  ;;  %vm1220_vm10 = vcmp.lt.s32.totalorder %v1199_v62, 3  ;;  %v1222_v54 = vsel %vm1218_vm8, %v1202_v15, %v1205_v23  ;;  %v2188_v31 = vld [vmem:[%s2540_s6 + $0x20] sm:$0xff] }
 0x1ab   : > { %v1230_v21 = vsel %vm1218_vm8, %v1208_v45, %v1211_v18  ;;  %v1224_v61 = vsel %vm1220_vm10, %v1208_v45, %v1223_v58  ;;  %v1228_v16 = vsel %vm1220_vm10, %v1211_v18, %v1227_v35  ;;  %v1231_v0 = vsel %vm1221_vm7, %v1217_v13, 1326507024 }
 0x1ac   : > { %v838_v14 = vclz %v1903_v30  ;;  %v566_v2 = vshrl.u32 %v565_v3, 23  ;;  %vm772_vm11 = vcmp.lt.s32.totalorder %v2647_v28, 0  ;;  %v1229_v42 = vsel %vm1219_vm9, %v1226_v34, %v1228_v16 }
 0x1ad   : > { %v1232_v24 = vsel %vm1220_vm10, %v1214_v48, %v1231_v0  ;;  %vm2987_vm12 = vcmp.le.f32.partialorder %v770_v20, 0.7853982  ;;  %v2992_v19 = vmul.u32.u64.low %v1234_v41, %v1229_v42  ;;  %v2993_v44 = vmul.u32.u64.high %v1234_v41, %v1229_v42, %v2992_v19 }
 0x1ae   : > { %v1904_v17 = vadd.s32 4294967294, %v838_v14  ;;  %v1233_v11 = vsel %vm1219_vm9, %v1230_v21, %v1232_v24  ;;  %v1894_v5 = vadd.s32 4294967169, %v566_v2  ;;  %v1225_v22 = vsel %vm1219_vm9, %v1222_v54, %v1224_v61 }
 0x1af   : > { %v2997_v40 = vmul.u32.u64.low %v1234_v41, %v1233_v11  ;;  %v2998_v60 = vmul.u32.u64.high %v1234_v41, %v1233_v11, %v2997_v40  ;;  %vm966_vm14 = vweird.f32 %v2188_v31  ;;  %vm969_vm15 = vcmp.lt.s32.totalorder %v2975_v12, 2 }
 0x1b0   : > { %vm1905_vm13 = vcmp.lt.s32.totalorder %v1904_v17, 0  ;;  %v856_v43 = vsub.s32 4, %v2954_v27  ;;  %v572_v32 = vadd.s32 1, %v1894_v5  ;;  %vm973_vm0 = vcmp.eq.s32.totalorder %v2975_v12, 2 }
 0x1b1   : > { %v841_v20 = vsel %vm1905_vm13, 0, %v1904_v17  ;;  %v826_v33 = vadd.s32 %v2913_v37, %v2922_v4  ;;  %v1241_v56 = vmul.u32 %v1234_v41, %v1225_v22  ;;  %v1244_v36 = vadd.s32 1, %v2993_v44 }
 0x1b2   : > { %v842_v59 = vsub.s32 32, %v841_v20  ;;  %v846_v26 = vsub.s32 4294967266, %v841_v20  ;;  %v562_v38 = vand.u32 2147483647, %v2926_v6  ;;  %vm573_vm1 = vcmp.gt.s32.totalorder %v572_v32, 0 }
 0x1b3   : > { %v843_v46 = vshll.u32 %v2970_v52, %v841_v20  ;;  %vm1243_vm2 = vc.u32 %v2998_v60, %v2992_v19  ;;  %v857_v37 = vsel %vm772_vm11, %v856_v43, %v2954_v27  ;;  %v574_v45 = vsel %vm573_vm1, %v572_v32, 0 }
 0x1b4   : > { %v2153_v39 = vpop.eup %2152  ;;  %v844_v62 = vshrl.u32 %v826_v33, %v842_v59  ;;  %v847_v23 = vadd.s32 127, %v846_v26  ;;  %v1245_v4 = vsel %vm1243_vm2, %v1244_v36, %v2993_v44  ;;  %vm970_vm3 = vcmp.eq.s32.totalorder %v2975_v12, 0 }
 0x1b5   : > { %v2155_v47 = vpop.eup %2154  ;;  %v974_v50 = vxor.u32 2147483648, %v2153_v39  ;;  %v1246_v7 = vadd.s32 %v1245_v4, %v1241_v56  ;;  %v569_v8 = vand.u32 8388607, %v562_v38  ;;  %v576_v13 = vand.u32 31, %v574_v45 }
 0x1b6   : > { %v971_v18 = vxor.u32 2147483648, %v2155_v47  ;;  %v845_v48 = vor.u32 %v844_v62, %v843_v46  ;;  %v848_v63 = vshll.u32 %v847_v23, 23  ;;  %v859_v27 = vsel %vm2987_vm12, 0, %v857_v37 }
 0x1b7   : > { %v975_v52 = vsel %vm973_vm0, %v974_v50, %v2155_v47  ;;  %v1247_v15 = vadd.s32 536870912, %v1246_v7  ;;  %v577_v35 = vsub.s32 32, %v576_v13  ;;  %v579_v41 = vshll.u32 %v2350_v49, %v576_v13 }
 0x1b8   : > { %v972_v3 = vsel %vm970_vm3, %v2153_v39, %v971_v18  ;;  %v849_v30 = vor.u32 4788187, %v848_v63  ;;  %v852_v34 = vcvt.s32.f32 %v845_v48  ;;  %v582_v61 = vshll.u32 %v2351_v51, %v576_v13 }
 0x1b9   : > { %v976_v58 = vsel %vm969_vm15, %v972_v3, %v975_v52  ;;  %v1248_v21 = vshrl.u32 %v1247_v15, 30  ;;  %v580_v16 = vshrl.u32 %v2351_v51, %v577_v35  ;;  %v583_v0 = vshrl.u32 %v2352_v53, %v577_v35  ;;  %v1985_v15 = vpop.f32.mrf.mxu1 }
 0x1ba   : > { %v977_v14 = vsel %vm966_vm14, nan, %v976_v58  ;;  %v850_v54 = vand.u32 2147483647, %v849_v30  ;;  %v585_v2 = vshll.u32 %v2352_v53, %v576_v13  ;;  %v586_v12 = vshrl.u32 %v2353_v55, %v577_v35 }
 0x1bb   : > { %1710 = vst [vmem:[%s2858_s14 + $0x20] sm:$0xff] %v977_v14  ;;  %v1249_v42 = vshll.u32 %v1248_v21, 30  ;;  %v570_v24 = vor.u32 8388608, %v569_v8  ;;  %v588_v11 = vshll.u32 %v2353_v55, %v576_v13  ;;  %v863_v44 = vadd.s32 3, %v859_v27 }
 0x1bc   : > { %v853_v17 = vmul.f32 %v852_v34, %v850_v54  ;;  %vm1188_vm4 = vcmp.lt.s32.totalorder %v2650_v29, 0  ;;  %v575_v5 = vshrl.u32 %v574_v45, 5  ;;  %v589_v22 = vshrl.u32 %v2354_v57, %v577_v35 }
 0x1bd   : > { %v981_v40 = vand.u32 2139095040, %v2931_v10  ;;  %v3036_v20 = vsub.s32 %v1246_v7, %v1249_v42  ;;  %v581_v43 = vor.u32 %v580_v16, %v579_v41  ;;  %v591_v32 = vshll.u32 %v2354_v57, %v576_v13 }
 0x1be   : > { %v854_v31 = vxor.u32 2147483648, %v853_v17  ;;  %v584_v33 = vor.u32 %v583_v0, %v582_v61  ;;  %v587_v59 = vor.u32 %v586_v12, %v585_v2  ;;  %v590_v26 = vor.u32 %v589_v22, %v588_v11  ;;  %v3065_v2 = vld [vmem:[%s3515_s2] ss:$0 sm:$0xff]  ;;  %v431_v0 = vpop.f32.mrf.mxu1 }
 0x1bf   : > { %v592_v56 = vshrl.u32 %v2355_v1, %v577_v35  ;;  %v1252_v39 = vsub.s32 0, %v3036_v20  ;;  %v578_v46 = vshrl.u32 %v2350_v49, %v577_v35  ;;  %v610_v62 = vshll.u32 %v570_v24, 8 }
 0x1c0   : > { %v855_v36 = vsel %vm772_vm11, %v854_v31, %v853_v17  ;;  %v1272_v47 = vsub.s32 4, %v1248_v21  ;;  %v982_v37 = vshrl.u32 %v981_v40, 23  ;;  %vm594_vm5 = vcmp.lt.s32.totalorder %v575_v5, 1 }
 0x1c1   : > { %v858_v23 = vsel %vm2987_vm12, %v2647_v28, %v855_v36  ;;  %v593_v50 = vor.u32 %v592_v56, %v591_v32  ;;  %v1919_v4 = vmin.u32 %v1252_v39, %v3036_v20  ;;  %vm597_vm6 = vcmp.lt.s32.totalorder %v575_v5, 4  ;;  %v2190_v56 = vld [vmem:[%s2540_s6 + $0x18] sm:$0xff] }
 0x1c2   : > { %2156 = vcosq.f32 %v858_v23  ;;  %v599_v45 = vsel %vm597_vm6, %v587_v59, 2102212464  ;;  %v602_v18 = vsel %vm594_vm5, %v581_v43, %v584_v33  ;;  %v603_v48 = vsel %vm597_vm6, %v590_v26, 920167782 }
 0x1c3   : > { %2158 = vsinq.f32 %v858_v23  ;;  %v1254_v63 = vclz %v1919_v4  ;;  %vm595_vm7 = vcmp.lt.s32.totalorder %v575_v5, 2  ;;  %vm596_vm8 = vcmp.lt.s32.totalorder %v575_v5, 3 }
 0x1c4   : > { %v598_v7 = vsel %vm594_vm5, %v578_v46, %v581_v43  ;;  %v600_v52 = vsel %vm596_vm8, %v584_v33, %v599_v45  ;;  %v604_v8 = vsel %vm596_vm8, %v587_v59, %v603_v48  ;;  %v606_v25 = vsel %vm594_vm5, %v584_v33, %v587_v59 }
 0x1c5   : > { %v607_v28 = vsel %vm597_vm6, %v593_v50, 1326507024  ;;  %v1920_v13 = vadd.s32 4294967294, %v1254_v63  ;;  %v1273_v3 = vsel %vm1188_vm4, %v1272_v47, %v1248_v21  ;;  %v605_v30 = vsel %vm595_vm7, %v602_v18, %v604_v8 }
 0x1c6   : > { %v608_v27 = vsel %vm596_vm8, %v590_v26, %v607_v28  ;;  %v601_v58 = vsel %vm595_vm7, %v598_v7, %v600_v52  ;;  %v3050_v35 = vmul.u32.u64.low %v610_v62, %v605_v30  ;;  %v3051_v41 = vmul.u32.u64.high %v610_v62, %v605_v30, %v3050_v35 }
 0x1c7   : > { %v609_v34 = vsel %vm595_vm7, %v606_v25, %v608_v27  ;;  %vm1921_vm9 = vcmp.lt.s32.totalorder %v1920_v13, 0  ;;  %v1910_v61 = vadd.s32 4294967169, %v982_v37  ;;  %v864_v16 = vand.u32 3, %v863_v44 }
 0x1c8   : > { %v3053_v14 = vmul.u32.u64.low %v610_v62, %v609_v34  ;;  %v3054_v54 = vmul.u32.u64.high %v610_v62, %v609_v34, %v3053_v14  ;;  %vm3058_vm10 = vcmp.le.f32.partialorder %v1186_v9, 0.7853982  ;;  %v1257_v21 = vsel %vm1921_vm9, 0, %v1920_v13 }
 0x1c9   : > { %v3068_v12 = vadd.f32 %v3065_v2, %v1985_v15  ;;  %v1242_v17 = vadd.s32 %v2992_v19, %v2998_v60  ;;  %v1258_v42 = vsub.s32 32, %v1257_v21  ;;  %v1262_v24 = vsub.s32 4294967266, %v1257_v21 }
 0x1ca   : > { %v988_v11 = vadd.s32 1, %v1910_v61  ;;  %v1275_v9 = vsel %vm3058_vm10, 0, %v1273_v3  ;;  %v617_v44 = vmul.u32 %v610_v62, %v601_v58  ;;  %v620_v5 = vadd.s32 1, %v3051_v41 }
 0x1cb   : > { %v978_v22 = vand.u32 2147483647, %v2931_v10  ;;  %456 = vst [vmem:[%s2540_s6 + $0x50] sm:$0xff] %v3068_v12  ;;  %v1259_v40 = vshll.u32 %v3036_v20, %v1257_v21  ;;  %v1260_v31 = vshrl.u32 %v1242_v17, %v1258_v42  ;;  %v1263_v43 = vadd.s32 127, %v1262_v24 }
 0x1cc   : > { %vm619_vm11 = vc.u32 %v3054_v54, %v3050_v35  ;;  %vm989_vm12 = vcmp.gt.s32.totalorder %v988_v11, 0  ;;  %vm862_vm13 = vweird.f32 %v2190_v56  ;;  %v1279_v36 = vadd.s32 3, %v1275_v9  ;;  %v3111_v9 = vld [vmem:[%s2540_s6 + $0x38] sm:$0xff] }
 0x1cd   : > { %v621_v19 = vsel %vm619_vm11, %v620_v5, %v3051_v41  ;;  %v1261_v60 = vor.u32 %v1260_v31, %v1259_v40  ;;  %v1264_v32 = vshll.u32 %v1263_v43, 23  ;;  %v990_v59 = vsel %vm989_vm12, %v988_v11, 0 }
 0x1ce   : > { %v622_v33 = vadd.s32 %v621_v19, %v617_v44  ;;  %v985_v39 = vand.u32 8388607, %v978_v22  ;;  %v992_v46 = vand.u32 31, %v990_v59  ;;  %vm865_vm14 = vcmp.lt.s32.totalorder %v864_v16, 2 }
 0x1cf   : > { %v2157_v26 = vpop.eup %2156  ;;  %v1265_v23 = vor.u32 4788187, %v1264_v32  ;;  %vm866_vm15 = vcmp.eq.s32.totalorder %v864_v16, 0  ;;  %vm869_vm0 = vcmp.eq.s32.totalorder %v864_v16, 2  ;;  %v1268_v18 = vcvt.s32.f32 %v1261_v60 }
 0x1d0   : > { %v2159_v20 = vpop.eup %2158  ;;  %v870_v62 = vxor.u32 2147483648, %v2157_v26  ;;  %v623_v47 = vadd.s32 536870912, %v622_v33  ;;  %v993_v37 = vsub.s32 32, %v992_v46  ;;  %v3086_v7 = vand.u32 3, %v1279_v36 }
 0x1d1   : > { %v867_v50 = vxor.u32 2147483648, %v2159_v20  ;;  %v1266_v45 = vand.u32 2147483647, %v1265_v23  ;;  %v986_v52 = vor.u32 8388608, %v985_v39  ;;  %v3091_v13 = vadd.s32 %v3050_v35, %v3054_v54 }
 0x1d2   : > { %v871_v4 = vsel %vm869_vm0, %v870_v62, %v2159_v20  ;;  %v3084_v48 = vshrl.u32 %v623_v47, 30  ;;  %v996_v8 = vshrl.u32 %v2351_v51, %v993_v37  ;;  %v995_v27 = vshll.u32 %v2350_v49, %v992_v46 }
 0x1d3   : > { %v868_v63 = vsel %vm866_vm15, %v2157_v26, %v867_v50  ;;  %v1269_v28 = vmul.f32 %v1268_v18, %v1266_v45  ;;  %v999_v15 = vshrl.u32 %v2352_v53, %v993_v37  ;;  %v1002_v58 = vshrl.u32 %v2353_v55, %v993_v37 }
 0x1d4   : > { %v872_v25 = vsel %vm865_vm14, %v868_v63, %v871_v4  ;;  %v625_v3 = vshll.u32 %v3084_v48, 30  ;;  %v991_v14 = vshrl.u32 %v990_v59, 5  ;;  %v998_v61 = vshll.u32 %v2351_v51, %v992_v46  ;;  %v1986_v63 = vpop.f32.mrf.mxu1 }
 0x1d5   : > { %v873_v30 = vsel %vm862_vm13, nan, %v872_v25  ;;  %v1270_v34 = vxor.u32 2147483648, %v1269_v28  ;;  %v997_v35 = vor.u32 %v996_v8, %v995_v27  ;;  %v1001_v54 = vshll.u32 %v2352_v53, %v992_v46 }
 0x1d6   : > { %1709 = vst [vmem:[%s2858_s14 + $0x18] sm:$0xff] %v873_v30  ;;  %v3099_v41 = vsub.s32 %v622_v33, %v625_v3  ;;  %v1004_v16 = vshll.u32 %v2353_v55, %v992_v46  ;;  %v1005_v21 = vshrl.u32 %v2354_v57, %v993_v37  ;;  %v1007_v24 = vshll.u32 %v2354_v57, %v992_v46 }
 0x1d7   : > { %v1271_v17 = vsel %vm1188_vm4, %v1270_v34, %v1269_v28  ;;  %v1008_v11 = vshrl.u32 %v2355_v1, %v993_v37  ;;  %v1000_v5 = vor.u32 %v999_v15, %v998_v61  ;;  %v1003_v40 = vor.u32 %v1002_v58, %v1001_v54 }
 0x1d8   : > { %v628_v42 = vsub.s32 0, %v3099_v41  ;;  %v1274_v44 = vsel %vm3058_vm10, %v3111_v9, %v1271_v17  ;;  %v1006_v31 = vor.u32 %v1005_v21, %v1004_v16  ;;  %v1026_v19 = vshll.u32 %v986_v52, 8 }
 0x1d9   : > { %2160 = vcosq.f32 %v1274_v44  ;;  %v1009_v29 = vor.u32 %v1008_v11, %v1007_v24  ;;  %v994_v60 = vshrl.u32 %v2350_v49, %v993_v37  ;;  %vm1010_vm1 = vcmp.lt.s32.totalorder %v991_v14, 1 }
 0x1da   : > { %v1895_v43 = vmin.u32 %v628_v42, %v3099_v41  ;;  %2162 = vsinq.f32 %v1274_v44  ;;  %v1501_v32 = vand.u32 2139095040, %v3068_v12  ;;  %vm564_vm2 = vcmp.lt.s32.totalorder %v2926_v6, 0 }
 0x1db   : > { %vm1011_vm3 = vcmp.lt.s32.totalorder %v991_v14, 2  ;;  %vm1012_vm4 = vcmp.lt.s32.totalorder %v991_v14, 3  ;;  %vm1013_vm5 = vcmp.lt.s32.totalorder %v991_v14, 4  ;;  %v1018_v26 = vsel %vm1010_vm1, %v997_v35, %v1000_v5 }
 0x1dc   : > { %v630_v33 = vclz %v1895_v43  ;;  %v1015_v59 = vsel %vm1013_vm5, %v1003_v40, 2102212464  ;;  %v1019_v56 = vsel %vm1013_vm5, %v1006_v31, 920167782  ;;  %v1022_v36 = vsel %vm1010_vm1, %v1000_v5, %v1003_v40 }
 0x1dd   : > { %v1014_v46 = vsel %vm1010_vm1, %v994_v60, %v997_v35  ;;  %v1020_v20 = vsel %vm1012_vm4, %v1003_v40, %v1019_v56  ;;  %v1023_v62 = vsel %vm1013_vm5, %v1009_v29, 1326507024  ;;  %v1016_v23 = vsel %vm1012_vm4, %v1000_v5, %v1015_v59 }
 0x1de   : > { %v1896_v39 = vadd.s32 4294967294, %v630_v33  ;;  %v1021_v47 = vsel %vm1011_vm3, %v1018_v26, %v1020_v20  ;;  %v1024_v50 = vsel %vm1012_vm4, %v1006_v31, %v1023_v62  ;;  %v1502_v37 = vshrl.u32 %v1501_v32, 23 }
 0x1df   : > { %v1025_v4 = vsel %vm1011_vm3, %v1022_v36, %v1024_v50  ;;  %v3122_v45 = vmul.u32.u64.low %v1026_v19, %v1021_v47  ;;  %v3123_v18 = vmul.u32.u64.high %v1026_v19, %v1021_v47, %v3122_v45  ;;  %v648_v8 = vsub.s32 4, %v3084_v48 }
 0x1e0   : > { %vm1897_vm6 = vcmp.lt.s32.totalorder %v1896_v39, 0  ;;  %v3127_v25 = vmul.u32.u64.low %v1026_v19, %v1025_v4  ;;  %v3128_v28 = vmul.u32.u64.high %v1026_v19, %v1025_v4, %v3127_v25  ;;  %v1017_v27 = vsel %vm1011_vm3, %v1014_v46, %v1016_v23 }
 0x1e1   : > { %v633_v52 = vsel %vm1897_vm6, 0, %v1896_v39  ;;  %v1930_v15 = vadd.s32 4294967169, %v1502_v37  ;;  %v1498_v34 = vand.u32 2147483647, %v3068_v12  ;;  %v3134_v61 = vadd.f32 %v3065_v2, %v431_v0 }
 0x1e2   : > { %v634_v3 = vsub.s32 32, %v633_v52  ;;  %v638_v30 = vsub.s32 4294967266, %v633_v52  ;;  %v635_v58 = vshll.u32 %v3099_v41, %v633_v52  ;;  %v3137_v35 = vadd.f32 %v3065_v2, %v1986_v63 }
 0x1e3   : > { %v1036_v21 = vadd.s32 1, %v3123_v18  ;;  %v1508_v17 = vadd.s32 1, %v1930_v15  ;;  %v649_v14 = vsel %vm564_vm2, %v648_v8, %v3084_v48  ;;  %v1033_v42 = vmul.u32 %v1026_v19, %v1017_v27  ;;  %454 = vst [vmem:[%s2540_s6 + $0x40] sm:$0xff] %v3134_v61 }
 0x1e4   : > { %v636_v54 = vshrl.u32 %v3091_v13, %v634_v3  ;;  %v639_v16 = vadd.s32 127, %v638_v30  ;;  %vm1035_vm7 = vc.u32 %v3128_v28, %v3122_v45  ;;  %457 = vst [vmem:[%s2540_s6 + $0x58] sm:$0xff] %v3137_v35  ;;  %vm3153_vm9 = vcmp.le.f32.partialorder %v562_v38, 0.7853982 }
 0x1e5   : > { %v1037_v13 = vsel %vm1035_vm7, %v1036_v21, %v3123_v18  ;;  %vm1509_vm8 = vcmp.gt.s32.totalorder %v1508_v17, 0  ;;  %vm1285_vm10 = vcmp.eq.s32.totalorder %v3086_v7, 2  ;;  %v1505_v29 = vand.u32 8388607, %v1498_v34 }
 0x1e6   : > { %v637_v41 = vor.u32 %v636_v54, %v635_v58  ;;  %v640_v24 = vshll.u32 %v639_v16, 23  ;;  %v2161_v11 = vpop.eup %2160  ;;  %v1038_v48 = vadd.s32 %v1037_v13, %v1033_v42  ;;  %v1510_v5 = vsel %vm1509_vm8, %v1508_v17, 0 }
 0x1e7   : > { %v2163_v40 = vpop.eup %2162  ;;  %v1286_v31 = vxor.u32 2147483648, %v2161_v11  ;;  %v651_v60 = vsel %vm3153_vm9, 0, %v649_v14  ;;  %v1512_v33 = vand.u32 31, %v1510_v5  ;;  %vm1282_vm11 = vcmp.eq.s32.totalorder %v3086_v7, 0 }
 0x1e8   : > { %v641_v43 = vor.u32 4788187, %v640_v24  ;;  %v1283_v19 = vxor.u32 2147483648, %v2163_v40  ;;  %v1039_v32 = vadd.s32 536870912, %v1038_v48  ;;  %v644_v59 = vcvt.s32.f32 %v637_v41 }
 0x1e9   : > { %v1287_v38 = vsel %vm1285_vm10, %v1286_v31, %v2163_v40  ;;  %vm1281_vm12 = vcmp.lt.s32.totalorder %v3086_v7, 2  ;;  %v1513_v36 = vsub.s32 32, %v1512_v33  ;;  %vm1278_vm13 = vweird.f32 %v3111_v9 }
 0x1ea   : > { %v642_v0 = vand.u32 2147483647, %v641_v43  ;;  %v1284_v26 = vsel %vm1282_vm11, %v2161_v11, %v1283_v19  ;;  %v3164_v56 = vshrl.u32 %v1039_v32, 30  ;;  %v655_v20 = vadd.s32 3, %v651_v60 }
 0x1eb   : > { %v1288_v39 = vsel %vm1281_vm12, %v1284_v26, %v1287_v38  ;;  %v1506_v47 = vor.u32 8388608, %v1505_v29  ;;  %v1515_v50 = vshll.u32 %v2350_v49, %v1512_v33  ;;  %v1516_v4 = vshrl.u32 %v2351_v51, %v1513_v36 }
 0x1ec   : > { %v645_v46 = vmul.f32 %v644_v59, %v642_v0  ;;  %v1289_v62 = vsel %vm1278_vm13, nan, %v1288_v39  ;;  %v1041_v23 = vshll.u32 %v3164_v56, 30  ;;  %v1519_v7 = vshrl.u32 %v2352_v53, %v1513_v36 }
 0x1ed   : > { %1713 = vst [vmem:[%s2858_s14 + $0x38] sm:$0xff] %v1289_v62  ;;  %v1522_v18 = vshrl.u32 %v2353_v55, %v1513_v36  ;;  %v1518_v9 = vshll.u32 %v2351_v51, %v1512_v33  ;;  %v1521_v52 = vshll.u32 %v2352_v53, %v1512_v33  ;;  %v1525_v8 = vshrl.u32 %v2354_v57, %v1513_v36 }
 0x1ee   : > { %v646_v37 = vxor.u32 2147483648, %v645_v46  ;;  %v3173_v63 = vsub.s32 %v1038_v48, %v1041_v23  ;;  %v1511_v3 = vshrl.u32 %v1510_v5, 5  ;;  %v1517_v30 = vor.u32 %v1516_v4, %v1515_v50 }
 0x1ef   : > { %v1524_v27 = vshll.u32 %v2353_v55, %v1512_v33  ;;  %v1520_v54 = vor.u32 %v1519_v7, %v1518_v9  ;;  %v1523_v16 = vor.u32 %v1522_v18, %v1521_v52  ;;  %v1527_v17 = vshll.u32 %v2354_v57, %v1512_v33 }
 0x1f0   : > { %v647_v25 = vsel %vm564_vm2, %v646_v37, %v645_v46  ;;  %v1044_v58 = vsub.s32 0, %v3173_v63  ;;  %v1528_v14 = vshrl.u32 %v2355_v1, %v1513_v36  ;;  %v3187_v42 = vand.u32 3, %v655_v20 }
 0x1f1   : > { %v650_v15 = vsel %vm3153_vm9, %v2926_v6, %v647_v25  ;;  %v1526_v21 = vor.u32 %v1525_v8, %v1524_v27  ;;  %v1546_v24 = vshll.u32 %v1506_v47, 8  ;;  %v1514_v13 = vshrl.u32 %v2350_v49, %v1513_v36 }
 0x1f2   : > { %2164 = vcosq.f32 %v650_v15  ;;  %v1911_v41 = vmin.u32 %v1044_v58, %v3173_v63  ;;  %v1529_v11 = vor.u32 %v1528_v14, %v1527_v17  ;;  %vm1530_vm14 = vcmp.lt.s32.totalorder %v1511_v3, 1 }
 0x1f3   : > { %2166 = vsinq.f32 %v650_v15  ;;  %v1293_v44 = vand.u32 2139095040, %v3134_v61  ;;  %vm1532_vm15 = vcmp.lt.s32.totalorder %v1511_v3, 3  ;;  %vm1533_vm0 = vcmp.lt.s32.totalorder %v1511_v3, 4 }
 0x1f4   : > { %v1046_v48 = vclz %v1911_v41  ;;  %v1538_v5 = vsel %vm1530_vm14, %v1517_v30, %v1520_v54  ;;  %v1535_v40 = vsel %vm1533_vm0, %v1523_v16, 2102212464  ;;  %v1539_v31 = vsel %vm1533_vm0, %v1526_v21, 920167782 }
 0x1f5   : > { %v1542_v43 = vsel %vm1530_vm14, %v1520_v54, %v1523_v16  ;;  %v1543_v29 = vsel %vm1533_vm0, %v1529_v11, 1326507024  ;;  %vm1531_vm1 = vcmp.lt.s32.totalorder %v1511_v3, 2  ;;  %v1540_v60 = vsel %vm1532_vm15, %v1523_v16, %v1539_v31 }
 0x1f6   : > { %v1912_v19 = vadd.s32 4294967294, %v1046_v48  ;;  %v1544_v32 = vsel %vm1532_vm15, %v1526_v21, %v1543_v29  ;;  %v1534_v33 = vsel %vm1530_vm14, %v1514_v13, %v1517_v30  ;;  %v1541_v38 = vsel %vm1531_vm1, %v1538_v5, %v1540_v60 }
 0x1f7   : > { %v1545_v0 = vsel %vm1531_vm1, %v1542_v43, %v1544_v32  ;;  %v1294_v59 = vshrl.u32 %v1293_v44, 23  ;;  %v1536_v26 = vsel %vm1532_vm15, %v1520_v54, %v1535_v40  ;;  %v1034_v47 = vadd.s32 %v3122_v45, %v3128_v28 }
 0x1f8   : > { %vm1913_vm2 = vcmp.lt.s32.totalorder %v1912_v19, 0  ;;  %v3197_v36 = vmul.u32.u64.low %v1546_v24, %v1545_v0  ;;  %v3198_v39 = vmul.u32.u64.high %v1546_v24, %v1545_v0, %v3197_v36  ;;  %vm654_vm3 = vweird.f32 %v2926_v6 }
 0x1f9   : > { %v1049_v46 = vsel %vm1913_vm2, 0, %v1912_v19  ;;  %v3200_v20 = vmul.u32.u64.low %v1546_v24, %v1541_v38  ;;  %v3201_v62 = vmul.u32.u64.high %v1546_v24, %v1541_v38, %v3200_v20  ;;  %v1922_v23 = vadd.s32 4294967169, %v1294_v59 }
 0x1fa   : > { %v1050_v50 = vsub.s32 32, %v1049_v46  ;;  %v1054_v37 = vsub.s32 4294967266, %v1049_v46  ;;  %vm980_vm4 = vcmp.lt.s32.totalorder %v2931_v10, 0  ;;  %v1537_v4 = vsel %vm1531_vm1, %v1534_v33, %v1536_v26 }
 0x1fb   : > { %v1300_v7 = vadd.s32 1, %v1922_v23  ;;  %v1051_v18 = vshll.u32 %v3173_v63, %v1049_v46  ;;  %vm1555_vm5 = vc.u32 %v3198_v39, %v3200_v20  ;;  %vm657_vm6 = vcmp.lt.s32.totalorder %v3187_v42, 2 }
 0x1fc   : > { %v1052_v9 = vshrl.u32 %v1034_v47, %v1050_v50  ;;  %v1055_v52 = vadd.s32 127, %v1054_v37  ;;  %v1064_v45 = vsub.s32 4, %v3164_v56  ;;  %v1556_v28 = vadd.s32 1, %v3201_v62 }
 0x1fd   : > { %vm1301_vm7 = vcmp.gt.s32.totalorder %v1300_v7, 0  ;;  %v1553_v3 = vmul.u32 %v1546_v24, %v1537_v4  ;;  %v1290_v54 = vand.u32 2147483647, %v3134_v61  ;;  %vm661_vm8 = vcmp.eq.s32.totalorder %v3187_v42, 2 }
 0x1fe   : > { %v1053_v25 = vor.u32 %v1052_v9, %v1051_v18  ;;  %v1056_v30 = vshll.u32 %v1055_v52, 23  ;;  %v1302_v27 = vsel %vm1301_vm7, %v1300_v7, 0  ;;  %v1557_v63 = vsel %vm1555_vm5, %v1556_v28, %v3201_v62 }
 0x1ff   : > { %v2165_v8 = vpop.eup %2164  ;;  %v1304_v16 = vand.u32 31, %v1302_v27  ;;  %vm3220_vm9 = vcmp.le.f32.partialorder %v978_v22, 0.7853982  ;;  %v1558_v41 = vadd.s32 %v1557_v63, %v1553_v3  ;;  %vm658_vm10 = vcmp.eq.s32.totalorder %v3187_v42, 0 }
 0x200   : > { %v2167_v15 = vpop.eup %2166  ;;  %v662_v58 = vxor.u32 2147483648, %v2165_v8  ;;  %v1057_v14 = vor.u32 4788187, %v1056_v30  ;;  %v1065_v13 = vsel %vm980_vm4, %v1064_v45, %v3164_v56  ;;  %v1060_v5 = vcvt.s32.f32 %v1053_v25 }
 0x201   : > { %v659_v21 = vxor.u32 2147483648, %v2167_v15  ;;  %v1305_v11 = vsub.s32 32, %v1304_v16  ;;  %v1559_v40 = vadd.s32 536870912, %v1558_v41  ;;  %v1297_v31 = vand.u32 8388607, %v1290_v54 }
 0x202   : > { %v663_v24 = vsel %vm661_vm8, %v662_v58, %v2167_v15  ;;  %v1058_v48 = vand.u32 2147483647, %v1057_v14  ;;  %v1303_v33 = vshrl.u32 %v1302_v27, 5  ;;  %v1307_v42 = vshll.u32 %v2350_v49, %v1304_v16 }
 0x203   : > { %v660_v44 = vsel %vm658_vm10, %v2165_v8, %v659_v21  ;;  %v1308_v43 = vshrl.u32 %v2351_v51, %v1305_v11  ;;  %v1311_v29 = vshrl.u32 %v2352_v53, %v1305_v11  ;;  %v3236_v56 = vshrl.u32 %v1559_v40, 30  ;;  %v434_v40 = vpop.f32.mrf.mxu1 }
 0x204   : > { %v664_v22 = vsel %vm657_vm6, %v660_v44, %v663_v24  ;;  %v1061_v60 = vmul.f32 %v1060_v5, %v1058_v48  ;;  %v1314_v32 = vshrl.u32 %v2353_v55, %v1305_v11  ;;  %v1313_v38 = vshll.u32 %v2352_v53, %v1304_v16 }
 0x205   : > { %v665_v19 = vsel %vm654_vm3, nan, %v664_v22  ;;  %v1317_v0 = vshrl.u32 %v2354_v57, %v1305_v11  ;;  %v1561_v26 = vshll.u32 %v3236_v56, 30  ;;  %v1310_v36 = vshll.u32 %v2351_v51, %v1304_v16 }
 0x206   : > { %1707 = vst [vmem:[%s2858_s14 + $0x8] sm:$0xff] %v665_v19  ;;  %v1062_v59 = vxor.u32 2147483648, %v1061_v60  ;;  %v1316_v6 = vshll.u32 %v2353_v55, %v1304_v16  ;;  %v1309_v46 = vor.u32 %v1308_v43, %v1307_v42  ;;  %v1315_v62 = vor.u32 %v1314_v32, %v1313_v38 }
 0x207   : > { %v1319_v23 = vshll.u32 %v2354_v57, %v1304_v16  ;;  %v1320_v47 = vshrl.u32 %v2355_v1, %v1305_v11  ;;  %v3250_v37 = vsub.s32 %v1558_v41, %v1561_v26  ;;  %v1312_v4 = vor.u32 %v1311_v29, %v1310_v36 }
 0x208   : > { %v1063_v50 = vsel %vm980_vm4, %v1062_v59, %v1061_v60  ;;  %v1318_v7 = vor.u32 %v1317_v0, %v1316_v6  ;;  %v1067_v9 = vsel %vm3220_vm9, 0, %v1065_v13  ;;  %v1298_v52 = vor.u32 8388608, %v1297_v31 }
 0x209   : > { %v1066_v18 = vsel %vm3220_vm9, %v2931_v10, %v1063_v50  ;;  %v1321_v45 = vor.u32 %v1320_v47, %v1319_v23  ;;  %v1564_v28 = vsub.s32 0, %v3250_v37  ;;  %vm1325_vm11 = vcmp.lt.s32.totalorder %v1303_v33, 4 }
 0x20a   : > { %2168 = vcosq.f32 %v1066_v18  ;;  %v1605_v8 = vand.u32 2139095040, %v3137_v35  ;;  %v1306_v25 = vshrl.u32 %v2350_v49, %v1305_v11  ;;  %vm1322_vm12 = vcmp.lt.s32.totalorder %v1303_v33, 1 }
 0x20b   : > { %2170 = vsinq.f32 %v1066_v18  ;;  %v1327_v30 = vsel %vm1325_vm11, %v1315_v62, 2102212464  ;;  %v1931_v3 = vmin.u32 %v1564_v28, %v3250_v37  ;;  %vm1324_vm13 = vcmp.lt.s32.totalorder %v1303_v33, 3 }
 0x20c   : > { %v1330_v27 = vsel %vm1322_vm12, %v1309_v46, %v1312_v4  ;;  %v1331_v15 = vsel %vm1325_vm11, %v1318_v7, 920167782  ;;  %v1071_v58 = vadd.s32 3, %v1067_v9  ;;  %v1334_v16 = vsel %vm1322_vm12, %v1312_v4, %v1315_v62 }
 0x20d   : > { %v1332_v63 = vsel %vm1324_vm13, %v1315_v62, %v1331_v15  ;;  %v1335_v21 = vsel %vm1325_vm11, %v1321_v45, 1326507024  ;;  %v1566_v17 = vclz %v1931_v3  ;;  %vm1323_vm14 = vcmp.lt.s32.totalorder %v1303_v33, 2 }
 0x20e   : > { %v1326_v14 = vsel %vm1322_vm12, %v1306_v25, %v1309_v46  ;;  %v1328_v41 = vsel %vm1324_vm13, %v1312_v4, %v1327_v30  ;;  %v1333_v24 = vsel %vm1323_vm14, %v1330_v27, %v1332_v63  ;;  %v1336_v13 = vsel %vm1324_vm13, %v1318_v7, %v1335_v21 }
 0x20f   : > { %v3261_v11 = vshll.u32 %v1298_v52, 8  ;;  %v1606_v44 = vshrl.u32 %v1605_v8, 23  ;;  %v1932_v48 = vadd.s32 4294967294, %v1566_v17  ;;  %v1337_v5 = vsel %vm1323_vm14, %v1334_v16, %v1336_v13 }
 0x210   : > { %v1329_v19 = vsel %vm1323_vm14, %v1326_v14, %v1328_v41  ;;  %v3274_v32 = vand.u32 3, %v1071_v58  ;;  %vm1500_vm0 = vcmp.lt.s32.totalorder %v3068_v12, 0  ;;  %v3278_v42 = vadd.f32 %v3065_v2, %v434_v40 }
 0x211   : > { %v3266_v22 = vmul.u32.u64.low %v3261_v11, %v1337_v5  ;;  %v3267_v31 = vmul.u32.u64.high %v3261_v11, %v1337_v5, %v3266_v22  ;;  %v3270_v43 = vmul.u32.u64.low %v3261_v11, %v1333_v24  ;;  %v3271_v29 = vmul.u32.u64.high %v3261_v11, %v1333_v24, %v3270_v43 }
 0x212   : > { %vm1933_vm15 = vcmp.lt.s32.totalorder %v1932_v48, 0  ;;  %v1934_v60 = vadd.s32 4294967169, %v1606_v44  ;;  %vm1070_vm1 = vweird.f32 %v2931_v10  ;;  %v1554_v38 = vadd.s32 %v3200_v20, %v3198_v39  ;;  %455 = vst [vmem:[%s2540_s6 + $0x48] sm:$0xff] %v3278_v42 }
 0x213   : > { %v1569_v33 = vsel %vm1933_vm15, 0, %v1932_v48  ;;  %v1584_v26 = vsub.s32 4, %v3236_v56  ;;  %v1345_v36 = vmul.u32 %v3261_v11, %v1329_v19  ;;  %vm1347_vm2 = vc.u32 %v3267_v31, %v3270_v43 }
 0x214   : > { %v1570_v0 = vsub.s32 32, %v1569_v33  ;;  %v1574_v2 = vsub.s32 4294967266, %v1569_v33  ;;  %v1612_v59 = vadd.s32 1, %v1934_v60  ;;  %v1348_v6 = vadd.s32 1, %v3271_v29 }
 0x215   : > { %v1571_v46 = vshll.u32 %v3250_v37, %v1569_v33 }
 0x216   : > { %v1572_v62 = vshrl.u32 %v1554_v38, %v1570_v0  ;;  %v1575_v39 = vadd.s32 127, %v1574_v2  ;;  %vm1613_vm3 = vcmp.gt.s32.totalorder %v1612_v59, 0 }
 0x217   : > { %2259 = shalt.err (!%p2256_p0)
}
 0x218   : > { %s2260_s23 = scalar_lea.hbm %s3285_s26, 1536  ;;  %s2264_s25 = scalar_lea.hbm %s3517_s4, 6144 }
 0x219   : > { %p2261_p10 = scmp.ne.s32.totalorder %s3285_s26, %s2260_s23  ;;  %p2265_p4 = scmp.lt.s32.totalorder %s3285_s26, %s3517_s4 }
 0x21a   : > { %p2266_p6 = scmp.lt.s32.totalorder %s2264_s25, %s2260_s23 }
 0x21b   : > { %p2262_p2 = pnand %p2261_p10, %p3549_p5 }
 0x21c   : > { %p2267_p8 = por %p2266_p6, %p2265_p4 }
 0x21d   : > { %p2263_p1 = pneg %p2262_p2 }
 0x21f   : > { %p2268_p3 = pnand %p2267_p8, %p2263_p1 }
 0x221   : > { %2271 = shalt.err (!%p2268_p3)
}
 0x222   : > { %s2357_s13 = smov 128   ;;  %s2358_s8 = smov 8   ;;  %v2169_v20 = vpop.eup %2168  ;;  %vm3328_vm4 = vcmp.le.f32.partialorder %v1498_v34, 0.7853982  ;;  %v1349_v47 = vsel %vm1347_vm2, %v1348_v6, %v3271_v29  ;;  %v1602_v50 = vand.u32 2147483647, %v3137_v35  ;;  %v1573_v18 = vor.u32 %v1572_v62, %v1571_v46 }
 0x223   : > { %2061 = dma.vmem_to_hbm [thread:$0]  (%p3549_p5), %s3287_s24, 1536, %s3285_s26, %s1724_s7, %s2357_s13, %s2357_s13, %s2358_s8   ;;  %v1614_v37 = vsel %vm1613_vm3, %v1612_v59, 0  ;;  %v2171_v4 = vpop.eup %2170  ;;  %v1078_v7 = vxor.u32 2147483648, %v2169_v20  ;;  %v1576_v9 = vshll.u32 %v1575_v39, 23  ;;  %v1350_v52 = vadd.s32 %v1349_v47, %v1345_v36 }
 0x224   : > { %vm1074_vm5 = vcmp.eq.s32.totalorder %v3274_v32, 0  ;;  %v1075_v34 = vxor.u32 2147483648, %v2171_v4  ;;  %vm1077_vm6 = vcmp.eq.s32.totalorder %v3274_v32, 2  ;;  %v1616_v45 = vand.u32 31, %v1614_v37  ;;  %s1737_s24 = sshll.u32 %s2858_s14, 4  ;;  %s3467_s12 = scalar_lea.hbm %s3516_s3, %s1943_s29  ;;  %s3469_s24 = int_to_ptr.vmem [resolvable:$true] %s1737_s24 }
 0x225   : > { %v1079_v28 = vsel %vm1077_vm6, %v1078_v7, %v2171_v4  ;;  %v1577_v8 = vor.u32 4788187, %v1576_v9  ;;  %v1585_v25 = vsel %vm1500_vm0, %v1584_v26, %v3236_v56  ;;  %v1351_v30 = vadd.s32 536870912, %v1350_v52  ;;  %s1719_s20 = scalar_lea.sflag [#allocation4], %s2506_s30  ;;  %s2272_s21 = scalar_lea.vmem %s3469_s24, 1536 }
 0x226   : > { %vm1073_vm7 = vcmp.lt.s32.totalorder %v3274_v32, 2  ;;  %v1076_v3 = vsel %vm1074_vm5, %v2169_v20, %v1075_v34  ;;  %v1609_v27 = vand.u32 8388607, %v1602_v50  ;;  %v1617_v15 = vsub.s32 32, %v1616_v45  ;;  %p2273_p7 = scmp.ne.s32.totalorder %s3469_s24, %s2272_s21  ;;  %s2359_s23 = smov [#allocation7]  }
 0x227   : > { %v1080_v58 = vsel %vm1073_vm7, %v1076_v3, %v1079_v28  ;;  %v1578_v63 = vand.u32 2147483647, %v1577_v8  ;;  %v1580_v16 = vcvt.s32.f32 %v1573_v18  ;;  %v3346_v21 = vshrl.u32 %v1351_v30, 30  ;;  %s2276_s19 = sshll.u32 %s2359_s23, 4  ;;  %s2277_s19 = int_to_ptr.vmem [resolvable:$false] %s2276_s19 }
 0x228   : > { %v1081_v17 = vsel %vm1070_vm1, nan, %v1080_v58  ;;  %v1587_v14 = vsel %vm3328_vm4, 0, %v1585_v25  ;;  %v1620_v24 = vshrl.u32 %v2351_v51, %v1617_v15  ;;  %v1623_v13 = vshrl.u32 %v2352_v53, %v1617_v15  ;;  %p2274_p9 = pnand %p2273_p7, %p3549_p5  ;;  %s2278_s5 = scalar_lea.vmem %s2277_s19, 3072 }
 0x229   : > { %1711 = vst [vmem:[%s2858_s14 + $0x28] sm:$0xff] %v1081_v17  ;;  %v1581_v56 = vmul.f32 %v1580_v16, %v1578_v63  ;;  %v1353_v41 = vshll.u32 %v3346_v21, 30  ;;  %v1610_v11 = vor.u32 8388608, %v1609_v27  ;;  %v1615_v44 = vshrl.u32 %v1614_v37, 5  ;;  %p2279_p12 = scmp.lt.s32.totalorder %s3469_s24, %s2277_s19  ;;  %p2280_p13 = scmp.lt.s32.totalorder %s2278_s5, %s2272_s21 }
 0x22a   : > { %v1626_v48 = vshrl.u32 %v2353_v55, %v1617_v15  ;;  %v1629_v5 = vshrl.u32 %v2354_v57, %v1617_v15  ;;  %v1619_v22 = vshll.u32 %v2350_v49, %v1616_v45  ;;  %v1622_v29 = vshll.u32 %v2351_v51, %v1616_v45  ;;  %p2275_p11 = pneg %p2274_p9 }
 0x22b   : > { %v1582_v40 = vxor.u32 2147483648, %v1581_v56  ;;  %v1354_v10 = vsub.s32 %v1350_v52, %v1353_v41  ;;  %v1625_v19 = vshll.u32 %v2352_v53, %v1616_v45  ;;  %v1628_v60 = vshll.u32 %v2353_v55, %v1616_v45  ;;  %p2281_p0 = por %p2280_p13, %p2279_p12 }
 0x22c   : > { %v1631_v32 = vshll.u32 %v2354_v57, %v1616_v45  ;;  %v1632_v33 = vshrl.u32 %v2355_v1, %v1617_v15  ;;  %v1621_v2 = vor.u32 %v1620_v24, %v1619_v22  ;;  %v1624_v59 = vor.u32 %v1623_v13, %v1622_v29 }
 0x22d   : > { %v1583_v38 = vsel %vm1500_vm0, %v1582_v40, %v1581_v56  ;;  %v1356_v0 = vsub.s32 0, %v1354_v10  ;;  %v1627_v36 = vor.u32 %v1626_v48, %v1625_v19  ;;  %v1630_v6 = vor.u32 %v1629_v5, %v1628_v60  ;;  %p2282_p10 = pnand %p2281_p0, %p2275_p11 }
 0x22e   : > { %v1586_v26 = vsel %vm3328_vm4, %v3068_v12, %v1583_v38  ;;  %v1633_v46 = vor.u32 %v1632_v33, %v1631_v32  ;;  %v1591_v62 = vadd.s32 3, %v1587_v14  ;;  %v1650_v20 = vshll.u32 %v1610_v11, 8 }
 0x22f   : > { %2172 = vcosq.f32 %v1586_v26  ;;  %v1923_v39 = vmin.u32 %v1356_v0, %v1354_v10  ;;  %v1618_v47 = vshrl.u32 %v2350_v49, %v1617_v15  ;;  %vm1634_vm8 = vcmp.lt.s32.totalorder %v1615_v44, 1 }
 0x230   : > { %2174 = vsinq.f32 %v1586_v26  ;;  %v1397_v37 = vand.u32 2139095040, %v3278_v42  ;;  %vm1636_vm9 = vcmp.lt.s32.totalorder %v1615_v44, 3  ;;  %vm1637_vm10 = vcmp.lt.s32.totalorder %v1615_v44, 4 }
 0x231   : > { %v1358_v4 = vclz %v1923_v39  ;;  %v1642_v7 = vsel %vm1634_vm8, %v1621_v2, %v1624_v59  ;;  %v1639_v18 = vsel %vm1637_vm10, %v1627_v36, 2102212464  ;;  %v1643_v23 = vsel %vm1637_vm10, %v1630_v6, 920167782 }
 0x232   : > { %v1646_v9 = vsel %vm1634_vm8, %v1624_v59, %v1627_v36  ;;  %v1647_v52 = vsel %vm1637_vm10, %v1633_v46, 1326507024  ;;  %vm1635_vm11 = vcmp.lt.s32.totalorder %v1615_v44, 2  ;;  %v1644_v45 = vsel %vm1636_vm9, %v1627_v36, %v1643_v23 }
 0x233   : > { %v1924_v34 = vadd.s32 4294967294, %v1358_v4  ;;  %v1648_v28 = vsel %vm1636_vm9, %v1630_v6, %v1647_v52  ;;  %v1638_v8 = vsel %vm1634_vm8, %v1618_v47, %v1621_v2  ;;  %v1645_v25 = vsel %vm1635_vm11, %v1642_v7, %v1644_v45 }
 0x234   : > { %v1649_v30 = vsel %vm1635_vm11, %v1646_v9, %v1648_v28  ;;  %v1398_v3 = vshrl.u32 %v1397_v37, 23  ;;  %v1640_v27 = vsel %vm1636_vm9, %v1624_v59, %v1639_v18  ;;  %v1346_v56 = vadd.s32 %v3270_v43, %v3267_v31 }
 0x235   : > { %vm1925_vm12 = vcmp.lt.s32.totalorder %v1924_v34, 0  ;;  %v3376_v15 = vmul.u32.u64.low %v1650_v20, %v1649_v30  ;;  %v3377_v58 = vmul.u32.u64.high %v1650_v20, %v1649_v30, %v3376_v15  ;;  %v1592_v13 = vand.u32 3, %v1591_v62 }
 0x236   : > { %v1361_v63 = vsel %vm1925_vm12, 0, %v1924_v34  ;;  %v3379_v16 = vmul.u32.u64.low %v1650_v20, %v1645_v25  ;;  %v3380_v17 = vmul.u32.u64.high %v1650_v20, %v1645_v25, %v3379_v16  ;;  %v1926_v14 = vadd.s32 4294967169, %v1398_v3 }
 0x237   : > { %v1362_v41 = vsub.s32 32, %v1361_v63  ;;  %v1366_v24 = vsub.s32 4294967266, %v1361_v63  ;;  %v1641_v11 = vsel %vm1635_vm11, %v1638_v8, %v1640_v27  ;;  %v1363_v5 = vshll.u32 %v1354_v10, %v1361_v63 }
 0x238   : > { %v1404_v48 = vadd.s32 1, %v1926_v14  ;;  %vm1659_vm13 = vc.u32 %v3377_v58, %v3379_v16  ;;  %vm1590_vm14 = vweird.f32 %v3068_v12  ;;  %v1660_v29 = vadd.s32 1, %v3380_v17 }
 0x239   : > { %v1364_v40 = vshrl.u32 %v1346_v56, %v1362_v41  ;;  %v1367_v22 = vadd.s32 127, %v1366_v24  ;;  %v1657_v31 = vmul.u32 %v1650_v20, %v1641_v11  ;;  %vm1593_vm0 = vcmp.lt.s32.totalorder %v1592_v13, 2 }
 0x23a   : > { %vm1405_vm15 = vcmp.gt.s32.totalorder %v1404_v48, 0  ;;  %vm1594_vm1 = vcmp.eq.s32.totalorder %v1592_v13, 0  ;;  %vm1292_vm2 = vcmp.lt.s32.totalorder %v3134_v61, 0  ;;  %v1661_v44 = vsel %vm1659_vm13, %v1660_v29, %v3380_v17 }
 0x23b   : > { %v1365_v19 = vor.u32 %v1364_v40, %v1363_v5  ;;  %v1368_v60 = vshll.u32 %v1367_v22, 23  ;;  %v1406_v43 = vsel %vm1405_vm15, %v1404_v48, 0  ;;  %vm1597_vm3 = vcmp.eq.s32.totalorder %v1592_v13, 2 }
 0x23c   : > { %v2173_v32 = vpop.eup %2172  ;;  %v1408_v10 = vand.u32 31, %v1406_v43  ;;  %vm3394_vm4 = vcmp.le.f32.partialorder %v1290_v54, 0.7853982  ;;  %v1662_v59 = vadd.s32 %v1661_v44, %v1657_v31  ;;  %v1376_v36 = vsub.s32 4, %v3346_v21 }
 0x23d   : > { %v2175_v33 = vpop.eup %2174  ;;  %v1598_v38 = vxor.u32 2147483648, %v2173_v32  ;;  %v1369_v2 = vor.u32 4788187, %v1368_v60  ;;  %v1394_v6 = vand.u32 2147483647, %v3278_v42  ;;  %v1372_v20 = vcvt.s32.f32 %v1365_v19 }
 0x23e   : > { %v1595_v26 = vxor.u32 2147483648, %v2175_v33  ;;  %v1409_v46 = vsub.s32 32, %v1408_v10  ;;  %v1663_v47 = vadd.s32 536870912, %v1662_v59  ;;  %v1411_v54 = vshll.u32 %v2350_v49, %v1408_v10 }
 0x23f   : > { %v1599_v62 = vsel %vm1597_vm3, %v1598_v38, %v2175_v33  ;;  %v1370_v39 = vand.u32 2147483647, %v1369_v2  ;;  %v1401_v45 = vand.u32 8388607, %v1394_v6  ;;  %v1407_v28 = vshrl.u32 %v1406_v43, 5 }
 0x240   : > { %v1596_v37 = vsel %vm1594_vm1, %v2173_v32, %v1595_v26  ;;  %v1412_v4 = vshrl.u32 %v2351_v51, %v1409_v46  ;;  %v1415_v7 = vshrl.u32 %v2352_v53, %v1409_v46  ;;  %v3405_v9 = vshrl.u32 %v1663_v47, 30 }
 0x241   : > { %v1600_v18 = vsel %vm1593_vm0, %v1596_v37, %v1599_v62  ;;  %v1373_v23 = vmul.f32 %v1372_v20, %v1370_v39  ;;  %v1418_v52 = vshrl.u32 %v2353_v55, %v1409_v46  ;;  %v1414_v8 = vshll.u32 %v2351_v51, %v1408_v10 }
 0x242   : > { %v1601_v34 = vsel %vm1590_vm14, nan, %v1600_v18  ;;  %v1665_v30 = vshll.u32 %v3405_v9, 30  ;;  %v1413_v3 = vor.u32 %v1412_v4, %v1411_v54  ;;  %v1417_v27 = vshll.u32 %v2352_v53, %v1408_v10 }
 0x243   : > { %1716 = vst [vmem:[%s2858_s14 + $0x50] sm:$0xff] %v1601_v34  ;;  %v1374_v25 = vxor.u32 2147483648, %v1373_v23  ;;  %v1420_v15 = vshll.u32 %v2353_v55, %v1408_v10  ;;  %v1421_v63 = vshrl.u32 %v2354_v57, %v1409_v46  ;;  %v1423_v12 = vshll.u32 %v2354_v57, %v1408_v10 }
 0x244   : > { %v1424_v17 = vshrl.u32 %v2355_v1, %v1409_v46  ;;  %v1666_v56 = vsub.s32 %v1662_v59, %v1665_v30  ;;  %v1416_v51 = vor.u32 %v1415_v7, %v1414_v8  ;;  %v1419_v41 = vor.u32 %v1418_v52, %v1417_v27 }
 0x245   : > { %v1375_v14 = vsel %vm1292_vm2, %v1374_v25, %v1373_v23  ;;  %v1422_v13 = vor.u32 %v1421_v63, %v1420_v15  ;;  %v1377_v55 = vsel %vm1292_vm2, %v1376_v36, %v3346_v21  ;;  %v1402_v11 = vor.u32 8388608, %v1401_v45 }
 0x246   : > { %v1378_v24 = vsel %vm3394_vm4, %v3134_v61, %v1375_v14  ;;  %v1425_v53 = vor.u32 %v1424_v17, %v1423_v12  ;;  %v1668_v57 = vsub.s32 0, %v1666_v56  ;;  %vm1426_vm5 = vcmp.lt.s32.totalorder %v1407_v28, 1 }
 0x247   : > { %2176 = vcosq.f32 %v1378_v24  ;;  %vm1428_vm6 = vcmp.lt.s32.totalorder %v1407_v28, 3  ;;  %vm1429_vm7 = vcmp.lt.s32.totalorder %v1407_v28, 4  ;;  %v1434_v5 = vsel %vm1426_vm5, %v1413_v3, %v1416_v51 }
 0x248   : > { %2178 = vsinq.f32 %v1378_v24  ;;  %v1935_v1 = vmin.u32 %v1668_v57, %v1666_v56  ;;  %v1431_v48 = vsel %vm1429_vm7, %v1419_v41, 2102212464  ;;  %v1435_v40 = vsel %vm1429_vm7, %v1422_v13, 920167782 }
 0x249   : > { %v1410_v22 = vshrl.u32 %v2350_v49, %v1409_v46  ;;  %v1436_v29 = vsel %vm1428_vm6, %v1419_v41, %v1435_v40  ;;  %v1438_v19 = vsel %vm1426_vm5, %v1416_v51, %v1419_v41  ;;  %v1439_v60 = vsel %vm1429_vm7, %v1425_v53, 1326507024 }
 0x24a   : > { %v1379_v21 = vsel %vm3394_vm4, 0, %v1377_v55  ;;  %v1670_v31 = vclz %v1935_v1  ;;  %vm1427_vm8 = vcmp.lt.s32.totalorder %v1407_v28, 2  ;;  %v1442_v43 = vshll.u32 %v1402_v11, 8 }
 0x24b   : > { %v1430_v32 = vsel %vm1426_vm5, %v1410_v22, %v1413_v3  ;;  %v1432_v44 = vsel %vm1428_vm6, %v1416_v51, %v1431_v48  ;;  %v1437_v10 = vsel %vm1427_vm8, %v1434_v5, %v1436_v29  ;;  %v1440_v33 = vsel %vm1428_vm6, %v1422_v13, %v1439_v60 }
 0x24c   : > { %v1936_v38 = vadd.s32 4294967294, %v1670_v31  ;;  %v1441_v2 = vsel %vm1427_vm8, %v1438_v19, %v1440_v33  ;;  %v3434_v59 = vmul.u32.u64.low %v1442_v43, %v1437_v10  ;;  %v3435_v49 = vmul.u32.u64.high %v1442_v43, %v1437_v10, %v3434_v59 }
 0x24d   : > { %v1383_v26 = vadd.s32 3, %v1379_v21  ;;  %v3437_v36 = vmul.u32.u64.low %v1442_v43, %v1441_v2  ;;  %v3438_v46 = vmul.u32.u64.high %v1442_v43, %v1441_v2, %v3437_v36  ;;  %v1433_v0 = vsel %vm1427_vm8, %v1430_v32, %v1432_v44 }
 0x24e   : > { %vm1937_vm9 = vcmp.lt.s32.totalorder %v1936_v38, 0  ;;  %v1658_v39 = vadd.s32 %v3379_v16, %v3377_v58  ;;  %v1452_v37 = vadd.s32 1, %v3435_v49  ;;  %v1449_v4 = vmul.u32 %v1442_v43, %v1433_v0 }
 0x24f   : > { %v1673_v62 = vsel %vm1937_vm9, 0, %v1936_v38  ;;  %v1384_v54 = vand.u32 3, %v1383_v26  ;;  %vm1451_vm10 = vc.u32 %v3438_v46, %v3434_v59  ;;  %vm1382_vm14 = vweird.f32 %v3134_v61 }
 0x250   : > { %v1674_v20 = vsub.s32 32, %v1673_v62  ;;  %v1678_v47 = vsub.s32 4294967266, %v1673_v62  ;;  %v1675_v7 = vshll.u32 %v1666_v56, %v1673_v62  ;;  %v1453_v52 = vsel %vm1451_vm10, %v1452_v37, %v3435_v49 }
 0x251   : > { %v1454_v45 = vadd.s32 %v1453_v52, %v1449_v4  ;;  %vm1389_vm11 = vcmp.eq.s32.totalorder %v1384_v54, 2  ;;  %vm1386_vm12 = vcmp.eq.s32.totalorder %v1384_v54, 0  ;;  %vm1385_vm13 = vcmp.lt.s32.totalorder %v1384_v54, 2 }
 0x252   : > { %v1676_v18 = vshrl.u32 %v1658_v39, %v1674_v20  ;;  %v1679_v23 = vadd.s32 127, %v1678_v47  ;;  %vm1604_vm15 = vcmp.lt.s32.totalorder %v3137_v35, 0  ;;  %v1688_v53 = vsub.s32 4, %v3405_v9 }
 0x253   : > { %v1455_v16 = vadd.s32 536870912, %v1454_v45  ;;  %vm1603_vm0 = vcmp.le.f32.partialorder %v1602_v50, 0.7853982  ;;  %v1450_v19 = vadd.s32 %v3434_v59, %v3438_v46  ;;  %vm1694_vm5 = vweird.f32 %v3137_v35 }
 0x254   : > { %v2177_v34 = vpop.eup %2176  ;;  %v1677_v25 = vor.u32 %v1676_v18, %v1675_v7  ;;  %v1680_v30 = vshll.u32 %v1679_v23, 23  ;;  %v1689_v1 = vsel %vm1604_vm15, %v1688_v53, %v3405_v9  ;;  %vm1396_vm6 = vcmp.lt.s32.totalorder %v3278_v42, 0 }
 0x255   : > { %v2179_v28 = vpop.eup %2178  ;;  %v1390_v8 = vxor.u32 2147483648, %v2177_v34  ;;  %v1456_v63 = vshrl.u32 %v1455_v16, 30  ;;  %v1691_v40 = vsel %vm1603_vm0, 0, %v1689_v1  ;;  %vm1395_vm7 = vcmp.le.f32.partialorder %v1394_v6, 0.7853982 }
 0x256   : > { %v1387_v58 = vxor.u32 2147483648, %v2179_v28  ;;  %v1681_v27 = vor.u32 4788187, %v1680_v30  ;;  %v1684_v14 = vcvt.s32.f32 %v1677_v25  ;;  %v1695_v29 = vadd.s32 3, %v1691_v40 }
 0x257   : > { %v1391_v3 = vsel %vm1389_vm11, %v1390_v8, %v2179_v28  ;;  %v1457_v51 = vshll.u32 %v1456_v63, 30  ;;  %v1480_v47 = vsub.s32 4, %v1456_v63  ;;  %vm1486_vm11 = vweird.f32 %v3278_v42 }
 0x258   : > { %v1388_v15 = vsel %vm1386_vm12, %v2177_v34, %v1387_v58  ;;  %v1682_v17 = vand.u32 2147483647, %v1681_v27  ;;  %v1696_v32 = vand.u32 3, %v1695_v29 }
 0x259   : > { %v1392_v12 = vsel %vm1385_vm13, %v1388_v15, %v1391_v3  ;;  %v1458_v24 = vsub.s32 %v1454_v45, %v1457_v51  ;;  %v1481_v4 = vsel %vm1396_vm6, %v1480_v47, %v1456_v63 }
 0x25a   : > { %v1393_v56 = vsel %vm1382_vm14, nan, %v1392_v12  ;;  %v1685_v41 = vmul.f32 %v1684_v14, %v1682_v17  ;;  %vm1701_vm2 = vcmp.eq.s32.totalorder %v1696_v32, 2  ;;  %vm1698_vm3 = vcmp.eq.s32.totalorder %v1696_v32, 0 }
 0x25b   : > { %1714 = vst [vmem:[%s2858_s14 + $0x40] sm:$0xff] %v1393_v56  ;;  %v1460_v55 = vsub.s32 0, %v1458_v24  ;;  %vm1697_vm4 = vcmp.lt.s32.totalorder %v1696_v32, 2  ;;  %v1483_v7 = vsel %vm1395_vm7, 0, %v1481_v4 }
 0x25c   : > { %v1686_v13 = vxor.u32 2147483648, %v1685_v41 }
 0x25d   : > { %v1927_v11 = vmin.u32 %v1460_v55, %v1458_v24 }
 0x25e   : > { %v1687_v57 = vsel %vm1604_vm15, %v1686_v13, %v1685_v41 }
 0x25f   : > { %v1690_v61 = vsel %vm1603_vm0, %v3137_v35, %v1687_v57  ;;  %v1462_v48 = vclz %v1927_v11  ;;  %v1487_v35 = vadd.s32 3, %v1483_v7 }
 0x260   : > { %2180 = vcosq.f32 %v1690_v61 }
 0x261   : > { %2182 = vsinq.f32 %v1690_v61  ;;  %v1928_v5 = vadd.s32 4294967294, %v1462_v48  ;;  %v1488_v18 = vand.u32 3, %v1487_v35 }
 0x263   : > { %vm1929_vm1 = vcmp.lt.s32.totalorder %v1928_v5, 0  ;;  %vm1493_vm8 = vcmp.eq.s32.totalorder %v1488_v18, 2  ;;  %vm1490_vm9 = vcmp.eq.s32.totalorder %v1488_v18, 0  ;;  %vm1489_vm10 = vcmp.lt.s32.totalorder %v1488_v18, 2 }
 0x264   : > { %v1465_v22 = vsel %vm1929_vm1, 0, %v1928_v5 }
 0x265   : > { %v1466_v60 = vsub.s32 32, %v1465_v22  ;;  %v1470_v21 = vsub.s32 4294967266, %v1465_v22  ;;  %v1467_v31 = vshll.u32 %v1458_v24, %v1465_v22 }
 0x267   : > { %v1468_v50 = vshrl.u32 %v1450_v19, %v1466_v60  ;;  %v1471_v43 = vadd.s32 127, %v1470_v21 }
 0x269   : > { %v1469_v44 = vor.u32 %v1468_v50, %v1467_v31  ;;  %v1472_v10 = vshll.u32 %v1471_v43, 23 }
 0x26b   : > { %v1473_v38 = vor.u32 4788187, %v1472_v10  ;;  %v1476_v36 = vcvt.s32.f32 %v1469_v44 }
 0x26d   : > { %v2181_v33 = vpop.eup %2180  ;;  %v1474_v26 = vand.u32 2147483647, %v1473_v38 }
 0x26e   : > { %v2183_v9 = vpop.eup %2182  ;;  %v1702_v2 = vxor.u32 2147483648, %v2181_v33 }
 0x26f   : > { %v1699_v49 = vxor.u32 2147483648, %v2183_v9  ;;  %v1477_v46 = vmul.f32 %v1476_v36, %v1474_v26 }
 0x270   : > { %v1703_v0 = vsel %vm1701_vm2, %v1702_v2, %v2183_v9 }
 0x271   : > { %v1700_v59 = vsel %vm1698_vm3, %v2181_v33, %v1699_v49  ;;  %v1478_v20 = vxor.u32 2147483648, %v1477_v46 }
 0x272   : > { %v1704_v62 = vsel %vm1697_vm4, %v1700_v59, %v1703_v0 }
 0x273   : > { %v1705_v39 = vsel %vm1694_vm5, nan, %v1704_v62  ;;  %v1479_v37 = vsel %vm1396_vm6, %v1478_v20, %v1477_v46 }
 0x274   : > { %1717 = vst [vmem:[%s2858_s14 + $0x58] sm:$0xff] %v1705_v39  ;;  %v1482_v54 = vsel %vm1395_vm7, %v3278_v42, %v1479_v37 }
 0x275   : > { %2184 = vcosq.f32 %v1482_v54 }
 0x276   : > { %2186 = vsinq.f32 %v1482_v54 }
 0x282   : > { %v2185_v23 = vpop.eup %2184 }
 0x283   : > { %v2187_v52 = vpop.eup %2186  ;;  %v1494_v34 = vxor.u32 2147483648, %v2185_v23 }
 0x284   : > { %v1491_v45 = vxor.u32 2147483648, %v2187_v52 }
 0x285   : > { %v1495_v6 = vsel %vm1493_vm8, %v1494_v34, %v2187_v52 }
 0x286   : > { %v1492_v28 = vsel %vm1490_vm9, %v2185_v23, %v1491_v45 }
 0x287   : > { %v1496_v8 = vsel %vm1489_vm10, %v1492_v28, %v1495_v6 }
 0x288   : > { %v1497_v25 = vsel %vm1486_vm11, nan, %v1496_v8 }
 0x289   : > { %1715 = vst [vmem:[%s2858_s14 + $0x48] sm:$0xff] %v1497_v25 }
 0x28a   : > { %2285 = shalt.err (!%p2282_p10)
}
 0x28b   : > { %s2286_s14 = scalar_lea.hbm %s3467_s12, 1536  ;;  %s2290_s6 = scalar_lea.hbm %s3516_s3, 6144 }
 0x28c   : > { %p2287_p2 = scmp.ne.s32.totalorder %s3467_s12, %s2286_s14  ;;  %p2291_p6 = scmp.lt.s32.totalorder %s3467_s12, %s3516_s3 }
 0x28d   : > { %p2292_p8 = scmp.lt.s32.totalorder %s2290_s6, %s2286_s14 }
 0x28e   : > { %p2288_p1 = pnand %p2287_p2, %p3549_p5 }
 0x28f   : > { %p2293_p3 = por %p2292_p8, %p2291_p6 }
 0x290   : > { %p2289_p4 = pneg %p2288_p1 }
 0x292   : > { %p2294_p7 = pnand %p2293_p3, %p2289_p4 }
 0x294   : > { %2297 = shalt.err (!%p2294_p7)
}
 0x295   : > { %2060 = dma.vmem_to_hbm [thread:$0]  (%p3549_p5), %s3469_s24, 1536, %s3467_s12, %s1719_s20, %s2357_s13, %s2357_s13, %s2358_s8  }
 0x296 PF: > { %p2082_p9 = scmp.ge.s32.totalorder %s2344_s18, 2  ;;  %s1768_s11 = sand.u32 1, %s2332_s15  }
 0x297   : > { %p3554_p11 = scmp.ne.s32.totalorder %s3523_s22, 0  ;;  %s1769_s26 = scalar_lea.sflag [#allocation4], %s1768_s11 }
 0x299   : > { %p2073_p12 = pnand %p2082_p9, %p3554_p11 }
 0x29b   : > { %p2074_p13 = pneg %p2073_p12 }
 0x29d   : > { %2323 = dma.done.wait (%p2074_p13), %s1769_s26, 1536  }
 0x29e   : > { %2325 = vsyncadd (%p2074_p13), %s1769_s26, 4294965760  ;;  %s1778_s7 = scalar_lea.sflag [#allocation9], %s1768_s11 }
 0x29f   : > { %2327 = dma.done.wait (%p2074_p13), %s1778_s7, 1536  }
 0x2a0   : > { %2329 = vsyncadd (%p2074_p13), %s1778_s7, 4294965760  ;;  %p22_p5 = scmp.ge.s32.totalorder %s2438_s27, 6   ;;  %s3555_s15 = smov %s2336_s16 }
 0x2a1   : > { %s3556_s16 = smov %s2340_s17  ;;  %s3557_s17 = smov %s2458_s9 }
 0x2a2   : > { %s3558_s18 = smov %s2438_s27  ;;  %24 = sbr.rel (!%p22_p5) target bundleno = 8 (0x8), region = 98 }
 0x2a7   :  { %1783 = vsyncpa [#allocation3], 1 }
 0x2a8   :  { %1785 = vsyncpa [#allocation3 + $0x1], 1 }
 0x2a9   :  { %1786 = vsyncpa [#allocation6], 1 }
 0x2aa   :  { %1787 = vsyncpa [#allocation4], 1 }
 0x2ab   :  { %1789 = vsyncpa [#allocation4 + $0x1], 1 }
 0x2ac   :  { %1790 = vsyncpa [#allocation9], 1 }
 0x2ad   :  { %1792 = vsyncpa [#allocation9 + $0x1], 1 }

// kernel: tpu_custom_call.1
= control target key start
LH: loop header
LB: loop body
LE: loop exit
PB: predicated region body
PF: predicated region fallthrough
CT: control target
= control target key end

     0   :  { %10 = vsyncpa [#allocation3], 0  ;;  %s3513_s0 = inlined_call_operand.hbm [shape: bf16[384,128], index: 0, kind: input, shape index: {}]   ;;  %s3514_s1 = inlined_call_operand.hbm [shape: bf16[128,128], index: 1, kind: input, shape index: {}]   ;;  %s3515_s2 = inlined_call_operand.vmem [shape: f32[1,128], index: 2, kind: input, shape index: {}]   ;;  %s3516_s3 = inlined_call_operand.hbm [shape: f32[384,128], index: 3, kind: output, shape index: {0}]   ;;  %s3517_s4 = inlined_call_operand.hbm [shape: f32[384,128], index: 4, kind: output, shape index: {1}]  }
   0x1   :  { %12 = vsyncpa [#allocation3 + $0x1], 0 }
   0x2   :  { %13 = vsyncpa [#allocation6], 0 }
   0x3   :  { %14 = vsyncpa [#allocation4], 0 }
   0x4   :  { %16 = vsyncpa [#allocation4 + $0x1], 0 }
   0x5   :  { %17 = vsyncpa [#allocation9], 0 }
   0x6   :  { %19 = vsyncpa [#allocation9 + $0x1], 0  ;;  %s2385_s15 = smov 0   ;;  %s2387_s16 = smov 0  }
   0x7   :  { %s2389_s17 = smov 0   ;;  %s2391_s18 = smov 0  }
   0x8 LB: > { %s2406_s19 = sadd.s32 4294967295, %s2344_s18   ;;  %s1868_s20 = sadd.s32 4294967294, %s2344_s18   ;;  %s2344_s18 = sphi %s2391_s18, %s3558_s18   ;;  %s2340_s17 = sphi %s2389_s17, %s3557_s17   ;;  %s2336_s16 = sphi %s2387_s16, %s3556_s16   ;;  %s2332_s15 = sphi %s2385_s15, %s3555_s15  }
   0x9   : > { %p45_p0 = scmp.ne.s32.totalorder %s2336_s16, %s2332_s15  ;;  %p3518_p1 = scmp.eq.s32.totalorder %s2406_s19, 0 }
   0xa   : > { %p117_p3 = scmp.eq.s32.totalorder %s1868_s20, 3  ;;  %p1869_p5 = scmp.ge.s32.totalorder %s2344_s18, 1 }
   0xb   : > { %p2415_p4 = por %p3518_p1, %p45_p0  ;;  %p150_p7 = scmp.lt.s32.totalorder %s2344_s18, 5 }
   0xc   : > { %p2420_p6 = por %p117_p3, %p45_p0  ;;  %s2346_s24 = smov [#allocation5]  }
   0xd   : > { %s3522_s21 = scalar_select %p2415_p4, 1, 0 }
   0xe   : > { %s3523_s22 = scalar_select %p2420_p6, 1, 0 }
   0xf   : > { %p2425_p8 = pnand %p1869_p5, %p150_p7  ;;  %s162_s25 = sshll.u32 %s2346_s24, 4  ;;  %s163_s25 = int_to_ptr.vmem [resolvable:$true] %s162_s25 }
  0x10   : > { %s2438_s27 = sadd.s32 1, %s2344_s18   ;;  %s32_s28 = sadd.s32 1, %s2340_s17 }
  0x11   : > { %s3524_s23 = scalar_select %p2425_p8, 1, 0 }
  0x12   : > { %p2064_p9 = pneg %p2425_p8  ;;  %s29_s29 = ssub.s32 %s2344_s18, %s2438_s27 }
  0x13   : > { %s2203_s30 = scalar_lea.vmem %s163_s25, 1024  ;;  %p2211_p3 = scmp.lt.s32.totalorder %s163_s25, %s163_s25 }
  0x14   : > { %p2433_p10 = pnand %p2064_p9, %p3518_p1  ;;  %p2204_p12 = scmp.ne.s32.totalorder %s163_s25, %s2203_s30 }
  0x15   : > { %p2212_p5 = scmp.lt.s32.totalorder %s2203_s30, %s2203_s30 }
  0x16   : > { %p2194_p11 = pneg %p2433_p10 }
  0x17   : > { %p2213_p7 = por %p2212_p5, %p2211_p3 }
  0x18   : > { %p2206_p13 = pnand %p2204_p12, %p2194_p11 }
  0x1a   : > { %p2207_p0 = pneg %p2206_p13 }
  0x1c   : > { %p2214_p2 = pnand %p2213_p7, %p2207_p0 }
  0x1e   : > { %2217 = shalt.err (!%p2214_p2)
}
  0x1f   : > { %s2347_s5 = smov 64   ;;  %s2348_s6 = smov 4  }
  0x20   : > { %2067 = dma.hbm_to_vmem [thread:$0]  (!%p2433_p10), %s3514_s1, 1024, %s163_s25, [#allocation6], %s2347_s5, %s2347_s5, %s2348_s6  }
  0x21   : > { %p30_p2 = scmp.eq.s32.totalorder %s29_s29, 0  ;;  %p39_p9 = scmp.ne.s32.totalorder %s2340_s17, %s2336_s16 }
  0x22   : > { %p40_p11 = scmp.eq.s32.totalorder %s2344_s18, 0  ;;  %p2080_p12 = scmp.lt.s32.totalorder %s2344_s18, 4 }
  0x23   : > { %s2458_s9 = scalar_select %p30_p2, %s2340_s17, %s32_s28  }
  0x24   : > { %p41_p13 = por %p40_p11, %p39_p9  ;;  %p3526_p0 = scmp.eq.s32.totalorder %s2406_s19, 3 }
  0x25   : > { %s179_s11 = sand.u32 1, %s2340_s17   ;;  %s1942_s12 = smul.u32 768, %s2344_s18 }
  0x26   : > { %p2462_p3 = por %p3526_p0, %p39_p9  ;;  %s2003_s13 = smul.u32 48, %s179_s11 }
  0x27   : > { %p2468_p5 = pnand %p2080_p12, %p41_p13  ;;  %s2475_s25 = scalar_lea.hbm %s3513_s0, %s1942_s12 }
  0x28   : > { %s3527_s10 = scalar_select %p2462_p3, 1, 0 }
  0x29   : > { %s183_s26 = scalar_lea.vmem [#allocation2], %s2003_s13  ;;  %s2479_s29 = scalar_lea.sflag [#allocation3], %s179_s11 }
  0x2a   : > { %s190_s28 = sshll.u32 %s183_s26, 4  ;;  %s2218_s30 = scalar_lea.hbm %s2475_s25, 768  ;;  %s2477_s28 = int_to_ptr.vmem [resolvable:$true] %s190_s28 }
  0x2b   : > { %p2219_p10 = scmp.ne.s32.totalorder %s2475_s25, %s2218_s30  ;;  %p2220_p7 = pneg %p2468_p5 }
  0x2c   : > { %s2223_s12 = scalar_lea.hbm %s3513_s0, 3072  ;;  %p2224_p11 = scmp.lt.s32.totalorder %s2475_s25, %s3513_s0 }
  0x2d   : > { %p2221_p2 = pnand %p2220_p7, %p2219_p10  ;;  %p2225_p12 = scmp.lt.s32.totalorder %s2223_s12, %s2218_s30 }
  0x2f   : > { %p2222_p9 = pneg %p2221_p2  ;;  %p2226_p13 = por %p2225_p12, %p2224_p11 }
  0x31   : > { %p2227_p0 = pnand %p2226_p13, %p2222_p9 }
  0x33   : > { %2230 = shalt.err (!%p2227_p0)
}
  0x34   : > { %s2231_s11 = scalar_lea.vmem %s2477_s28, 768  ;;  %s2349_s13 = smov [#allocation2]  }
  0x35   : > { %p2232_p1 = scmp.ne.s32.totalorder %s2477_s28, %s2231_s11  ;;  %s2236_s26 = sshll.u32 %s2349_s13, 4  ;;  %s2237_s26 = int_to_ptr.vmem [resolvable:$false] %s2236_s26 }
  0x36   : > { %s2238_s7 = scalar_lea.vmem %s2237_s26, 1536  ;;  %p2239_p2 = scmp.lt.s32.totalorder %s2477_s28, %s2237_s26 }
  0x37   : > { %p2234_p6 = pnand %p2232_p1, %p2220_p7  ;;  %p2240_p3 = scmp.lt.s32.totalorder %s2238_s7, %s2231_s11 }
  0x39   : > { %p2235_p10 = pneg %p2234_p6  ;;  %p2241_p4 = por %p2240_p3, %p2239_p2 }
  0x3b   : > { %p2242_p8 = pnand %p2241_p4, %p2235_p10 }
  0x3d   : > { %2245 = shalt.err (!%p2242_p8)
}
  0x3e   : > { %2071 = dma.hbm_to_vmem [thread:$0]  (!%p2468_p5), %s2475_s25, 768, %s2477_s28, %s2479_s29, %s2347_s5, %s2347_s5, %s2348_s6  }
  0x3f   : > { %p3529_p1 = scmp.ne.s32.totalorder %s3524_s23, 0 }
  0x40   : > { %s2506_s30 = sand.u32 (!%p3529_p1), 1, %s2336_s16   ;;  %p3530_p4 = scmp.ne.s32.totalorder (!%p3529_p1), %s3522_s21, 0 }
  0x41   : > { %202 = sbr.rel (%p3529_p1) target bundleno = 662 (0x296), region = 32  ;;  %s205_s12 = scalar_lea.sflag (!%p3529_p1), [#allocation3], %s2506_s30 }
  0x42   : > { %s2004_s8 = smul.u32 (!%p3529_p1), 48, %s2506_s30 }
  0x44   : > { %s2510_s20 = scalar_lea.vmem (!%p3529_p1), [#allocation2], %s2004_s8 }
  0x46   : > { %2315 = dma.done.wait (%p3530_p4), %s205_s12, 768  }
  0x47   : > { %2317 = vsyncadd (%p3530_p4), %s205_s12, 4294966528  ;;  %p3531_p6 = scmp.eq.s32.totalorder %s2406_s19, 0 }
  0x49   : > { %2319 = dma.done.wait (%p3531_p6), [#allocation6], 1024   ;;  %p3532_p8 = pmov %p3531_p6 }
  0x4a   : > { %v2126_v0 = vld [vmem:[#allocation5 + $0x38] sm:$0xff]   ;;  %v2127_v1 = vld [vmem:[#allocation5 + $0x30] sm:$0xff]   ;;  %v2128_v2 = vld [vmem:[#allocation5 + $0x28] sm:$0xff]   ;;  %s2005_s21 = smul.u32 96, %s2506_s30  ;;  %v2350_v49 = vmov 683565275  }
  0x4b   : > { %2321 = vsyncadd (%p3532_p8), [#allocation6], 4294966272  ;;  %1959 = vmatprep.subr.bf16.mxu0 %v2126_v0  ;;  %1987 = vmatprep.subr.bf16.mxu1 %v2126_v0  ;;  %v2129_v3 = vld [vmem:[#allocation5 + $0x20] sm:$0xff]   ;;  %v2130_v6 = vld [vmem:[#allocation5 + $0x18] sm:$0xff]   ;;  %v2351_v51 = vmov 2475754826  }
  0x4c   : > { %1960 = vmatpush3.bf16.msra.mxu0 %v2126_v0  ;;  %1995 = vmatpush3.bf16.msra.mxu1 %v2126_v0  ;;  %v2134_v4 = vld [vmem:[%s2510_s20] sm:$0xff]   ;;  %v2135_v5 = vld [vmem:[%s2510_s20 + $0x10] sm:$0xff]   ;;  %v2132_v8 = vld [vmem:[#allocation5 + $0x8] sm:$0xff]   ;;  %s2540_s6 = scalar_lea.vmem [#allocation8], %s2005_s21  ;;  %v2352_v53 = vmov 2131351028  }
  0x4d   : > { %1961 = vmatprep.subr.bf16.mxu0 %v2127_v1  ;;  %1988 = vmatprep.subr.bf16.mxu1 %v2127_v1  ;;  %v2131_v7 = vld [vmem:[#allocation5 + $0x10] sm:$0xff]   ;;  %v2133_v9 = vld [vmem:[#allocation5] sm:$0xff]   ;;  %v2136_v10 = vld [vmem:[%s2510_s20 + $0x8] sm:$0xff]   ;;  %v2353_v55 = vmov 2102212464   ;;  %s2858_s14 = scalar_lea.vmem [#allocation7], %s2005_s21 }
  0x4e   : > { %1975 = vmatprep.mubr.bf16.mxu0 %v2134_v4  ;;  %1979 = vmatprep.mubr.bf16.mxu1 %v2135_v5  ;;  %v2137_v11 = vld [vmem:[%s2510_s20 + $0x18] sm:$0xff]   ;;  %v2138_v12 = vld [vmem:[%s2510_s20 + $0x20] sm:$0xff]   ;;  %v2139_v13 = vld [vmem:[%s2510_s20 + $0x28] sm:$0xff]   ;;  %v2354_v57 = vmov 920167782   ;;  %s1943_s29 = smul.u32 1536, %s2406_s19 }
  0x4f   : > { %v2530_v14 = vld [vmem:[%s3515_s2] ss:$0 sm:$0xff]  ;;  %s1753_s24 = sshll.u32 %s2540_s6, 4  ;;  %s1724_s7 = scalar_lea.sflag [#allocation9], %s2506_s30  ;;  %s3287_s24 = int_to_ptr.vmem [resolvable:$true] %s1753_s24 }
  0x50   : > { %1962 = vmatpush3.bf16.msra.mxu0 %v2127_v1  ;;  %1996 = vmatpush3.bf16.msra.mxu1 %v2127_v1  ;;  %v2355_v1 = vmov 1326507024   ;;  %s3285_s26 = scalar_lea.hbm %s3517_s4, %s1943_s29  ;;  %s2246_s8 = scalar_lea.vmem %s3287_s24, 1536 }
  0x51   : > { %1963 = vmatprep.subr.bf16.mxu0 %v2128_v2  ;;  %1989 = vmatprep.subr.bf16.mxu1 %v2128_v2  ;;  %p2247_p3 = scmp.ne.s32.totalorder %s3287_s24, %s2246_s8  ;;  %p3549_p5 = scmp.ne.s32.totalorder %s3527_s10, 0 }
  0x52   : > { %s2356_s12 = smov [#allocation8]  }
  0x53   : > { %p2248_p7 = pnand %p2247_p3, %p3549_p5  ;;  %s2250_s20 = sshll.u32 %s2356_s12, 4  ;;  %s2251_s20 = int_to_ptr.vmem [resolvable:$false] %s2250_s20 }
  0x54   : > { %1964 = vmatpush3.bf16.msra.mxu0 %v2128_v2  ;;  %1997 = vmatpush3.bf16.msra.mxu1 %v2128_v2  ;;  %s2252_s21 = scalar_lea.vmem %s2251_s20, 3072  ;;  %p2253_p11 = scmp.lt.s32.totalorder %s3287_s24, %s2251_s20 }
  0x55   : > { %1965 = vmatprep.subr.bf16.mxu0 %v2129_v3  ;;  %1990 = vmatprep.subr.bf16.mxu1 %v2129_v3  ;;  %p2249_p9 = pneg %p2248_p7  ;;  %p2254_p12 = scmp.lt.s32.totalorder %s2252_s21, %s2246_s8 }
  0x57   : > { %p2255_p13 = por %p2254_p12, %p2253_p11 }
  0x58   : > { %1966 = vmatpush3.bf16.msra.mxu0 %v2129_v3  ;;  %1998 = vmatpush3.bf16.msra.mxu1 %v2129_v3 }
  0x59   : > { %1967 = vmatprep.subr.bf16.mxu0 %v2130_v6  ;;  %1991 = vmatprep.subr.bf16.mxu1 %v2130_v6  ;;  %p2256_p0 = pnand %p2255_p13, %p2249_p9 }
  0x5c   : > { %1968 = vmatpush3.bf16.msra.mxu0 %v2130_v6  ;;  %1999 = vmatpush3.bf16.msra.mxu1 %v2130_v6 }
  0x5d   : > { %1969 = vmatprep.subr.bf16.mxu0 %v2131_v7  ;;  %1992 = vmatprep.subr.bf16.mxu1 %v2131_v7 }
  0x60   : > { %1970 = vmatpush3.bf16.msra.mxu0 %v2131_v7  ;;  %2000 = vmatpush3.bf16.msra.mxu1 %v2131_v7 }
  0x61   : > { %1971 = vmatprep.subr.bf16.mxu0 %v2132_v8  ;;  %1993 = vmatprep.subr.bf16.mxu1 %v2132_v8 }
  0x64   : > { %1972 = vmatpush3.bf16.msra.mxu0 %v2132_v8  ;;  %2001 = vmatpush3.bf16.msra.mxu1 %v2132_v8 }
  0x65   : > { %1973 = vmatprep.subr.bf16.mxu0 %v2133_v9  ;;  %1994 = vmatprep.subr.bf16.mxu1 %v2133_v9 }
  0x68   : > { %1974 = vmatpush3.bf16.msra.mxu0 %v2133_v9  ;;  %2002 = vmatpush3.bf16.msra.mxu1 %v2133_v9 }
  0x6b   : > { %1976 = vmatmul.mubr.bf16.vlgmr.msra.gmra.mxu0 %v2136_v10  ;;  %1980 = vmatmul.mubr.bf16.vlgmr.msra.gmra.mxu1 %v2137_v11 }
  0x6c   : > { %1983 = vmatprep.mubr.bf16.mxu1 %v2138_v12 }
  0x73   : > { %1984 = vmatmul.mubr.bf16.gmra.mxu1 %v2139_v13 }
 0x12b   : > { %v1977_v15 = vpop.f32.mrf.mxu0  ;;  %v1981_v16 = vpop.f32.mrf.mxu1 }
 0x12c   : > { %v2533_v17 = vadd.f32 %v1977_v15, %v2530_v14  ;;  %v2536_v18 = vadd.f32 %v1981_v16, %v2530_v14 }
 0x12d   : > { %v399_v19 = vpop.f32.mrf.mxu0  ;;  %v415_v22 = vpop.f32.mrf.mxu1 }
 0x12e   : > { %448 = vst [vmem:[%s2540_s6 + $0x10] sm:$0xff] %v2533_v17  ;;  %v666_v20 = vand.u32 2147483647, %v2533_v17  ;;  %v669_v21 = vand.u32 2139095040, %v2533_v17  ;;  %452 = vst [vmem:[%s2540_s6 + $0x30] sm:$0xff] %v2536_v18  ;;  %v1085_v24 = vand.u32 2139095040, %v2536_v18  ;;  %v2551_v26 = vadd.f32 %v2530_v14, %v399_v19 }
 0x12f   : > { %v1082_v23 = vand.u32 2147483647, %v2536_v18  ;;  %v2558_v30 = vadd.f32 %v2530_v14, %v415_v22  ;;  %vm668_vm13 = vcmp.lt.s32.totalorder %v2533_v17, 0 }
 0x130   : > { %v670_v25 = vshrl.u32 %v669_v21, 23  ;;  %v673_v27 = vand.u32 8388607, %v666_v20  ;;  %v1086_v28 = vshrl.u32 %v1085_v24, 23  ;;  %446 = vst [vmem:[%s2540_s6] sm:$0xff] %v2551_v26  ;;  %v461_v33 = vand.u32 2139095040, %v2551_v26 }
 0x131   : > { %v1089_v29 = vand.u32 8388607, %v1082_v23  ;;  %450 = vst [vmem:[%s2540_s6 + $0x20] sm:$0xff] %v2558_v30  ;;  %v458_v43 = vand.u32 2147483647, %v2551_v26 }
 0x132   : > { %v1898_v31 = vadd.s32 4294967169, %v670_v25  ;;  %v1914_v32 = vadd.s32 4294967169, %v1086_v28  ;;  %v674_v35 = vor.u32 8388608, %v673_v27  ;;  %v462_v38 = vshrl.u32 %v461_v33, 23 }
 0x133   : > { %v1090_v36 = vor.u32 8388608, %v1089_v29  ;;  %vm2686_vm14 = vcmp.le.f32.partialorder %v666_v20, 0.7853982 }
 0x134   : > { %v676_v34 = vadd.s32 1, %v1898_v31  ;;  %v1092_v37 = vadd.s32 1, %v1914_v32  ;;  %v2566_v44 = vshll.u32 %v674_v35, 8  ;;  %v1890_v47 = vadd.s32 4294967169, %v462_v38 }
 0x135   : > { %v2570_v46 = vshll.u32 %v1090_v36, 8 }
 0x136   : > { %vm677_vm0 = vcmp.gt.s32.totalorder %v676_v34, 0  ;;  %vm1093_vm1 = vcmp.gt.s32.totalorder %v1092_v37, 0  ;;  %v468_v9 = vadd.s32 1, %v1890_v47 }
 0x137   : > { %v678_v39 = vsel %vm677_vm0, %v676_v34, 0  ;;  %v1094_v42 = vsel %vm1093_vm1, %v1092_v37, 0 }
 0x138   : > { %v679_v40 = vshrl.u32 %v678_v39, 5  ;;  %v680_v41 = vand.u32 31, %v678_v39  ;;  %v2568_v45 = vand.u32 31, %v1094_v42  ;;  %v2577_v59 = vshrl.u32 %v1094_v42, 5 }
 0x139   : > { %vm469_vm11 = vcmp.gt.s32.totalorder %v468_v9, 0 }
 0x13a   : > { %v681_v48 = vsub.s32 32, %v680_v41  ;;  %v683_v50 = vshll.u32 %v2350_v49, %v680_v41  ;;  %v686_v52 = vshll.u32 %v2351_v51, %v680_v41  ;;  %v689_v54 = vshll.u32 %v2352_v53, %v680_v41 }
 0x13b   : > { %v692_v56 = vshll.u32 %v2353_v55, %v680_v41  ;;  %v695_v58 = vshll.u32 %v2354_v57, %v680_v41  ;;  %vm698_vm2 = vcmp.lt.s32.totalorder %v679_v40, 1  ;;  %vm700_vm3 = vcmp.lt.s32.totalorder %v679_v40, 3 }
 0x13c   : > { %v682_v60 = vshrl.u32 %v2350_v49, %v681_v48  ;;  %v684_v61 = vshrl.u32 %v2351_v51, %v681_v48  ;;  %v687_v62 = vshrl.u32 %v2352_v53, %v681_v48  ;;  %v690_v63 = vshrl.u32 %v2353_v55, %v681_v48 }
 0x13d   : > { %v693_v0 = vshrl.u32 %v2354_v57, %v681_v48  ;;  %v696_v2 = vshrl.u32 %v2355_v1, %v681_v48  ;;  %vm701_vm4 = vcmp.lt.s32.totalorder %v679_v40, 4  ;;  %v1097_v6 = vsub.s32 32, %v2568_v45 }
 0x13e   : > { %v685_v3 = vor.u32 %v684_v61, %v683_v50  ;;  %v688_v4 = vor.u32 %v687_v62, %v686_v52  ;;  %v691_v5 = vor.u32 %v690_v63, %v689_v54  ;;  %vm699_vm5 = vcmp.lt.s32.totalorder %v679_v40, 2 }
 0x13f   : > { %v694_v7 = vor.u32 %v693_v0, %v692_v56  ;;  %v697_v8 = vor.u32 %v696_v2, %v695_v58  ;;  %v1099_v21 = vshll.u32 %v2350_v49, %v2568_v45  ;;  %v1100_v25 = vshrl.u32 %v2351_v51, %v1097_v6 }
 0x140   : > { %v702_v10 = vsel %vm698_vm2, %v682_v60, %v685_v3  ;;  %v703_v11 = vsel %vm701_vm4, %v691_v5, 2102212464  ;;  %v706_v12 = vsel %vm698_vm2, %v685_v3, %v688_v4  ;;  %v710_v13 = vsel %vm698_vm2, %v688_v4, %v691_v5 }
 0x141   : > { %v704_v15 = vsel %vm700_vm3, %v688_v4, %v703_v11  ;;  %v707_v16 = vsel %vm701_vm4, %v694_v7, 920167782  ;;  %v711_v19 = vsel %vm701_vm4, %v697_v8, 1326507024  ;;  %v1102_v27 = vshll.u32 %v2351_v51, %v2568_v45 }
 0x142   : > { %v708_v22 = vsel %vm700_vm3, %v691_v5, %v707_v16  ;;  %v712_v24 = vsel %vm700_vm3, %v694_v7, %v711_v19  ;;  %v705_v28 = vsel %vm699_vm5, %v702_v10, %v704_v15  ;;  %v1103_v32 = vshrl.u32 %v2352_v53, %v1097_v6  ;;  %v1982_v15 = vpop.f32.mrf.mxu1 }
 0x143   : > { %v709_v29 = vsel %vm699_vm5, %v706_v12, %v708_v22  ;;  %v713_v31 = vsel %vm699_vm5, %v710_v13, %v712_v24  ;;  %v1101_v37 = vor.u32 %v1100_v25, %v1099_v21  ;;  %v1105_v39 = vshll.u32 %v2352_v53, %v2568_v45  ;;  %v1978_v13 = vpop.f32.mrf.mxu0 }
 0x144   : > { %v2602_v33 = vmul.u32.u64.low %v2566_v44, %v713_v31  ;;  %v2603_v34 = vmul.u32.u64.high %v2566_v44, %v713_v31, %v2602_v33  ;;  %v2606_v35 = vmul.u32.u64.low %v2566_v44, %v709_v29  ;;  %v2607_v36 = vmul.u32.u64.high %v2566_v44, %v709_v29, %v2606_v35 }
 0x145   : > { %v1104_v38 = vor.u32 %v1103_v32, %v1102_v27  ;;  %v1106_v41 = vshrl.u32 %v2353_v55, %v1097_v6  ;;  %v1098_v40 = vshrl.u32 %v2350_v49, %v1097_v6  ;;  %v1108_v42 = vshll.u32 %v2353_v55, %v2568_v45 }
 0x146   : > { %v1109_v47 = vshrl.u32 %v2354_v57, %v1097_v6  ;;  %v1112_v48 = vshrl.u32 %v2355_v1, %v1097_v6  ;;  %v721_v50 = vmul.u32 %v2566_v44, %v705_v28  ;;  %v1111_v54 = vshll.u32 %v2354_v57, %v2568_v45 }
 0x147   : > { %v1107_v52 = vor.u32 %v1106_v41, %v1105_v39  ;;  %vm1114_vm6 = vcmp.lt.s32.totalorder %v2577_v59, 1  ;;  %vm723_vm7 = vc.u32 %v2603_v34, %v2606_v35  ;;  %v724_v56 = vadd.s32 1, %v2607_v36 }
 0x148   : > { %v1110_v58 = vor.u32 %v1109_v47, %v1108_v42  ;;  %vm1115_vm8 = vcmp.lt.s32.totalorder %v2577_v59, 2  ;;  %v1113_v60 = vor.u32 %v1112_v48, %v1111_v54  ;;  %vm1116_vm9 = vcmp.lt.s32.totalorder %v2577_v59, 3 }
 0x149   : > { %vm1117_vm10 = vcmp.lt.s32.totalorder %v2577_v59, 4  ;;  %v1122_v44 = vsel %vm1114_vm6, %v1101_v37, %v1104_v38  ;;  %v725_v61 = vsel %vm723_vm7, %v724_v56, %v2607_v36  ;;  %v1126_v63 = vsel %vm1114_vm6, %v1104_v38, %v1107_v52 }
 0x14a   : > { %v1119_v62 = vsel %vm1117_vm10, %v1107_v52, 2102212464  ;;  %v1123_v45 = vsel %vm1117_vm10, %v1110_v58, 920167782  ;;  %v726_v0 = vadd.s32 %v725_v61, %v721_v50  ;;  %v1118_v2 = vsel %vm1114_vm6, %v1098_v40, %v1101_v37 }
 0x14b   : > { %v1124_v3 = vsel %vm1116_vm9, %v1107_v52, %v1123_v45  ;;  %v1127_v4 = vsel %vm1117_vm10, %v1113_v60, 1326507024  ;;  %v1120_v5 = vsel %vm1116_vm9, %v1104_v38, %v1119_v62  ;;  %v470_v21 = vsel %vm469_vm11, %v468_v9, 0 }
 0x14c   : > { %v1125_v6 = vsel %vm1115_vm8, %v1122_v44, %v1124_v3  ;;  %v1128_v7 = vsel %vm1116_vm9, %v1110_v58, %v1127_v4  ;;  %v727_v8 = vadd.s32 536870912, %v726_v0  ;;  %v1121_v24 = vsel %vm1115_vm8, %v1118_v2, %v1120_v5 }
 0x14d   : > { %v1129_v10 = vsel %vm1115_vm8, %v1126_v63, %v1128_v7  ;;  %v2634_v11 = vmul.u32.u64.low %v2570_v46, %v1125_v6  ;;  %v2635_v12 = vmul.u32.u64.high %v2570_v46, %v1125_v6, %v2634_v11  ;;  %v472_v25 = vand.u32 31, %v470_v21 }
 0x14e   : > { %v2639_v16 = vmul.u32.u64.low %v2570_v46, %v1129_v10  ;;  %v2640_v19 = vmul.u32.u64.high %v2570_v46, %v1129_v10, %v2639_v16  ;;  %v728_v22 = vshrl.u32 %v727_v8, 30  ;;  %v465_v27 = vand.u32 8388607, %v458_v43 }
 0x14f   : > { %v2647_v28 = vadd.f32 %v1978_v13, %v2530_v14  ;;  %v2650_v29 = vadd.f32 %v1982_v15, %v2530_v14  ;;  %v1140_v32 = vadd.s32 1, %v2635_v12  ;;  %v1137_v33 = vmul.u32 %v2570_v46, %v1121_v24 }
 0x150   : > { %v729_v31 = vshll.u32 %v728_v22, 30  ;;  %vm1139_vm12 = vc.u32 %v2640_v19, %v2634_v11  ;;  %v473_v59 = vsub.s32 32, %v472_v25  ;;  %v466_v38 = vor.u32 8388608, %v465_v27 }
 0x151   : > { %449 = vst [vmem:[%s2540_s6 + $0x18] sm:$0xff] %v2647_v28  ;;  %453 = vst [vmem:[%s2540_s6 + $0x38] sm:$0xff] %v2650_v29  ;;  %v1141_v36 = vsel %vm1139_vm12, %v1140_v32, %v2635_v12  ;;  %v877_v39 = vand.u32 2139095040, %v2558_v30  ;;  %v2666_v41 = vshrl.u32 %v470_v21, 5  ;;  %v475_v40 = vshll.u32 %v2350_v49, %v472_v25 }
 0x152   : > { %v2660_v9 = vsub.s32 %v726_v0, %v729_v31  ;;  %v1142_v37 = vadd.s32 %v1141_v36, %v1137_v33  ;;  %v478_v42 = vshll.u32 %v2351_v51, %v472_v25  ;;  %v476_v48 = vshrl.u32 %v2351_v51, %v473_v59 }
 0x153   : > { %v479_v50 = vshrl.u32 %v2352_v53, %v473_v59  ;;  %v481_v52 = vshll.u32 %v2352_v53, %v472_v25  ;;  %v482_v56 = vshrl.u32 %v2353_v55, %v473_v59  ;;  %v484_v58 = vshll.u32 %v2353_v55, %v472_v25 }
 0x154   : > { %v732_v46 = vsub.s32 0, %v2660_v9  ;;  %v1143_v47 = vadd.s32 536870912, %v1142_v37  ;;  %v485_v60 = vshrl.u32 %v2354_v57, %v473_v59  ;;  %v752_v44 = vsub.s32 4, %v728_v22 }
 0x155   : > { %v874_v62 = vand.u32 2147483647, %v2558_v30  ;;  %v878_v45 = vshrl.u32 %v877_v39, 23  ;;  %v487_v0 = vshll.u32 %v2354_v57, %v472_v25  ;;  %v488_v2 = vshrl.u32 %v2355_v1, %v473_v59 }
 0x156   : > { %v1899_v54 = vmin.u32 %v732_v46, %v2660_v9  ;;  %v2677_v61 = vshrl.u32 %v1143_v47, 30  ;;  %v2682_v3 = vshll.u32 %v466_v38, 8  ;;  %v722_v5 = vadd.s32 %v2606_v35, %v2603_v34 }
 0x157   : > { %v477_v7 = vor.u32 %v476_v48, %v475_v40  ;;  %v480_v8 = vor.u32 %v479_v50, %v478_v42  ;;  %v483_v12 = vor.u32 %v482_v56, %v481_v52  ;;  %v486_v13 = vor.u32 %v485_v60, %v484_v58 }
 0x158   : > { %v734_v63 = vclz %v1899_v54  ;;  %v1145_v6 = vshll.u32 %v2677_v61, 30  ;;  %vm490_vm15 = vcmp.lt.s32.totalorder %v2666_v41, 1  ;;  %v753_v15 = vsel %vm668_vm13, %v752_v44, %v728_v22 }
 0x159   : > { %vm493_vm0 = vcmp.lt.s32.totalorder %v2666_v41, 4  ;;  %v1906_v20 = vadd.s32 4294967169, %v878_v45  ;;  %v474_v34 = vshrl.u32 %v2350_v49, %v473_v59  ;;  %v489_v35 = vor.u32 %v488_v2, %v487_v0 }
 0x15a   : > { %v1900_v10 = vadd.s32 4294967294, %v734_v63  ;;  %v2696_v16 = vsub.s32 %v1142_v37, %v1145_v6  ;;  %vm492_vm2 = vcmp.lt.s32.totalorder %v2666_v41, 3  ;;  %vm491_vm3 = vcmp.lt.s32.totalorder %v2666_v41, 2 }
 0x15b   : > { %v498_v25 = vsel %vm490_vm15, %v477_v7, %v480_v8  ;;  %v495_v31 = vsel %vm493_vm0, %v483_v12, 2102212464  ;;  %v499_v32 = vsel %vm493_vm0, %v486_v13, 920167782  ;;  %v502_v37 = vsel %vm490_vm15, %v480_v8, %v483_v12 }
 0x15c   : > { %vm1901_vm1 = vcmp.lt.s32.totalorder %v1900_v10, 0  ;;  %v1148_v24 = vsub.s32 0, %v2696_v16  ;;  %v500_v36 = vsel %vm492_vm2, %v483_v12, %v499_v32  ;;  %v503_v40 = vsel %vm493_vm0, %v489_v35, 1326507024 }
 0x15d   : > { %v737_v21 = vsel %vm1901_vm1, 0, %v1900_v10  ;;  %v501_v46 = vsel %vm491_vm3, %v498_v25, %v500_v36  ;;  %vm1084_vm4 = vcmp.lt.s32.totalorder %v2536_v18, 0  ;;  %v496_v47 = vsel %vm492_vm2, %v480_v8, %v495_v31 }
 0x15e   : > { %v738_v22 = vsub.s32 32, %v737_v21  ;;  %v742_v27 = vsub.s32 4294967266, %v737_v21  ;;  %v739_v33 = vshll.u32 %v2660_v9, %v737_v21  ;;  %v1915_v59 = vmin.u32 %v1148_v24, %v2696_v16 }
 0x15f   : > { %v494_v9 = vsel %vm490_vm15, %v474_v34, %v477_v7  ;;  %v2726_v48 = vand.u32 8388607, %v874_v62  ;;  %v755_v54 = vsel %vm2686_vm14, 0, %v753_v15  ;;  %v504_v56 = vsel %vm492_vm2, %v486_v13, %v503_v40 }
 0x160   : > { %v740_v38 = vshrl.u32 %v722_v5, %v738_v22  ;;  %v743_v39 = vadd.s32 127, %v742_v27  ;;  %v1150_v42 = vclz %v1915_v59  ;;  %v505_v60 = vsel %vm491_vm3, %v502_v37, %v504_v56 }
 0x161   : > { %v2735_v44 = vmul.u32.u64.low %v2682_v3, %v501_v46  ;;  %v2736_v45 = vmul.u32.u64.high %v2682_v3, %v501_v46, %v2735_v44  ;;  %v497_v0 = vsel %vm491_vm3, %v494_v9, %v496_v47  ;;  %v759_v6 = vadd.s32 3, %v755_v54 }
 0x162   : > { %v741_v50 = vor.u32 %v740_v38, %v739_v33  ;;  %v744_v52 = vshll.u32 %v743_v39, 23  ;;  %v1916_v58 = vadd.s32 4294967294, %v1150_v42  ;;  %v1138_v7 = vadd.s32 %v2634_v11, %v2640_v19 }
 0x163   : > { %v2742_v2 = vmul.u32.u64.low %v2682_v3, %v505_v60  ;;  %v2743_v5 = vmul.u32.u64.high %v2682_v3, %v505_v60, %v2742_v2  ;;  %v884_v8 = vadd.s32 1, %v1906_v20  ;;  %v1168_v15 = vsub.s32 4, %v2677_v61 }
 0x164   : > { %v745_v63 = vor.u32 4788187, %v744_v52  ;;  %vm1917_vm5 = vcmp.lt.s32.totalorder %v1916_v58, 0  ;;  %v748_v12 = vcvt.s32.f32 %v741_v50  ;;  %v513_v41 = vmul.u32 %v2682_v3, %v497_v0 }
 0x165   : > { %v1153_v13 = vsel %vm1917_vm5, 0, %v1916_v58  ;;  %v516_v21 = vadd.s32 1, %v2736_v45  ;;  %vm515_vm6 = vc.u32 %v2743_v5, %v2735_v44  ;;  %vm885_vm7 = vcmp.gt.s32.totalorder %v884_v8, 0 }
 0x166   : > { %v746_v10 = vand.u32 2147483647, %v745_v63  ;;  %v1154_v34 = vsub.s32 32, %v1153_v13  ;;  %v1158_v35 = vsub.s32 4294967266, %v1153_v13  ;;  %v1155_v25 = vshll.u32 %v2696_v16, %v1153_v13 }
 0x167   : > { %v517_v20 = vsel %vm515_vm6, %v516_v21, %v2736_v45  ;;  %v886_v22 = vsel %vm885_vm7, %v884_v8, 0  ;;  %v1169_v31 = vsel %vm1084_vm4, %v1168_v15, %v2677_v61  ;;  %vm2761_vm8 = vcmp.le.f32.partialorder %v1082_v23, 0.7853982 }
 0x168   : > { %v749_v24 = vmul.f32 %v748_v12, %v746_v10  ;;  %v1156_v11 = vshrl.u32 %v1138_v7, %v1154_v34  ;;  %v1159_v19 = vadd.s32 127, %v1158_v35  ;;  %v518_v3 = vadd.s32 %v517_v20, %v513_v41 }
 0x169   : > { %v888_v32 = vand.u32 31, %v886_v22  ;;  %v2768_v61 = vand.u32 3, %v759_v6  ;;  %v1171_v40 = vsel %vm2761_vm8, 0, %v1169_v31  ;;  %v882_v23 = vor.u32 8388608, %v2726_v48 }
 0x16a   : > { %v750_v27 = vxor.u32 2147483648, %v749_v24  ;;  %v1157_v33 = vor.u32 %v1156_v11, %v1155_v25  ;;  %v1160_v59 = vshll.u32 %v1159_v19, 23  ;;  %v519_v37 = vadd.s32 536870912, %v518_v3 }
 0x16b   : > { %v889_v38 = vsub.s32 32, %v888_v32  ;;  %v2778_v54 = vshrl.u32 %v886_v22, 5  ;;  %v891_v56 = vshll.u32 %v2350_v49, %v888_v32  ;;  %v894_v45 = vshll.u32 %v2351_v51, %v888_v32 }
 0x16c   : > { %v751_v16 = vsel %vm668_vm13, %v750_v27, %v749_v24  ;;  %v1161_v46 = vor.u32 4788187, %v1160_v59  ;;  %v2772_v42 = vshrl.u32 %v519_v37, 30  ;;  %v1164_v50 = vcvt.s32.f32 %v1157_v33 }
 0x16d   : > { %v754_v39 = vsel %vm2686_vm14, %v2533_v17, %v751_v16  ;;  %v892_v9 = vshrl.u32 %v2351_v51, %v889_v38  ;;  %v895_v52 = vshrl.u32 %v2352_v53, %v889_v38  ;;  %v898_v58 = vshrl.u32 %v2353_v55, %v889_v38 }
 0x16e   : > { %2140 = vcosq.f32 %v754_v39  ;;  %v1162_v47 = vand.u32 2147483647, %v1161_v46  ;;  %v521_v4 = vshll.u32 %v2772_v42, 30  ;;  %v900_v48 = vshll.u32 %v2353_v55, %v888_v32 }
 0x16f   : > { %2142 = vsinq.f32 %v754_v39  ;;  %v901_v63 = vshrl.u32 %v2354_v57, %v889_v38  ;;  %v1175_v0 = vadd.s32 3, %v1171_v40  ;;  %v893_v6 = vor.u32 %v892_v9, %v891_v56 }
 0x170   : > { %v1165_v60 = vmul.f32 %v1164_v50, %v1162_v47  ;;  %v2785_v2 = vsub.s32 %v518_v3, %v521_v4  ;;  %v897_v7 = vshll.u32 %v2352_v53, %v888_v32  ;;  %v896_v10 = vor.u32 %v895_v52, %v894_v45 }
 0x171   : > { %v902_v12 = vor.u32 %v901_v63, %v900_v48  ;;  %v904_v13 = vshrl.u32 %v2355_v1, %v889_v38  ;;  %v903_v35 = vshll.u32 %v2354_v57, %v888_v32  ;;  %v773_v41 = vand.u32 2139095040, %v2647_v28 }
 0x172   : > { %v1166_v8 = vxor.u32 2147483648, %v1165_v60  ;;  %v524_v15 = vsub.s32 0, %v2785_v2  ;;  %v899_v34 = vor.u32 %v898_v58, %v897_v7  ;;  %vm765_vm9 = vcmp.eq.s32.totalorder %v2768_v61, 2 }
 0x173   : > { %v514_v24 = vadd.s32 %v2735_v44, %v2743_v5  ;;  %vm906_vm10 = vcmp.lt.s32.totalorder %v2778_v54, 1  ;;  %v2798_v25 = vshll.u32 %v882_v23, 8  ;;  %vm762_vm11 = vcmp.eq.s32.totalorder %v2768_v61, 0 }
 0x174   : > { %v1167_v21 = vsel %vm1084_vm4, %v1166_v8, %v1165_v60  ;;  %v1891_v19 = vmin.u32 %v524_v15, %v2785_v2  ;;  %v905_v20 = vor.u32 %v904_v13, %v903_v35  ;;  %vm909_vm12 = vcmp.lt.s32.totalorder %v2778_v54, 4 }
 0x175   : > { %v1170_v11 = vsel %vm2761_vm8, %v2536_v18, %v1167_v21  ;;  %vm761_vm13 = vcmp.lt.s32.totalorder %v2768_v61, 2  ;;  %v890_v44 = vshrl.u32 %v2350_v49, %v889_v38  ;;  %v914_v5 = vsel %vm906_vm10, %v893_v6, %v896_v10 }
 0x176   : > { %2144 = vcosq.f32 %v1170_v11  ;;  %v915_v22 = vsel %vm909_vm12, %v902_v12, 920167782  ;;  %vm758_vm14 = vweird.f32 %v2533_v17  ;;  %vm460_vm15 = vcmp.lt.s32.totalorder %v2551_v26, 0 }
 0x177   : > { %2146 = vsinq.f32 %v1170_v11  ;;  %v526_v27 = vclz %v1891_v19  ;;  %vm908_vm0 = vcmp.lt.s32.totalorder %v2778_v54, 3  ;;  %v911_v31 = vsel %vm909_vm12, %v899_v34, 2102212464 }
 0x178   : > { %v544_v3 = vsub.s32 4, %v2772_v42  ;;  %vm907_vm1 = vcmp.lt.s32.totalorder %v2778_v54, 2  ;;  %v916_v32 = vsel %vm908_vm0, %v899_v34, %v915_v22  ;;  %v918_v33 = vsel %vm906_vm10, %v896_v10, %v899_v34 }
 0x179   : > { %v1892_v59 = vadd.s32 4294967294, %v526_v27  ;;  %v910_v16 = vsel %vm906_vm10, %v890_v44, %v893_v6  ;;  %v917_v36 = vsel %vm907_vm1, %v914_v5, %v916_v32  ;;  %v919_v37 = vsel %vm909_vm12, %v905_v20, 1326507024 }
 0x17a   : > { %v912_v39 = vsel %vm908_vm0, %v896_v10, %v911_v31  ;;  %v920_v46 = vsel %vm908_vm0, %v902_v12, %v919_v37  ;;  %v2828_v40 = vmul.u32.u64.low %v2798_v25, %v917_v36  ;;  %v2829_v23 = vmul.u32.u64.high %v2798_v25, %v917_v36, %v2828_v40 }
 0x17b   : > { %v2141_v38 = vpop.eup %2140  ;;  %vm1893_vm2 = vcmp.lt.s32.totalorder %v1892_v59, 0  ;;  %v921_v50 = vsel %vm907_vm1, %v918_v33, %v920_v46  ;;  %v774_v52 = vshrl.u32 %v773_v41, 23  ;;  %v913_v6 = vsel %vm907_vm1, %v910_v16, %v912_v39 }
 0x17c   : > { %v2143_v9 = vpop.eup %2142  ;;  %v766_v47 = vxor.u32 2147483648, %v2141_v38  ;;  %v529_v56 = vsel %vm1893_vm2, 0, %v1892_v59  ;;  %v2835_v58 = vmul.u32.u64.low %v2798_v25, %v921_v50  ;;  %v2836_v60 = vmul.u32.u64.high %v2798_v25, %v921_v50, %v2835_v58 }
 0x17d   : > { %v763_v4 = vxor.u32 2147483648, %v2143_v9  ;;  %v530_v48 = vsub.s32 32, %v529_v56  ;;  %v534_v63 = vsub.s32 4294967266, %v529_v56  ;;  %v1176_v8 = vand.u32 3, %v1175_v0 }
 0x17e   : > { %v767_v45 = vsel %vm765_vm9, %v766_v47, %v2143_v9  ;;  %v932_v10 = vadd.s32 1, %v2829_v23  ;;  %v1902_v12 = vadd.s32 4294967169, %v774_v52  ;;  %v531_v15 = vshll.u32 %v2785_v2, %v529_v56 }
 0x17f   : > { %v764_v7 = vsel %vm762_vm11, %v2141_v38, %v763_v4  ;;  %v532_v34 = vshrl.u32 %v514_v24, %v530_v48  ;;  %v535_v35 = vadd.s32 127, %v534_v63  ;;  %v545_v54 = vsel %vm460_vm15, %v544_v3, %v2772_v42 }
 0x180   : > { %v768_v13 = vsel %vm761_vm13, %v764_v7, %v767_v45  ;;  %v929_v21 = vmul.u32 %v2798_v25, %v913_v6  ;;  %vm931_vm3 = vc.u32 %v2836_v60, %v2828_v40  ;;  %v780_v17 = vadd.s32 1, %v1902_v12 }
 0x181   : > { %v769_v41 = vsel %vm758_vm14, nan, %v768_v13  ;;  %v533_v61 = vor.u32 %v532_v34, %v531_v15  ;;  %v536_v0 = vshll.u32 %v535_v35, 23  ;;  %v933_v2 = vsel %vm931_vm3, %v932_v10, %v2829_v23 }
 0x182   : > { %1708 = vst [vmem:[%s2858_s14 + $0x10] sm:$0xff] %v769_v41  ;;  %vm1177_vm4 = vcmp.lt.s32.totalorder %v1176_v8, 2  ;;  %vm2864_vm5 = vcmp.le.f32.partialorder %v458_v43, 0.7853982  ;;  %v934_v24 = vadd.s32 %v933_v2, %v929_v21  ;;  %v770_v20 = vand.u32 2147483647, %v2647_v28 }
 0x183   : > { %v2145_v25 = vpop.eup %2144  ;;  %v537_v11 = vor.u32 4788187, %v536_v0  ;;  %v547_v19 = vsel %vm2864_vm5, 0, %v545_v54  ;;  %vm781_vm6 = vcmp.gt.s32.totalorder %v780_v17, 0  ;;  %vm1181_vm7 = vcmp.eq.s32.totalorder %v1176_v8, 2 }
 0x184   : > { %v2147_v44 = vpop.eup %2146  ;;  %v1182_v5 = vxor.u32 2147483648, %v2145_v25  ;;  %v935_v22 = vadd.s32 536870912, %v934_v24  ;;  %v782_v27 = vsel %vm781_vm6, %v780_v17, 0  ;;  %v540_v43 = vcvt.s32.f32 %v533_v61 }
 0x185   : > { %v1179_v31 = vxor.u32 2147483648, %v2147_v44  ;;  %v538_v3 = vand.u32 2147483647, %v537_v11  ;;  %v784_v32 = vand.u32 31, %v782_v27  ;;  %vm1178_vm8 = vcmp.eq.s32.totalorder %v1176_v8, 0 }
 0x186   : > { %v1183_v33 = vsel %vm1181_vm7, %v1182_v5, %v2147_v44  ;;  %v551_v59 = vadd.s32 3, %v547_v19  ;;  %v2871_v16 = vshrl.u32 %v935_v22, 30  ;;  %v777_v38 = vand.u32 8388607, %v770_v20 }
 0x187   : > { %v1180_v36 = vsel %vm1178_vm8, %v2145_v25, %v1179_v31  ;;  %v541_v37 = vmul.f32 %v540_v43, %v538_v3  ;;  %v785_v39 = vsub.s32 32, %v784_v32  ;;  %vm1174_vm9 = vweird.f32 %v2536_v18 }
 0x188   : > { %v1184_v46 = vsel %vm1177_vm4, %v1180_v36, %v1183_v33  ;;  %v937_v23 = vshll.u32 %v2871_v16, 30  ;;  %v787_v9 = vshll.u32 %v2350_v49, %v784_v32  ;;  %v790_v4 = vshll.u32 %v2351_v51, %v784_v32 }
 0x189   : > { %v1185_v47 = vsel %vm1174_vm9, nan, %v1184_v46  ;;  %v542_v50 = vxor.u32 2147483648, %v541_v37  ;;  %v788_v52 = vshrl.u32 %v2351_v51, %v785_v39  ;;  %v2882_v56 = vand.u32 3, %v551_v59 }
 0x18a   : > { %1712 = vst [vmem:[%s2858_s14 + $0x30] sm:$0xff] %v1185_v47  ;;  %v2884_v58 = vsub.s32 %v934_v24, %v937_v23  ;;  %v791_v45 = vshrl.u32 %v2352_v53, %v785_v39  ;;  %v793_v18 = vshll.u32 %v2352_v53, %v784_v32  ;;  %v778_v63 = vor.u32 8388608, %v777_v38  ;;  %v418_v47 = vpop.f32.mrf.mxu1 }
 0x18b   : > { %v543_v48 = vsel %vm460_vm15, %v542_v50, %v541_v37  ;;  %v794_v6 = vshrl.u32 %v2353_v55, %v785_v39  ;;  %v1189_v7 = vand.u32 2139095040, %v2650_v29  ;;  %v783_v12 = vshrl.u32 %v782_v27, 5 }
 0x18c   : > { %v546_v8 = vsel %vm2864_vm5, %v2551_v26, %v543_v48  ;;  %v940_v10 = vsub.s32 0, %v2884_v58  ;;  %v789_v13 = vor.u32 %v788_v52, %v787_v9  ;;  %v792_v15 = vor.u32 %v791_v45, %v790_v4 }
 0x18d   : > { %2148 = vcosq.f32 %v546_v8  ;;  %v796_v34 = vshll.u32 %v2353_v55, %v784_v32  ;;  %v797_v35 = vshrl.u32 %v2354_v57, %v785_v39  ;;  %v795_v54 = vor.u32 %v794_v6, %v793_v18 }
 0x18e   : > { %2150 = vsinq.f32 %v546_v8  ;;  %v1907_v41 = vmin.u32 %v940_v10, %v2884_v58  ;;  %v799_v21 = vshll.u32 %v2354_v57, %v784_v32  ;;  %v930_v61 = vadd.s32 %v2828_v40, %v2836_v60 }
 0x18f   : > { %v786_v0 = vshrl.u32 %v2350_v49, %v785_v39  ;;  %v798_v2 = vor.u32 %v797_v35, %v796_v34  ;;  %v800_v17 = vshrl.u32 %v2355_v1, %v785_v39  ;;  %vm802_vm10 = vcmp.lt.s32.totalorder %v783_v12, 1  ;;  %v402_v39 = vpop.f32.mrf.mxu0 }
 0x190   : > { %v942_v42 = vclz %v1907_v41  ;;  %v818_v24 = vshll.u32 %v778_v63, 8  ;;  %v1190_v25 = vshrl.u32 %v1189_v7, 23  ;;  %vm876_vm11 = vcmp.lt.s32.totalorder %v2558_v30, 0 }
 0x191   : > { %v801_v11 = vor.u32 %v800_v17, %v799_v21  ;;  %vm803_vm12 = vcmp.lt.s32.totalorder %v783_v12, 2  ;;  %vm804_vm13 = vcmp.lt.s32.totalorder %v783_v12, 3  ;;  %vm805_vm14 = vcmp.lt.s32.totalorder %v783_v12, 4 }
 0x192   : > { %v1908_v19 = vadd.s32 4294967294, %v942_v42  ;;  %v807_v44 = vsel %vm805_vm14, %v795_v54, 2102212464  ;;  %v810_v5 = vsel %vm802_vm10, %v789_v13, %v792_v15  ;;  %v811_v22 = vsel %vm805_vm14, %v798_v2, 920167782 }
 0x193   : > { %v806_v40 = vsel %vm802_vm10, %v786_v0, %v789_v13  ;;  %v812_v60 = vsel %vm804_vm13, %v795_v54, %v811_v22  ;;  %v814_v27 = vsel %vm802_vm10, %v792_v15, %v795_v54  ;;  %v815_v31 = vsel %vm805_vm14, %v801_v11, 1326507024 }
 0x194   : > { %vm2907_vm15 = vcmp.le.f32.partialorder %v874_v62, 0.7853982  ;;  %vm1909_vm0 = vcmp.lt.s32.totalorder %v1908_v19, 0  ;;  %v808_v43 = vsel %vm804_vm13, %v792_v15, %v807_v44  ;;  %v813_v32 = vsel %vm803_vm12, %v810_v5, %v812_v60 }
 0x195   : > { %v816_v33 = vsel %vm804_vm13, %v798_v2, %v815_v31  ;;  %v945_v59 = vsel %vm1909_vm0, 0, %v1908_v19  ;;  %v2913_v37 = vmul.u32.u64.low %v818_v24, %v813_v32  ;;  %v2914_v38 = vmul.u32.u64.high %v818_v24, %v813_v32, %v2913_v37 }
 0x196   : > { %v817_v36 = vsel %vm803_vm12, %v814_v27, %v816_v33  ;;  %vm553_vm1 = vcmp.lt.s32.totalorder %v2882_v56, 2  ;;  %v946_v46 = vsub.s32 32, %v945_v59  ;;  %v950_v62 = vsub.s32 4294967266, %v945_v59 }
 0x197   : > { %v960_v23 = vsub.s32 4, %v2871_v16  ;;  %v1186_v9 = vand.u32 2147483647, %v2650_v29  ;;  %v809_v50 = vsel %vm803_vm12, %v806_v40, %v808_v43  ;;  %v1918_v45 = vadd.s32 4294967169, %v1190_v25 }
 0x198   : > { %v2921_v52 = vmul.u32.u64.low %v818_v24, %v817_v36  ;;  %v2922_v4 = vmul.u32.u64.high %v818_v24, %v817_v36, %v2921_v52  ;;  %v947_v18 = vshll.u32 %v2884_v58, %v945_v59  ;;  %v948_v48 = vshrl.u32 %v930_v61, %v946_v46 }
 0x199   : > { %v951_v63 = vadd.s32 127, %v950_v62  ;;  %v2926_v6 = vadd.f32 %v2530_v14, %v402_v39  ;;  %vm554_vm2 = vcmp.eq.s32.totalorder %v2882_v56, 0  ;;  %v828_v7 = vadd.s32 1, %v2914_v38 }
 0x19a   : > { %v1196_v8 = vadd.s32 1, %v1918_v45  ;;  %v2931_v10 = vadd.f32 %v2530_v14, %v418_v47  ;;  %v2149_v12 = vpop.eup %2148  ;;  %vm557_vm3 = vcmp.eq.s32.totalorder %v2882_v56, 2  ;;  %v949_v13 = vor.u32 %v948_v48, %v947_v18 }
 0x19b   : > { %v952_v15 = vshll.u32 %v951_v63, 23  ;;  %v961_v58 = vsel %vm876_vm11, %v960_v23, %v2871_v16  ;;  %447 = vst [vmem:[%s2540_s6 + $0x8] sm:$0xff] %v2926_v6  ;;  %v2151_v34 = vpop.eup %2150  ;;  %v558_v35 = vxor.u32 2147483648, %v2149_v12  ;;  %v825_v41 = vmul.u32 %v818_v24, %v809_v50 }
 0x19c   : > { %vm827_vm4 = vc.u32 %v2922_v4, %v2913_v37  ;;  %vm1197_vm5 = vcmp.gt.s32.totalorder %v1196_v8, 0  ;;  %451 = vst [vmem:[%s2540_s6 + $0x28] sm:$0xff] %v2931_v10  ;;  %v555_v14 = vxor.u32 2147483648, %v2151_v34  ;;  %v1193_v61 = vand.u32 8388607, %v1186_v9 }
 0x19d   : > { %v953_v54 = vor.u32 4788187, %v952_v15  ;;  %v829_v21 = vsel %vm827_vm4, %v828_v7, %v2914_v38  ;;  %v559_v16 = vsel %vm557_vm3, %v558_v35, %v2151_v34  ;;  %v963_v0 = vsel %vm2907_vm15, 0, %v961_v58 }
 0x19e   : > { %v830_v2 = vadd.s32 %v829_v21, %v825_v41  ;;  %v1198_v17 = vsel %vm1197_vm5, %v1196_v8, 0  ;;  %v556_v42 = vsel %vm554_vm2, %v2149_v12, %v555_v14  ;;  %v956_v25 = vcvt.s32.f32 %v949_v13 }
 0x19f   : > { %v954_v24 = vand.u32 2147483647, %v953_v54  ;;  %v1200_v11 = vand.u32 31, %v1198_v17  ;;  %vm550_vm6 = vweird.f32 %v2551_v26  ;;  %v560_v19 = vsel %vm553_vm1, %v556_v42, %v559_v16 }
 0x1a0   : > { %v831_v44 = vadd.s32 536870912, %v830_v2  ;;  %v561_v5 = vsel %vm550_vm6, nan, %v560_v19  ;;  %v967_v60 = vadd.s32 3, %v963_v0  ;;  %v1194_v31 = vor.u32 8388608, %v1193_v61 }
 0x1a1   : > { %v957_v22 = vmul.f32 %v956_v25, %v954_v24  ;;  %v1201_v40 = vsub.s32 32, %v1200_v11  ;;  %1706 = vst [vmem:[%s2858_s14] sm:$0xff] %v561_v5  ;;  %v1203_v43 = vshll.u32 %v2350_v49, %v1200_v11  ;;  %v1206_v59 = vshll.u32 %v2351_v51, %v1200_v11 }
 0x1a2   : > { %v2954_v27 = vshrl.u32 %v831_v44, 30  ;;  %v1209_v36 = vshll.u32 %v2352_v53, %v1200_v11  ;;  %v1199_v62 = vshrl.u32 %v1198_v17, 5  ;;  %v1212_v47 = vshll.u32 %v2353_v55, %v1200_v11 }
 0x1a3   : > { %v958_v32 = vxor.u32 2147483648, %v957_v22  ;;  %v1204_v33 = vshrl.u32 %v2351_v51, %v1201_v40  ;;  %v1207_v26 = vshrl.u32 %v2352_v53, %v1201_v40  ;;  %v1210_v38 = vshrl.u32 %v2353_v55, %v1201_v40 }
 0x1a4   : > { %v833_v56 = vshll.u32 %v2954_v27, 30  ;;  %v1213_v39 = vshrl.u32 %v2354_v57, %v1201_v40  ;;  %v1215_v63 = vshll.u32 %v2354_v57, %v1200_v11  ;;  %v1216_v7 = vshrl.u32 %v2355_v1, %v1201_v40 }
 0x1a5   : > { %v959_v46 = vsel %vm876_vm11, %v958_v32, %v957_v22  ;;  %v1205_v23 = vor.u32 %v1204_v33, %v1203_v43  ;;  %v1208_v45 = vor.u32 %v1207_v26, %v1206_v59  ;;  %v1211_v18 = vor.u32 %v1210_v38, %v1209_v36 }
 0x1a6   : > { %v962_v50 = vsel %vm2907_vm15, %v2558_v30, %v959_v46  ;;  %v2970_v52 = vsub.s32 %v830_v2, %v833_v56  ;;  %v1214_v48 = vor.u32 %v1213_v39, %v1212_v47  ;;  %v2975_v12 = vand.u32 3, %v967_v60 }
 0x1a7   : > { %2152 = vcosq.f32 %v962_v50  ;;  %v1217_v13 = vor.u32 %v1216_v7, %v1215_v63  ;;  %vm1221_vm7 = vcmp.lt.s32.totalorder %v1199_v62, 4  ;;  %v565_v3 = vand.u32 2139095040, %v2926_v6 }
 0x1a8   : > { %2154 = vsinq.f32 %v962_v50  ;;  %v836_v8 = vsub.s32 0, %v2970_v52  ;;  %v1202_v15 = vshrl.u32 %v2350_v49, %v1201_v40  ;;  %vm1218_vm8 = vcmp.lt.s32.totalorder %v1199_v62, 1 }
 0x1a9   : > { %v1223_v58 = vsel %vm1221_vm7, %v1211_v18, 2102212464  ;;  %vm1219_vm9 = vcmp.lt.s32.totalorder %v1199_v62, 2  ;;  %v1226_v34 = vsel %vm1218_vm8, %v1205_v23, %v1208_v45  ;;  %v1227_v35 = vsel %vm1221_vm7, %v1214_v48, 920167782 }
 0x1aa   : > { %v1903_v30 = vmin.u32 %v836_v8, %v2970_v52  ;;  %v1234_v41 = vshll.u32 %v1194_v31, 8  ;;  %vm1220_vm10 = vcmp.lt.s32.totalorder %v1199_v62, 3  ;;  %v1222_v54 = vsel %vm1218_vm8, %v1202_v15, %v1205_v23  ;;  %v2188_v31 = vld [vmem:[%s2540_s6 + $0x20] sm:$0xff] }
 0x1ab   : > { %v1230_v21 = vsel %vm1218_vm8, %v1208_v45, %v1211_v18  ;;  %v1224_v61 = vsel %vm1220_vm10, %v1208_v45, %v1223_v58  ;;  %v1228_v16 = vsel %vm1220_vm10, %v1211_v18, %v1227_v35  ;;  %v1231_v0 = vsel %vm1221_vm7, %v1217_v13, 1326507024 }
 0x1ac   : > { %v838_v14 = vclz %v1903_v30  ;;  %v566_v2 = vshrl.u32 %v565_v3, 23  ;;  %vm772_vm11 = vcmp.lt.s32.totalorder %v2647_v28, 0  ;;  %v1229_v42 = vsel %vm1219_vm9, %v1226_v34, %v1228_v16 }
 0x1ad   : > { %v1232_v24 = vsel %vm1220_vm10, %v1214_v48, %v1231_v0  ;;  %vm2987_vm12 = vcmp.le.f32.partialorder %v770_v20, 0.7853982  ;;  %v2992_v19 = vmul.u32.u64.low %v1234_v41, %v1229_v42  ;;  %v2993_v44 = vmul.u32.u64.high %v1234_v41, %v1229_v42, %v2992_v19 }
 0x1ae   : > { %v1904_v17 = vadd.s32 4294967294, %v838_v14  ;;  %v1233_v11 = vsel %vm1219_vm9, %v1230_v21, %v1232_v24  ;;  %v1894_v5 = vadd.s32 4294967169, %v566_v2  ;;  %v1225_v22 = vsel %vm1219_vm9, %v1222_v54, %v1224_v61 }
 0x1af   : > { %v2997_v40 = vmul.u32.u64.low %v1234_v41, %v1233_v11  ;;  %v2998_v60 = vmul.u32.u64.high %v1234_v41, %v1233_v11, %v2997_v40  ;;  %vm966_vm14 = vweird.f32 %v2188_v31  ;;  %vm969_vm15 = vcmp.lt.s32.totalorder %v2975_v12, 2 }
 0x1b0   : > { %vm1905_vm13 = vcmp.lt.s32.totalorder %v1904_v17, 0  ;;  %v856_v43 = vsub.s32 4, %v2954_v27  ;;  %v572_v32 = vadd.s32 1, %v1894_v5  ;;  %vm973_vm0 = vcmp.eq.s32.totalorder %v2975_v12, 2 }
 0x1b1   : > { %v841_v20 = vsel %vm1905_vm13, 0, %v1904_v17  ;;  %v826_v33 = vadd.s32 %v2913_v37, %v2922_v4  ;;  %v1241_v56 = vmul.u32 %v1234_v41, %v1225_v22  ;;  %v1244_v36 = vadd.s32 1, %v2993_v44 }
 0x1b2   : > { %v842_v59 = vsub.s32 32, %v841_v20  ;;  %v846_v26 = vsub.s32 4294967266, %v841_v20  ;;  %v562_v38 = vand.u32 2147483647, %v2926_v6  ;;  %vm573_vm1 = vcmp.gt.s32.totalorder %v572_v32, 0 }
 0x1b3   : > { %v843_v46 = vshll.u32 %v2970_v52, %v841_v20  ;;  %vm1243_vm2 = vc.u32 %v2998_v60, %v2992_v19  ;;  %v857_v37 = vsel %vm772_vm11, %v856_v43, %v2954_v27  ;;  %v574_v45 = vsel %vm573_vm1, %v572_v32, 0 }
 0x1b4   : > { %v2153_v39 = vpop.eup %2152  ;;  %v844_v62 = vshrl.u32 %v826_v33, %v842_v59  ;;  %v847_v23 = vadd.s32 127, %v846_v26  ;;  %v1245_v4 = vsel %vm1243_vm2, %v1244_v36, %v2993_v44  ;;  %vm970_vm3 = vcmp.eq.s32.totalorder %v2975_v12, 0 }
 0x1b5   : > { %v2155_v47 = vpop.eup %2154  ;;  %v974_v50 = vxor.u32 2147483648, %v2153_v39  ;;  %v1246_v7 = vadd.s32 %v1245_v4, %v1241_v56  ;;  %v569_v8 = vand.u32 8388607, %v562_v38  ;;  %v576_v13 = vand.u32 31, %v574_v45 }
 0x1b6   : > { %v971_v18 = vxor.u32 2147483648, %v2155_v47  ;;  %v845_v48 = vor.u32 %v844_v62, %v843_v46  ;;  %v848_v63 = vshll.u32 %v847_v23, 23  ;;  %v859_v27 = vsel %vm2987_vm12, 0, %v857_v37 }
 0x1b7   : > { %v975_v52 = vsel %vm973_vm0, %v974_v50, %v2155_v47  ;;  %v1247_v15 = vadd.s32 536870912, %v1246_v7  ;;  %v577_v35 = vsub.s32 32, %v576_v13  ;;  %v579_v41 = vshll.u32 %v2350_v49, %v576_v13 }
 0x1b8   : > { %v972_v3 = vsel %vm970_vm3, %v2153_v39, %v971_v18  ;;  %v849_v30 = vor.u32 4788187, %v848_v63  ;;  %v852_v34 = vcvt.s32.f32 %v845_v48  ;;  %v582_v61 = vshll.u32 %v2351_v51, %v576_v13 }
 0x1b9   : > { %v976_v58 = vsel %vm969_vm15, %v972_v3, %v975_v52  ;;  %v1248_v21 = vshrl.u32 %v1247_v15, 30  ;;  %v580_v16 = vshrl.u32 %v2351_v51, %v577_v35  ;;  %v583_v0 = vshrl.u32 %v2352_v53, %v577_v35  ;;  %v1985_v15 = vpop.f32.mrf.mxu1 }
 0x1ba   : > { %v977_v14 = vsel %vm966_vm14, nan, %v976_v58  ;;  %v850_v54 = vand.u32 2147483647, %v849_v30  ;;  %v585_v2 = vshll.u32 %v2352_v53, %v576_v13  ;;  %v586_v12 = vshrl.u32 %v2353_v55, %v577_v35 }
 0x1bb   : > { %1710 = vst [vmem:[%s2858_s14 + $0x20] sm:$0xff] %v977_v14  ;;  %v1249_v42 = vshll.u32 %v1248_v21, 30  ;;  %v570_v24 = vor.u32 8388608, %v569_v8  ;;  %v588_v11 = vshll.u32 %v2353_v55, %v576_v13  ;;  %v863_v44 = vadd.s32 3, %v859_v27 }
 0x1bc   : > { %v853_v17 = vmul.f32 %v852_v34, %v850_v54  ;;  %vm1188_vm4 = vcmp.lt.s32.totalorder %v2650_v29, 0  ;;  %v575_v5 = vshrl.u32 %v574_v45, 5  ;;  %v589_v22 = vshrl.u32 %v2354_v57, %v577_v35 }
 0x1bd   : > { %v981_v40 = vand.u32 2139095040, %v2931_v10  ;;  %v3036_v20 = vsub.s32 %v1246_v7, %v1249_v42  ;;  %v581_v43 = vor.u32 %v580_v16, %v579_v41  ;;  %v591_v32 = vshll.u32 %v2354_v57, %v576_v13 }
 0x1be   : > { %v854_v31 = vxor.u32 2147483648, %v853_v17  ;;  %v584_v33 = vor.u32 %v583_v0, %v582_v61  ;;  %v587_v59 = vor.u32 %v586_v12, %v585_v2  ;;  %v590_v26 = vor.u32 %v589_v22, %v588_v11  ;;  %v3065_v2 = vld [vmem:[%s3515_s2] ss:$0 sm:$0xff]  ;;  %v431_v0 = vpop.f32.mrf.mxu1 }
 0x1bf   : > { %v592_v56 = vshrl.u32 %v2355_v1, %v577_v35  ;;  %v1252_v39 = vsub.s32 0, %v3036_v20  ;;  %v578_v46 = vshrl.u32 %v2350_v49, %v577_v35  ;;  %v610_v62 = vshll.u32 %v570_v24, 8 }
 0x1c0   : > { %v855_v36 = vsel %vm772_vm11, %v854_v31, %v853_v17  ;;  %v1272_v47 = vsub.s32 4, %v1248_v21  ;;  %v982_v37 = vshrl.u32 %v981_v40, 23  ;;  %vm594_vm5 = vcmp.lt.s32.totalorder %v575_v5, 1 }
 0x1c1   : > { %v858_v23 = vsel %vm2987_vm12, %v2647_v28, %v855_v36  ;;  %v593_v50 = vor.u32 %v592_v56, %v591_v32  ;;  %v1919_v4 = vmin.u32 %v1252_v39, %v3036_v20  ;;  %vm597_vm6 = vcmp.lt.s32.totalorder %v575_v5, 4  ;;  %v2190_v56 = vld [vmem:[%s2540_s6 + $0x18] sm:$0xff] }
 0x1c2   : > { %2156 = vcosq.f32 %v858_v23  ;;  %v599_v45 = vsel %vm597_vm6, %v587_v59, 2102212464  ;;  %v602_v18 = vsel %vm594_vm5, %v581_v43, %v584_v33  ;;  %v603_v48 = vsel %vm597_vm6, %v590_v26, 920167782 }
 0x1c3   : > { %2158 = vsinq.f32 %v858_v23  ;;  %v1254_v63 = vclz %v1919_v4  ;;  %vm595_vm7 = vcmp.lt.s32.totalorder %v575_v5, 2  ;;  %vm596_vm8 = vcmp.lt.s32.totalorder %v575_v5, 3 }
 0x1c4   : > { %v598_v7 = vsel %vm594_vm5, %v578_v46, %v581_v43  ;;  %v600_v52 = vsel %vm596_vm8, %v584_v33, %v599_v45  ;;  %v604_v8 = vsel %vm596_vm8, %v587_v59, %v603_v48  ;;  %v606_v25 = vsel %vm594_vm5, %v584_v33, %v587_v59 }
 0x1c5   : > { %v607_v28 = vsel %vm597_vm6, %v593_v50, 1326507024  ;;  %v1920_v13 = vadd.s32 4294967294, %v1254_v63  ;;  %v1273_v3 = vsel %vm1188_vm4, %v1272_v47, %v1248_v21  ;;  %v605_v30 = vsel %vm595_vm7, %v602_v18, %v604_v8 }
 0x1c6   : > { %v608_v27 = vsel %vm596_vm8, %v590_v26, %v607_v28  ;;  %v601_v58 = vsel %vm595_vm7, %v598_v7, %v600_v52  ;;  %v3050_v35 = vmul.u32.u64.low %v610_v62, %v605_v30  ;;  %v3051_v41 = vmul.u32.u64.high %v610_v62, %v605_v30, %v3050_v35 }
 0x1c7   : > { %v609_v34 = vsel %vm595_vm7, %v606_v25, %v608_v27  ;;  %vm1921_vm9 = vcmp.lt.s32.totalorder %v1920_v13, 0  ;;  %v1910_v61 = vadd.s32 4294967169, %v982_v37  ;;  %v864_v16 = vand.u32 3, %v863_v44 }
 0x1c8   : > { %v3053_v14 = vmul.u32.u64.low %v610_v62, %v609_v34  ;;  %v3054_v54 = vmul.u32.u64.high %v610_v62, %v609_v34, %v3053_v14  ;;  %vm3058_vm10 = vcmp.le.f32.partialorder %v1186_v9, 0.7853982  ;;  %v1257_v21 = vsel %vm1921_vm9, 0, %v1920_v13 }
 0x1c9   : > { %v3068_v12 = vadd.f32 %v3065_v2, %v1985_v15  ;;  %v1242_v17 = vadd.s32 %v2992_v19, %v2998_v60  ;;  %v1258_v42 = vsub.s32 32, %v1257_v21  ;;  %v1262_v24 = vsub.s32 4294967266, %v1257_v21 }
 0x1ca   : > { %v988_v11 = vadd.s32 1, %v1910_v61  ;;  %v1275_v9 = vsel %vm3058_vm10, 0, %v1273_v3  ;;  %v617_v44 = vmul.u32 %v610_v62, %v601_v58  ;;  %v620_v5 = vadd.s32 1, %v3051_v41 }
 0x1cb   : > { %v978_v22 = vand.u32 2147483647, %v2931_v10  ;;  %456 = vst [vmem:[%s2540_s6 + $0x50] sm:$0xff] %v3068_v12  ;;  %v1259_v40 = vshll.u32 %v3036_v20, %v1257_v21  ;;  %v1260_v31 = vshrl.u32 %v1242_v17, %v1258_v42  ;;  %v1263_v43 = vadd.s32 127, %v1262_v24 }
 0x1cc   : > { %vm619_vm11 = vc.u32 %v3054_v54, %v3050_v35  ;;  %vm989_vm12 = vcmp.gt.s32.totalorder %v988_v11, 0  ;;  %vm862_vm13 = vweird.f32 %v2190_v56  ;;  %v1279_v36 = vadd.s32 3, %v1275_v9  ;;  %v3111_v9 = vld [vmem:[%s2540_s6 + $0x38] sm:$0xff] }
 0x1cd   : > { %v621_v19 = vsel %vm619_vm11, %v620_v5, %v3051_v41  ;;  %v1261_v60 = vor.u32 %v1260_v31, %v1259_v40  ;;  %v1264_v32 = vshll.u32 %v1263_v43, 23  ;;  %v990_v59 = vsel %vm989_vm12, %v988_v11, 0 }
 0x1ce   : > { %v622_v33 = vadd.s32 %v621_v19, %v617_v44  ;;  %v985_v39 = vand.u32 8388607, %v978_v22  ;;  %v992_v46 = vand.u32 31, %v990_v59  ;;  %vm865_vm14 = vcmp.lt.s32.totalorder %v864_v16, 2 }
 0x1cf   : > { %v2157_v26 = vpop.eup %2156  ;;  %v1265_v23 = vor.u32 4788187, %v1264_v32  ;;  %vm866_vm15 = vcmp.eq.s32.totalorder %v864_v16, 0  ;;  %vm869_vm0 = vcmp.eq.s32.totalorder %v864_v16, 2  ;;  %v1268_v18 = vcvt.s32.f32 %v1261_v60 }
 0x1d0   : > { %v2159_v20 = vpop.eup %2158  ;;  %v870_v62 = vxor.u32 2147483648, %v2157_v26  ;;  %v623_v47 = vadd.s32 536870912, %v622_v33  ;;  %v993_v37 = vsub.s32 32, %v992_v46  ;;  %v3086_v7 = vand.u32 3, %v1279_v36 }
 0x1d1   : > { %v867_v50 = vxor.u32 2147483648, %v2159_v20  ;;  %v1266_v45 = vand.u32 2147483647, %v1265_v23  ;;  %v986_v52 = vor.u32 8388608, %v985_v39  ;;  %v3091_v13 = vadd.s32 %v3050_v35, %v3054_v54 }
 0x1d2   : > { %v871_v4 = vsel %vm869_vm0, %v870_v62, %v2159_v20  ;;  %v3084_v48 = vshrl.u32 %v623_v47, 30  ;;  %v996_v8 = vshrl.u32 %v2351_v51, %v993_v37  ;;  %v995_v27 = vshll.u32 %v2350_v49, %v992_v46 }
 0x1d3   : > { %v868_v63 = vsel %vm866_vm15, %v2157_v26, %v867_v50  ;;  %v1269_v28 = vmul.f32 %v1268_v18, %v1266_v45  ;;  %v999_v15 = vshrl.u32 %v2352_v53, %v993_v37  ;;  %v1002_v58 = vshrl.u32 %v2353_v55, %v993_v37 }
 0x1d4   : > { %v872_v25 = vsel %vm865_vm14, %v868_v63, %v871_v4  ;;  %v625_v3 = vshll.u32 %v3084_v48, 30  ;;  %v991_v14 = vshrl.u32 %v990_v59, 5  ;;  %v998_v61 = vshll.u32 %v2351_v51, %v992_v46  ;;  %v1986_v63 = vpop.f32.mrf.mxu1 }
 0x1d5   : > { %v873_v30 = vsel %vm862_vm13, nan, %v872_v25  ;;  %v1270_v34 = vxor.u32 2147483648, %v1269_v28  ;;  %v997_v35 = vor.u32 %v996_v8, %v995_v27  ;;  %v1001_v54 = vshll.u32 %v2352_v53, %v992_v46 }
 0x1d6   : > { %1709 = vst [vmem:[%s2858_s14 + $0x18] sm:$0xff] %v873_v30  ;;  %v3099_v41 = vsub.s32 %v622_v33, %v625_v3  ;;  %v1004_v16 = vshll.u32 %v2353_v55, %v992_v46  ;;  %v1005_v21 = vshrl.u32 %v2354_v57, %v993_v37  ;;  %v1007_v24 = vshll.u32 %v2354_v57, %v992_v46 }
 0x1d7   : > { %v1271_v17 = vsel %vm1188_vm4, %v1270_v34, %v1269_v28  ;;  %v1008_v11 = vshrl.u32 %v2355_v1, %v993_v37  ;;  %v1000_v5 = vor.u32 %v999_v15, %v998_v61  ;;  %v1003_v40 = vor.u32 %v1002_v58, %v1001_v54 }
 0x1d8   : > { %v628_v42 = vsub.s32 0, %v3099_v41  ;;  %v1274_v44 = vsel %vm3058_vm10, %v3111_v9, %v1271_v17  ;;  %v1006_v31 = vor.u32 %v1005_v21, %v1004_v16  ;;  %v1026_v19 = vshll.u32 %v986_v52, 8 }
 0x1d9   : > { %2160 = vcosq.f32 %v1274_v44  ;;  %v1009_v29 = vor.u32 %v1008_v11, %v1007_v24  ;;  %v994_v60 = vshrl.u32 %v2350_v49, %v993_v37  ;;  %vm1010_vm1 = vcmp.lt.s32.totalorder %v991_v14, 1 }
 0x1da   : > { %v1895_v43 = vmin.u32 %v628_v42, %v3099_v41  ;;  %2162 = vsinq.f32 %v1274_v44  ;;  %v1501_v32 = vand.u32 2139095040, %v3068_v12  ;;  %vm564_vm2 = vcmp.lt.s32.totalorder %v2926_v6, 0 }
 0x1db   : > { %vm1011_vm3 = vcmp.lt.s32.totalorder %v991_v14, 2  ;;  %vm1012_vm4 = vcmp.lt.s32.totalorder %v991_v14, 3  ;;  %vm1013_vm5 = vcmp.lt.s32.totalorder %v991_v14, 4  ;;  %v1018_v26 = vsel %vm1010_vm1, %v997_v35, %v1000_v5 }
 0x1dc   : > { %v630_v33 = vclz %v1895_v43  ;;  %v1015_v59 = vsel %vm1013_vm5, %v1003_v40, 2102212464  ;;  %v1019_v56 = vsel %vm1013_vm5, %v1006_v31, 920167782  ;;  %v1022_v36 = vsel %vm1010_vm1, %v1000_v5, %v1003_v40 }
 0x1dd   : > { %v1014_v46 = vsel %vm1010_vm1, %v994_v60, %v997_v35  ;;  %v1020_v20 = vsel %vm1012_vm4, %v1003_v40, %v1019_v56  ;;  %v1023_v62 = vsel %vm1013_vm5, %v1009_v29, 1326507024  ;;  %v1016_v23 = vsel %vm1012_vm4, %v1000_v5, %v1015_v59 }
 0x1de   : > { %v1896_v39 = vadd.s32 4294967294, %v630_v33  ;;  %v1021_v47 = vsel %vm1011_vm3, %v1018_v26, %v1020_v20  ;;  %v1024_v50 = vsel %vm1012_vm4, %v1006_v31, %v1023_v62  ;;  %v1502_v37 = vshrl.u32 %v1501_v32, 23 }
 0x1df   : > { %v1025_v4 = vsel %vm1011_vm3, %v1022_v36, %v1024_v50  ;;  %v3122_v45 = vmul.u32.u64.low %v1026_v19, %v1021_v47  ;;  %v3123_v18 = vmul.u32.u64.high %v1026_v19, %v1021_v47, %v3122_v45  ;;  %v648_v8 = vsub.s32 4, %v3084_v48 }
 0x1e0   : > { %vm1897_vm6 = vcmp.lt.s32.totalorder %v1896_v39, 0  ;;  %v3127_v25 = vmul.u32.u64.low %v1026_v19, %v1025_v4  ;;  %v3128_v28 = vmul.u32.u64.high %v1026_v19, %v1025_v4, %v3127_v25  ;;  %v1017_v27 = vsel %vm1011_vm3, %v1014_v46, %v1016_v23 }
 0x1e1   : > { %v633_v52 = vsel %vm1897_vm6, 0, %v1896_v39  ;;  %v1930_v15 = vadd.s32 4294967169, %v1502_v37  ;;  %v1498_v34 = vand.u32 2147483647, %v3068_v12  ;;  %v3134_v61 = vadd.f32 %v3065_v2, %v431_v0 }
 0x1e2   : > { %v634_v3 = vsub.s32 32, %v633_v52  ;;  %v638_v30 = vsub.s32 4294967266, %v633_v52  ;;  %v635_v58 = vshll.u32 %v3099_v41, %v633_v52  ;;  %v3137_v35 = vadd.f32 %v3065_v2, %v1986_v63 }
 0x1e3   : > { %v1036_v21 = vadd.s32 1, %v3123_v18  ;;  %v1508_v17 = vadd.s32 1, %v1930_v15  ;;  %v649_v14 = vsel %vm564_vm2, %v648_v8, %v3084_v48  ;;  %v1033_v42 = vmul.u32 %v1026_v19, %v1017_v27  ;;  %454 = vst [vmem:[%s2540_s6 + $0x40] sm:$0xff] %v3134_v61 }
 0x1e4   : > { %v636_v54 = vshrl.u32 %v3091_v13, %v634_v3  ;;  %v639_v16 = vadd.s32 127, %v638_v30  ;;  %vm1035_vm7 = vc.u32 %v3128_v28, %v3122_v45  ;;  %457 = vst [vmem:[%s2540_s6 + $0x58] sm:$0xff] %v3137_v35  ;;  %vm3153_vm9 = vcmp.le.f32.partialorder %v562_v38, 0.7853982 }
 0x1e5   : > { %v1037_v13 = vsel %vm1035_vm7, %v1036_v21, %v3123_v18  ;;  %vm1509_vm8 = vcmp.gt.s32.totalorder %v1508_v17, 0  ;;  %vm1285_vm10 = vcmp.eq.s32.totalorder %v3086_v7, 2  ;;  %v1505_v29 = vand.u32 8388607, %v1498_v34 }
 0x1e6   : > { %v637_v41 = vor.u32 %v636_v54, %v635_v58  ;;  %v640_v24 = vshll.u32 %v639_v16, 23  ;;  %v2161_v11 = vpop.eup %2160  ;;  %v1038_v48 = vadd.s32 %v1037_v13, %v1033_v42  ;;  %v1510_v5 = vsel %vm1509_vm8, %v1508_v17, 0 }
 0x1e7   : > { %v2163_v40 = vpop.eup %2162  ;;  %v1286_v31 = vxor.u32 2147483648, %v2161_v11  ;;  %v651_v60 = vsel %vm3153_vm9, 0, %v649_v14  ;;  %v1512_v33 = vand.u32 31, %v1510_v5  ;;  %vm1282_vm11 = vcmp.eq.s32.totalorder %v3086_v7, 0 }
 0x1e8   : > { %v641_v43 = vor.u32 4788187, %v640_v24  ;;  %v1283_v19 = vxor.u32 2147483648, %v2163_v40  ;;  %v1039_v32 = vadd.s32 536870912, %v1038_v48  ;;  %v644_v59 = vcvt.s32.f32 %v637_v41 }
 0x1e9   : > { %v1287_v38 = vsel %vm1285_vm10, %v1286_v31, %v2163_v40  ;;  %vm1281_vm12 = vcmp.lt.s32.totalorder %v3086_v7, 2  ;;  %v1513_v36 = vsub.s32 32, %v1512_v33  ;;  %vm1278_vm13 = vweird.f32 %v3111_v9 }
 0x1ea   : > { %v642_v0 = vand.u32 2147483647, %v641_v43  ;;  %v1284_v26 = vsel %vm1282_vm11, %v2161_v11, %v1283_v19  ;;  %v3164_v56 = vshrl.u32 %v1039_v32, 30  ;;  %v655_v20 = vadd.s32 3, %v651_v60 }
 0x1eb   : > { %v1288_v39 = vsel %vm1281_vm12, %v1284_v26, %v1287_v38  ;;  %v1506_v47 = vor.u32 8388608, %v1505_v29  ;;  %v1515_v50 = vshll.u32 %v2350_v49, %v1512_v33  ;;  %v1516_v4 = vshrl.u32 %v2351_v51, %v1513_v36 }
 0x1ec   : > { %v645_v46 = vmul.f32 %v644_v59, %v642_v0  ;;  %v1289_v62 = vsel %vm1278_vm13, nan, %v1288_v39  ;;  %v1041_v23 = vshll.u32 %v3164_v56, 30  ;;  %v1519_v7 = vshrl.u32 %v2352_v53, %v1513_v36 }
 0x1ed   : > { %1713 = vst [vmem:[%s2858_s14 + $0x38] sm:$0xff] %v1289_v62  ;;  %v1522_v18 = vshrl.u32 %v2353_v55, %v1513_v36  ;;  %v1518_v9 = vshll.u32 %v2351_v51, %v1512_v33  ;;  %v1521_v52 = vshll.u32 %v2352_v53, %v1512_v33  ;;  %v1525_v8 = vshrl.u32 %v2354_v57, %v1513_v36 }
 0x1ee   : > { %v646_v37 = vxor.u32 2147483648, %v645_v46  ;;  %v3173_v63 = vsub.s32 %v1038_v48, %v1041_v23  ;;  %v1511_v3 = vshrl.u32 %v1510_v5, 5  ;;  %v1517_v30 = vor.u32 %v1516_v4, %v1515_v50 }
 0x1ef   : > { %v1524_v27 = vshll.u32 %v2353_v55, %v1512_v33  ;;  %v1520_v54 = vor.u32 %v1519_v7, %v1518_v9  ;;  %v1523_v16 = vor.u32 %v1522_v18, %v1521_v52  ;;  %v1527_v17 = vshll.u32 %v2354_v57, %v1512_v33 }
 0x1f0   : > { %v647_v25 = vsel %vm564_vm2, %v646_v37, %v645_v46  ;;  %v1044_v58 = vsub.s32 0, %v3173_v63  ;;  %v1528_v14 = vshrl.u32 %v2355_v1, %v1513_v36  ;;  %v3187_v42 = vand.u32 3, %v655_v20 }
 0x1f1   : > { %v650_v15 = vsel %vm3153_vm9, %v2926_v6, %v647_v25  ;;  %v1526_v21 = vor.u32 %v1525_v8, %v1524_v27  ;;  %v1546_v24 = vshll.u32 %v1506_v47, 8  ;;  %v1514_v13 = vshrl.u32 %v2350_v49, %v1513_v36 }
 0x1f2   : > { %2164 = vcosq.f32 %v650_v15  ;;  %v1911_v41 = vmin.u32 %v1044_v58, %v3173_v63  ;;  %v1529_v11 = vor.u32 %v1528_v14, %v1527_v17  ;;  %vm1530_vm14 = vcmp.lt.s32.totalorder %v1511_v3, 1 }
 0x1f3   : > { %2166 = vsinq.f32 %v650_v15  ;;  %v1293_v44 = vand.u32 2139095040, %v3134_v61  ;;  %vm1532_vm15 = vcmp.lt.s32.totalorder %v1511_v3, 3  ;;  %vm1533_vm0 = vcmp.lt.s32.totalorder %v1511_v3, 4 }
 0x1f4   : > { %v1046_v48 = vclz %v1911_v41  ;;  %v1538_v5 = vsel %vm1530_vm14, %v1517_v30, %v1520_v54  ;;  %v1535_v40 = vsel %vm1533_vm0, %v1523_v16, 2102212464  ;;  %v1539_v31 = vsel %vm1533_vm0, %v1526_v21, 920167782 }
 0x1f5   : > { %v1542_v43 = vsel %vm1530_vm14, %v1520_v54, %v1523_v16  ;;  %v1543_v29 = vsel %vm1533_vm0, %v1529_v11, 1326507024  ;;  %vm1531_vm1 = vcmp.lt.s32.totalorder %v1511_v3, 2  ;;  %v1540_v60 = vsel %vm1532_vm15, %v1523_v16, %v1539_v31 }
 0x1f6   : > { %v1912_v19 = vadd.s32 4294967294, %v1046_v48  ;;  %v1544_v32 = vsel %vm1532_vm15, %v1526_v21, %v1543_v29  ;;  %v1534_v33 = vsel %vm1530_vm14, %v1514_v13, %v1517_v30  ;;  %v1541_v38 = vsel %vm1531_vm1, %v1538_v5, %v1540_v60 }
 0x1f7   : > { %v1545_v0 = vsel %vm1531_vm1, %v1542_v43, %v1544_v32  ;;  %v1294_v59 = vshrl.u32 %v1293_v44, 23  ;;  %v1536_v26 = vsel %vm1532_vm15, %v1520_v54, %v1535_v40  ;;  %v1034_v47 = vadd.s32 %v3122_v45, %v3128_v28 }
 0x1f8   : > { %vm1913_vm2 = vcmp.lt.s32.totalorder %v1912_v19, 0  ;;  %v3197_v36 = vmul.u32.u64.low %v1546_v24, %v1545_v0  ;;  %v3198_v39 = vmul.u32.u64.high %v1546_v24, %v1545_v0, %v3197_v36  ;;  %vm654_vm3 = vweird.f32 %v2926_v6 }
 0x1f9   : > { %v1049_v46 = vsel %vm1913_vm2, 0, %v1912_v19  ;;  %v3200_v20 = vmul.u32.u64.low %v1546_v24, %v1541_v38  ;;  %v3201_v62 = vmul.u32.u64.high %v1546_v24, %v1541_v38, %v3200_v20  ;;  %v1922_v23 = vadd.s32 4294967169, %v1294_v59 }
 0x1fa   : > { %v1050_v50 = vsub.s32 32, %v1049_v46  ;;  %v1054_v37 = vsub.s32 4294967266, %v1049_v46  ;;  %vm980_vm4 = vcmp.lt.s32.totalorder %v2931_v10, 0  ;;  %v1537_v4 = vsel %vm1531_vm1, %v1534_v33, %v1536_v26 }
 0x1fb   : > { %v1300_v7 = vadd.s32 1, %v1922_v23  ;;  %v1051_v18 = vshll.u32 %v3173_v63, %v1049_v46  ;;  %vm1555_vm5 = vc.u32 %v3198_v39, %v3200_v20  ;;  %vm657_vm6 = vcmp.lt.s32.totalorder %v3187_v42, 2 }
 0x1fc   : > { %v1052_v9 = vshrl.u32 %v1034_v47, %v1050_v50  ;;  %v1055_v52 = vadd.s32 127, %v1054_v37  ;;  %v1064_v45 = vsub.s32 4, %v3164_v56  ;;  %v1556_v28 = vadd.s32 1, %v3201_v62 }
 0x1fd   : > { %vm1301_vm7 = vcmp.gt.s32.totalorder %v1300_v7, 0  ;;  %v1553_v3 = vmul.u32 %v1546_v24, %v1537_v4  ;;  %v1290_v54 = vand.u32 2147483647, %v3134_v61  ;;  %vm661_vm8 = vcmp.eq.s32.totalorder %v3187_v42, 2 }
 0x1fe   : > { %v1053_v25 = vor.u32 %v1052_v9, %v1051_v18  ;;  %v1056_v30 = vshll.u32 %v1055_v52, 23  ;;  %v1302_v27 = vsel %vm1301_vm7, %v1300_v7, 0  ;;  %v1557_v63 = vsel %vm1555_vm5, %v1556_v28, %v3201_v62 }
 0x1ff   : > { %v2165_v8 = vpop.eup %2164  ;;  %v1304_v16 = vand.u32 31, %v1302_v27  ;;  %vm3220_vm9 = vcmp.le.f32.partialorder %v978_v22, 0.7853982  ;;  %v1558_v41 = vadd.s32 %v1557_v63, %v1553_v3  ;;  %vm658_vm10 = vcmp.eq.s32.totalorder %v3187_v42, 0 }
 0x200   : > { %v2167_v15 = vpop.eup %2166  ;;  %v662_v58 = vxor.u32 2147483648, %v2165_v8  ;;  %v1057_v14 = vor.u32 4788187, %v1056_v30  ;;  %v1065_v13 = vsel %vm980_vm4, %v1064_v45, %v3164_v56  ;;  %v1060_v5 = vcvt.s32.f32 %v1053_v25 }
 0x201   : > { %v659_v21 = vxor.u32 2147483648, %v2167_v15  ;;  %v1305_v11 = vsub.s32 32, %v1304_v16  ;;  %v1559_v40 = vadd.s32 536870912, %v1558_v41  ;;  %v1297_v31 = vand.u32 8388607, %v1290_v54 }
 0x202   : > { %v663_v24 = vsel %vm661_vm8, %v662_v58, %v2167_v15  ;;  %v1058_v48 = vand.u32 2147483647, %v1057_v14  ;;  %v1303_v33 = vshrl.u32 %v1302_v27, 5  ;;  %v1307_v42 = vshll.u32 %v2350_v49, %v1304_v16 }
 0x203   : > { %v660_v44 = vsel %vm658_vm10, %v2165_v8, %v659_v21  ;;  %v1308_v43 = vshrl.u32 %v2351_v51, %v1305_v11  ;;  %v1311_v29 = vshrl.u32 %v2352_v53, %v1305_v11  ;;  %v3236_v56 = vshrl.u32 %v1559_v40, 30  ;;  %v434_v40 = vpop.f32.mrf.mxu1 }
 0x204   : > { %v664_v22 = vsel %vm657_vm6, %v660_v44, %v663_v24  ;;  %v1061_v60 = vmul.f32 %v1060_v5, %v1058_v48  ;;  %v1314_v32 = vshrl.u32 %v2353_v55, %v1305_v11  ;;  %v1313_v38 = vshll.u32 %v2352_v53, %v1304_v16 }
 0x205   : > { %v665_v19 = vsel %vm654_vm3, nan, %v664_v22  ;;  %v1317_v0 = vshrl.u32 %v2354_v57, %v1305_v11  ;;  %v1561_v26 = vshll.u32 %v3236_v56, 30  ;;  %v1310_v36 = vshll.u32 %v2351_v51, %v1304_v16 }
 0x206   : > { %1707 = vst [vmem:[%s2858_s14 + $0x8] sm:$0xff] %v665_v19  ;;  %v1062_v59 = vxor.u32 2147483648, %v1061_v60  ;;  %v1316_v6 = vshll.u32 %v2353_v55, %v1304_v16  ;;  %v1309_v46 = vor.u32 %v1308_v43, %v1307_v42  ;;  %v1315_v62 = vor.u32 %v1314_v32, %v1313_v38 }
 0x207   : > { %v1319_v23 = vshll.u32 %v2354_v57, %v1304_v16  ;;  %v1320_v47 = vshrl.u32 %v2355_v1, %v1305_v11  ;;  %v3250_v37 = vsub.s32 %v1558_v41, %v1561_v26  ;;  %v1312_v4 = vor.u32 %v1311_v29, %v1310_v36 }
 0x208   : > { %v1063_v50 = vsel %vm980_vm4, %v1062_v59, %v1061_v60  ;;  %v1318_v7 = vor.u32 %v1317_v0, %v1316_v6  ;;  %v1067_v9 = vsel %vm3220_vm9, 0, %v1065_v13  ;;  %v1298_v52 = vor.u32 8388608, %v1297_v31 }
 0x209   : > { %v1066_v18 = vsel %vm3220_vm9, %v2931_v10, %v1063_v50  ;;  %v1321_v45 = vor.u32 %v1320_v47, %v1319_v23  ;;  %v1564_v28 = vsub.s32 0, %v3250_v37  ;;  %vm1325_vm11 = vcmp.lt.s32.totalorder %v1303_v33, 4 }
 0x20a   : > { %2168 = vcosq.f32 %v1066_v18  ;;  %v1605_v8 = vand.u32 2139095040, %v3137_v35  ;;  %v1306_v25 = vshrl.u32 %v2350_v49, %v1305_v11  ;;  %vm1322_vm12 = vcmp.lt.s32.totalorder %v1303_v33, 1 }
 0x20b   : > { %2170 = vsinq.f32 %v1066_v18  ;;  %v1327_v30 = vsel %vm1325_vm11, %v1315_v62, 2102212464  ;;  %v1931_v3 = vmin.u32 %v1564_v28, %v3250_v37  ;;  %vm1324_vm13 = vcmp.lt.s32.totalorder %v1303_v33, 3 }
 0x20c   : > { %v1330_v27 = vsel %vm1322_vm12, %v1309_v46, %v1312_v4  ;;  %v1331_v15 = vsel %vm1325_vm11, %v1318_v7, 920167782  ;;  %v1071_v58 = vadd.s32 3, %v1067_v9  ;;  %v1334_v16 = vsel %vm1322_vm12, %v1312_v4, %v1315_v62 }
 0x20d   : > { %v1332_v63 = vsel %vm1324_vm13, %v1315_v62, %v1331_v15  ;;  %v1335_v21 = vsel %vm1325_vm11, %v1321_v45, 1326507024  ;;  %v1566_v17 = vclz %v1931_v3  ;;  %vm1323_vm14 = vcmp.lt.s32.totalorder %v1303_v33, 2 }
 0x20e   : > { %v1326_v14 = vsel %vm1322_vm12, %v1306_v25, %v1309_v46  ;;  %v1328_v41 = vsel %vm1324_vm13, %v1312_v4, %v1327_v30  ;;  %v1333_v24 = vsel %vm1323_vm14, %v1330_v27, %v1332_v63  ;;  %v1336_v13 = vsel %vm1324_vm13, %v1318_v7, %v1335_v21 }
 0x20f   : > { %v3261_v11 = vshll.u32 %v1298_v52, 8  ;;  %v1606_v44 = vshrl.u32 %v1605_v8, 23  ;;  %v1932_v48 = vadd.s32 4294967294, %v1566_v17  ;;  %v1337_v5 = vsel %vm1323_vm14, %v1334_v16, %v1336_v13 }
 0x210   : > { %v1329_v19 = vsel %vm1323_vm14, %v1326_v14, %v1328_v41  ;;  %v3274_v32 = vand.u32 3, %v1071_v58  ;;  %vm1500_vm0 = vcmp.lt.s32.totalorder %v3068_v12, 0  ;;  %v3278_v42 = vadd.f32 %v3065_v2, %v434_v40 }
 0x211   : > { %v3266_v22 = vmul.u32.u64.low %v3261_v11, %v1337_v5  ;;  %v3267_v31 = vmul.u32.u64.high %v3261_v11, %v1337_v5, %v3266_v22  ;;  %v3270_v43 = vmul.u32.u64.low %v3261_v11, %v1333_v24  ;;  %v3271_v29 = vmul.u32.u64.high %v3261_v11, %v1333_v24, %v3270_v43 }
 0x212   : > { %vm1933_vm15 = vcmp.lt.s32.totalorder %v1932_v48, 0  ;;  %v1934_v60 = vadd.s32 4294967169, %v1606_v44  ;;  %vm1070_vm1 = vweird.f32 %v2931_v10  ;;  %v1554_v38 = vadd.s32 %v3200_v20, %v3198_v39  ;;  %455 = vst [vmem:[%s2540_s6 + $0x48] sm:$0xff] %v3278_v42 }
 0x213   : > { %v1569_v33 = vsel %vm1933_vm15, 0, %v1932_v48  ;;  %v1584_v26 = vsub.s32 4, %v3236_v56  ;;  %v1345_v36 = vmul.u32 %v3261_v11, %v1329_v19  ;;  %vm1347_vm2 = vc.u32 %v3267_v31, %v3270_v43 }
 0x214   : > { %v1570_v0 = vsub.s32 32, %v1569_v33  ;;  %v1574_v2 = vsub.s32 4294967266, %v1569_v33  ;;  %v1612_v59 = vadd.s32 1, %v1934_v60  ;;  %v1348_v6 = vadd.s32 1, %v3271_v29 }
 0x215   : > { %v1571_v46 = vshll.u32 %v3250_v37, %v1569_v33 }
 0x216   : > { %v1572_v62 = vshrl.u32 %v1554_v38, %v1570_v0  ;;  %v1575_v39 = vadd.s32 127, %v1574_v2  ;;  %vm1613_vm3 = vcmp.gt.s32.totalorder %v1612_v59, 0 }
 0x217   : > { %2259 = shalt.err (!%p2256_p0)
}
 0x218   : > { %s2260_s23 = scalar_lea.hbm %s3285_s26, 1536  ;;  %s2264_s25 = scalar_lea.hbm %s3517_s4, 6144 }
 0x219   : > { %p2261_p10 = scmp.ne.s32.totalorder %s3285_s26, %s2260_s23  ;;  %p2265_p4 = scmp.lt.s32.totalorder %s3285_s26, %s3517_s4 }
 0x21a   : > { %p2266_p6 = scmp.lt.s32.totalorder %s2264_s25, %s2260_s23 }
 0x21b   : > { %p2262_p2 = pnand %p2261_p10, %p3549_p5 }
 0x21c   : > { %p2267_p8 = por %p2266_p6, %p2265_p4 }
 0x21d   : > { %p2263_p1 = pneg %p2262_p2 }
 0x21f   : > { %p2268_p3 = pnand %p2267_p8, %p2263_p1 }
 0x221   : > { %2271 = shalt.err (!%p2268_p3)
}
 0x222   : > { %s2357_s13 = smov 128   ;;  %s2358_s8 = smov 8   ;;  %v2169_v20 = vpop.eup %2168  ;;  %vm3328_vm4 = vcmp.le.f32.partialorder %v1498_v34, 0.7853982  ;;  %v1349_v47 = vsel %vm1347_vm2, %v1348_v6, %v3271_v29  ;;  %v1602_v50 = vand.u32 2147483647, %v3137_v35  ;;  %v1573_v18 = vor.u32 %v1572_v62, %v1571_v46 }
 0x223   : > { %2061 = dma.vmem_to_hbm [thread:$0]  (%p3549_p5), %s3287_s24, 1536, %s3285_s26, %s1724_s7, %s2357_s13, %s2357_s13, %s2358_s8   ;;  %v1614_v37 = vsel %vm1613_vm3, %v1612_v59, 0  ;;  %v2171_v4 = vpop.eup %2170  ;;  %v1078_v7 = vxor.u32 2147483648, %v2169_v20  ;;  %v1576_v9 = vshll.u32 %v1575_v39, 23  ;;  %v1350_v52 = vadd.s32 %v1349_v47, %v1345_v36 }
 0x224   : > { %vm1074_vm5 = vcmp.eq.s32.totalorder %v3274_v32, 0  ;;  %v1075_v34 = vxor.u32 2147483648, %v2171_v4  ;;  %vm1077_vm6 = vcmp.eq.s32.totalorder %v3274_v32, 2  ;;  %v1616_v45 = vand.u32 31, %v1614_v37  ;;  %s1737_s24 = sshll.u32 %s2858_s14, 4  ;;  %s3467_s12 = scalar_lea.hbm %s3516_s3, %s1943_s29  ;;  %s3469_s24 = int_to_ptr.vmem [resolvable:$true] %s1737_s24 }
 0x225   : > { %v1079_v28 = vsel %vm1077_vm6, %v1078_v7, %v2171_v4  ;;  %v1577_v8 = vor.u32 4788187, %v1576_v9  ;;  %v1585_v25 = vsel %vm1500_vm0, %v1584_v26, %v3236_v56  ;;  %v1351_v30 = vadd.s32 536870912, %v1350_v52  ;;  %s1719_s20 = scalar_lea.sflag [#allocation4], %s2506_s30  ;;  %s2272_s21 = scalar_lea.vmem %s3469_s24, 1536 }
 0x226   : > { %vm1073_vm7 = vcmp.lt.s32.totalorder %v3274_v32, 2  ;;  %v1076_v3 = vsel %vm1074_vm5, %v2169_v20, %v1075_v34  ;;  %v1609_v27 = vand.u32 8388607, %v1602_v50  ;;  %v1617_v15 = vsub.s32 32, %v1616_v45  ;;  %p2273_p7 = scmp.ne.s32.totalorder %s3469_s24, %s2272_s21  ;;  %s2359_s23 = smov [#allocation7]  }
 0x227   : > { %v1080_v58 = vsel %vm1073_vm7, %v1076_v3, %v1079_v28  ;;  %v1578_v63 = vand.u32 2147483647, %v1577_v8  ;;  %v1580_v16 = vcvt.s32.f32 %v1573_v18  ;;  %v3346_v21 = vshrl.u32 %v1351_v30, 30  ;;  %s2276_s19 = sshll.u32 %s2359_s23, 4  ;;  %s2277_s19 = int_to_ptr.vmem [resolvable:$false] %s2276_s19 }
 0x228   : > { %v1081_v17 = vsel %vm1070_vm1, nan, %v1080_v58  ;;  %v1587_v14 = vsel %vm3328_vm4, 0, %v1585_v25  ;;  %v1620_v24 = vshrl.u32 %v2351_v51, %v1617_v15  ;;  %v1623_v13 = vshrl.u32 %v2352_v53, %v1617_v15  ;;  %p2274_p9 = pnand %p2273_p7, %p3549_p5  ;;  %s2278_s5 = scalar_lea.vmem %s2277_s19, 3072 }
 0x229   : > { %1711 = vst [vmem:[%s2858_s14 + $0x28] sm:$0xff] %v1081_v17  ;;  %v1581_v56 = vmul.f32 %v1580_v16, %v1578_v63  ;;  %v1353_v41 = vshll.u32 %v3346_v21, 30  ;;  %v1610_v11 = vor.u32 8388608, %v1609_v27  ;;  %v1615_v44 = vshrl.u32 %v1614_v37, 5  ;;  %p2279_p12 = scmp.lt.s32.totalorder %s3469_s24, %s2277_s19  ;;  %p2280_p13 = scmp.lt.s32.totalorder %s2278_s5, %s2272_s21 }
 0x22a   : > { %v1626_v48 = vshrl.u32 %v2353_v55, %v1617_v15  ;;  %v1629_v5 = vshrl.u32 %v2354_v57, %v1617_v15  ;;  %v1619_v22 = vshll.u32 %v2350_v49, %v1616_v45  ;;  %v1622_v29 = vshll.u32 %v2351_v51, %v1616_v45  ;;  %p2275_p11 = pneg %p2274_p9 }
 0x22b   : > { %v1582_v40 = vxor.u32 2147483648, %v1581_v56  ;;  %v1354_v10 = vsub.s32 %v1350_v52, %v1353_v41  ;;  %v1625_v19 = vshll.u32 %v2352_v53, %v1616_v45  ;;  %v1628_v60 = vshll.u32 %v2353_v55, %v1616_v45  ;;  %p2281_p0 = por %p2280_p13, %p2279_p12 }
 0x22c   : > { %v1631_v32 = vshll.u32 %v2354_v57, %v1616_v45  ;;  %v1632_v33 = vshrl.u32 %v2355_v1, %v1617_v15  ;;  %v1621_v2 = vor.u32 %v1620_v24, %v1619_v22  ;;  %v1624_v59 = vor.u32 %v1623_v13, %v1622_v29 }
 0x22d   : > { %v1583_v38 = vsel %vm1500_vm0, %v1582_v40, %v1581_v56  ;;  %v1356_v0 = vsub.s32 0, %v1354_v10  ;;  %v1627_v36 = vor.u32 %v1626_v48, %v1625_v19  ;;  %v1630_v6 = vor.u32 %v1629_v5, %v1628_v60  ;;  %p2282_p10 = pnand %p2281_p0, %p2275_p11 }
 0x22e   : > { %v1586_v26 = vsel %vm3328_vm4, %v3068_v12, %v1583_v38  ;;  %v1633_v46 = vor.u32 %v1632_v33, %v1631_v32  ;;  %v1591_v62 = vadd.s32 3, %v1587_v14  ;;  %v1650_v20 = vshll.u32 %v1610_v11, 8 }
 0x22f   : > { %2172 = vcosq.f32 %v1586_v26  ;;  %v1923_v39 = vmin.u32 %v1356_v0, %v1354_v10  ;;  %v1618_v47 = vshrl.u32 %v2350_v49, %v1617_v15  ;;  %vm1634_vm8 = vcmp.lt.s32.totalorder %v1615_v44, 1 }
 0x230   : > { %2174 = vsinq.f32 %v1586_v26  ;;  %v1397_v37 = vand.u32 2139095040, %v3278_v42  ;;  %vm1636_vm9 = vcmp.lt.s32.totalorder %v1615_v44, 3  ;;  %vm1637_vm10 = vcmp.lt.s32.totalorder %v1615_v44, 4 }
 0x231   : > { %v1358_v4 = vclz %v1923_v39  ;;  %v1642_v7 = vsel %vm1634_vm8, %v1621_v2, %v1624_v59  ;;  %v1639_v18 = vsel %vm1637_vm10, %v1627_v36, 2102212464  ;;  %v1643_v23 = vsel %vm1637_vm10, %v1630_v6, 920167782 }
 0x232   : > { %v1646_v9 = vsel %vm1634_vm8, %v1624_v59, %v1627_v36  ;;  %v1647_v52 = vsel %vm1637_vm10, %v1633_v46, 1326507024  ;;  %vm1635_vm11 = vcmp.lt.s32.totalorder %v1615_v44, 2  ;;  %v1644_v45 = vsel %vm1636_vm9, %v1627_v36, %v1643_v23 }
 0x233   : > { %v1924_v34 = vadd.s32 4294967294, %v1358_v4  ;;  %v1648_v28 = vsel %vm1636_vm9, %v1630_v6, %v1647_v52  ;;  %v1638_v8 = vsel %vm1634_vm8, %v1618_v47, %v1621_v2  ;;  %v1645_v25 = vsel %vm1635_vm11, %v1642_v7, %v1644_v45 }
 0x234   : > { %v1649_v30 = vsel %vm1635_vm11, %v1646_v9, %v1648_v28  ;;  %v1398_v3 = vshrl.u32 %v1397_v37, 23  ;;  %v1640_v27 = vsel %vm1636_vm9, %v1624_v59, %v1639_v18  ;;  %v1346_v56 = vadd.s32 %v3270_v43, %v3267_v31 }
 0x235   : > { %vm1925_vm12 = vcmp.lt.s32.totalorder %v1924_v34, 0  ;;  %v3376_v15 = vmul.u32.u64.low %v1650_v20, %v1649_v30  ;;  %v3377_v58 = vmul.u32.u64.high %v1650_v20, %v1649_v30, %v3376_v15  ;;  %v1592_v13 = vand.u32 3, %v1591_v62 }
 0x236   : > { %v1361_v63 = vsel %vm1925_vm12, 0, %v1924_v34  ;;  %v3379_v16 = vmul.u32.u64.low %v1650_v20, %v1645_v25  ;;  %v3380_v17 = vmul.u32.u64.high %v1650_v20, %v1645_v25, %v3379_v16  ;;  %v1926_v14 = vadd.s32 4294967169, %v1398_v3 }
 0x237   : > { %v1362_v41 = vsub.s32 32, %v1361_v63  ;;  %v1366_v24 = vsub.s32 4294967266, %v1361_v63  ;;  %v1641_v11 = vsel %vm1635_vm11, %v1638_v8, %v1640_v27  ;;  %v1363_v5 = vshll.u32 %v1354_v10, %v1361_v63 }
 0x238   : > { %v1404_v48 = vadd.s32 1, %v1926_v14  ;;  %vm1659_vm13 = vc.u32 %v3377_v58, %v3379_v16  ;;  %vm1590_vm14 = vweird.f32 %v3068_v12  ;;  %v1660_v29 = vadd.s32 1, %v3380_v17 }
 0x239   : > { %v1364_v40 = vshrl.u32 %v1346_v56, %v1362_v41  ;;  %v1367_v22 = vadd.s32 127, %v1366_v24  ;;  %v1657_v31 = vmul.u32 %v1650_v20, %v1641_v11  ;;  %vm1593_vm0 = vcmp.lt.s32.totalorder %v1592_v13, 2 }
 0x23a   : > { %vm1405_vm15 = vcmp.gt.s32.totalorder %v1404_v48, 0  ;;  %vm1594_vm1 = vcmp.eq.s32.totalorder %v1592_v13, 0  ;;  %vm1292_vm2 = vcmp.lt.s32.totalorder %v3134_v61, 0  ;;  %v1661_v44 = vsel %vm1659_vm13, %v1660_v29, %v3380_v17 }
 0x23b   : > { %v1365_v19 = vor.u32 %v1364_v40, %v1363_v5  ;;  %v1368_v60 = vshll.u32 %v1367_v22, 23  ;;  %v1406_v43 = vsel %vm1405_vm15, %v1404_v48, 0  ;;  %vm1597_vm3 = vcmp.eq.s32.totalorder %v1592_v13, 2 }
 0x23c   : > { %v2173_v32 = vpop.eup %2172  ;;  %v1408_v10 = vand.u32 31, %v1406_v43  ;;  %vm3394_vm4 = vcmp.le.f32.partialorder %v1290_v54, 0.7853982  ;;  %v1662_v59 = vadd.s32 %v1661_v44, %v1657_v31  ;;  %v1376_v36 = vsub.s32 4, %v3346_v21 }
 0x23d   : > { %v2175_v33 = vpop.eup %2174  ;;  %v1598_v38 = vxor.u32 2147483648, %v2173_v32  ;;  %v1369_v2 = vor.u32 4788187, %v1368_v60  ;;  %v1394_v6 = vand.u32 2147483647, %v3278_v42  ;;  %v1372_v20 = vcvt.s32.f32 %v1365_v19 }
 0x23e   : > { %v1595_v26 = vxor.u32 2147483648, %v2175_v33  ;;  %v1409_v46 = vsub.s32 32, %v1408_v10  ;;  %v1663_v47 = vadd.s32 536870912, %v1662_v59  ;;  %v1411_v54 = vshll.u32 %v2350_v49, %v1408_v10 }
 0x23f   : > { %v1599_v62 = vsel %vm1597_vm3, %v1598_v38, %v2175_v33  ;;  %v1370_v39 = vand.u32 2147483647, %v1369_v2  ;;  %v1401_v45 = vand.u32 8388607, %v1394_v6  ;;  %v1407_v28 = vshrl.u32 %v1406_v43, 5 }
 0x240   : > { %v1596_v37 = vsel %vm1594_vm1, %v2173_v32, %v1595_v26  ;;  %v1412_v4 = vshrl.u32 %v2351_v51, %v1409_v46  ;;  %v1415_v7 = vshrl.u32 %v2352_v53, %v1409_v46  ;;  %v3405_v9 = vshrl.u32 %v1663_v47, 30 }
 0x241   : > { %v1600_v18 = vsel %vm1593_vm0, %v1596_v37, %v1599_v62  ;;  %v1373_v23 = vmul.f32 %v1372_v20, %v1370_v39  ;;  %v1418_v52 = vshrl.u32 %v2353_v55, %v1409_v46  ;;  %v1414_v8 = vshll.u32 %v2351_v51, %v1408_v10 }
 0x242   : > { %v1601_v34 = vsel %vm1590_vm14, nan, %v1600_v18  ;;  %v1665_v30 = vshll.u32 %v3405_v9, 30  ;;  %v1413_v3 = vor.u32 %v1412_v4, %v1411_v54  ;;  %v1417_v27 = vshll.u32 %v2352_v53, %v1408_v10 }
 0x243   : > { %1716 = vst [vmem:[%s2858_s14 + $0x50] sm:$0xff] %v1601_v34  ;;  %v1374_v25 = vxor.u32 2147483648, %v1373_v23  ;;  %v1420_v15 = vshll.u32 %v2353_v55, %v1408_v10  ;;  %v1421_v63 = vshrl.u32 %v2354_v57, %v1409_v46  ;;  %v1423_v12 = vshll.u32 %v2354_v57, %v1408_v10 }
 0x244   : > { %v1424_v17 = vshrl.u32 %v2355_v1, %v1409_v46  ;;  %v1666_v56 = vsub.s32 %v1662_v59, %v1665_v30  ;;  %v1416_v51 = vor.u32 %v1415_v7, %v1414_v8  ;;  %v1419_v41 = vor.u32 %v1418_v52, %v1417_v27 }
 0x245   : > { %v1375_v14 = vsel %vm1292_vm2, %v1374_v25, %v1373_v23  ;;  %v1422_v13 = vor.u32 %v1421_v63, %v1420_v15  ;;  %v1377_v55 = vsel %vm1292_vm2, %v1376_v36, %v3346_v21  ;;  %v1402_v11 = vor.u32 8388608, %v1401_v45 }
 0x246   : > { %v1378_v24 = vsel %vm3394_vm4, %v3134_v61, %v1375_v14  ;;  %v1425_v53 = vor.u32 %v1424_v17, %v1423_v12  ;;  %v1668_v57 = vsub.s32 0, %v1666_v56  ;;  %vm1426_vm5 = vcmp.lt.s32.totalorder %v1407_v28, 1 }
 0x247   : > { %2176 = vcosq.f32 %v1378_v24  ;;  %vm1428_vm6 = vcmp.lt.s32.totalorder %v1407_v28, 3  ;;  %vm1429_vm7 = vcmp.lt.s32.totalorder %v1407_v28, 4  ;;  %v1434_v5 = vsel %vm1426_vm5, %v1413_v3, %v1416_v51 }
 0x248   : > { %2178 = vsinq.f32 %v1378_v24  ;;  %v1935_v1 = vmin.u32 %v1668_v57, %v1666_v56  ;;  %v1431_v48 = vsel %vm1429_vm7, %v1419_v41, 2102212464  ;;  %v1435_v40 = vsel %vm1429_vm7, %v1422_v13, 920167782 }
 0x249   : > { %v1410_v22 = vshrl.u32 %v2350_v49, %v1409_v46  ;;  %v1436_v29 = vsel %vm1428_vm6, %v1419_v41, %v1435_v40  ;;  %v1438_v19 = vsel %vm1426_vm5, %v1416_v51, %v1419_v41  ;;  %v1439_v60 = vsel %vm1429_vm7, %v1425_v53, 1326507024 }
 0x24a   : > { %v1379_v21 = vsel %vm3394_vm4, 0, %v1377_v55  ;;  %v1670_v31 = vclz %v1935_v1  ;;  %vm1427_vm8 = vcmp.lt.s32.totalorder %v1407_v28, 2  ;;  %v1442_v43 = vshll.u32 %v1402_v11, 8 }
 0x24b   : > { %v1430_v32 = vsel %vm1426_vm5, %v1410_v22, %v1413_v3  ;;  %v1432_v44 = vsel %vm1428_vm6, %v1416_v51, %v1431_v48  ;;  %v1437_v10 = vsel %vm1427_vm8, %v1434_v5, %v1436_v29  ;;  %v1440_v33 = vsel %vm1428_vm6, %v1422_v13, %v1439_v60 }
 0x24c   : > { %v1936_v38 = vadd.s32 4294967294, %v1670_v31  ;;  %v1441_v2 = vsel %vm1427_vm8, %v1438_v19, %v1440_v33  ;;  %v3434_v59 = vmul.u32.u64.low %v1442_v43, %v1437_v10  ;;  %v3435_v49 = vmul.u32.u64.high %v1442_v43, %v1437_v10, %v3434_v59 }
 0x24d   : > { %v1383_v26 = vadd.s32 3, %v1379_v21  ;;  %v3437_v36 = vmul.u32.u64.low %v1442_v43, %v1441_v2  ;;  %v3438_v46 = vmul.u32.u64.high %v1442_v43, %v1441_v2, %v3437_v36  ;;  %v1433_v0 = vsel %vm1427_vm8, %v1430_v32, %v1432_v44 }
 0x24e   : > { %vm1937_vm9 = vcmp.lt.s32.totalorder %v1936_v38, 0  ;;  %v1658_v39 = vadd.s32 %v3379_v16, %v3377_v58  ;;  %v1452_v37 = vadd.s32 1, %v3435_v49  ;;  %v1449_v4 = vmul.u32 %v1442_v43, %v1433_v0 }
 0x24f   : > { %v1673_v62 = vsel %vm1937_vm9, 0, %v1936_v38  ;;  %v1384_v54 = vand.u32 3, %v1383_v26  ;;  %vm1451_vm10 = vc.u32 %v3438_v46, %v3434_v59  ;;  %vm1382_vm14 = vweird.f32 %v3134_v61 }
 0x250   : > { %v1674_v20 = vsub.s32 32, %v1673_v62  ;;  %v1678_v47 = vsub.s32 4294967266, %v1673_v62  ;;  %v1675_v7 = vshll.u32 %v1666_v56, %v1673_v62  ;;  %v1453_v52 = vsel %vm1451_vm10, %v1452_v37, %v3435_v49 }
 0x251   : > { %v1454_v45 = vadd.s32 %v1453_v52, %v1449_v4  ;;  %vm1389_vm11 = vcmp.eq.s32.totalorder %v1384_v54, 2  ;;  %vm1386_vm12 = vcmp.eq.s32.totalorder %v1384_v54, 0  ;;  %vm1385_vm13 = vcmp.lt.s32.totalorder %v1384_v54, 2 }
 0x252   : > { %v1676_v18 = vshrl.u32 %v1658_v39, %v1674_v20  ;;  %v1679_v23 = vadd.s32 127, %v1678_v47  ;;  %vm1604_vm15 = vcmp.lt.s32.totalorder %v3137_v35, 0  ;;  %v1688_v53 = vsub.s32 4, %v3405_v9 }
 0x253   : > { %v1455_v16 = vadd.s32 536870912, %v1454_v45  ;;  %vm1603_vm0 = vcmp.le.f32.partialorder %v1602_v50, 0.7853982  ;;  %v1450_v19 = vadd.s32 %v3434_v59, %v3438_v46  ;;  %vm1694_vm5 = vweird.f32 %v3137_v35 }
 0x254   : > { %v2177_v34 = vpop.eup %2176  ;;  %v1677_v25 = vor.u32 %v1676_v18, %v1675_v7  ;;  %v1680_v30 = vshll.u32 %v1679_v23, 23  ;;  %v1689_v1 = vsel %vm1604_vm15, %v1688_v53, %v3405_v9  ;;  %vm1396_vm6 = vcmp.lt.s32.totalorder %v3278_v42, 0 }
 0x255   : > { %v2179_v28 = vpop.eup %2178  ;;  %v1390_v8 = vxor.u32 2147483648, %v2177_v34  ;;  %v1456_v63 = vshrl.u32 %v1455_v16, 30  ;;  %v1691_v40 = vsel %vm1603_vm0, 0, %v1689_v1  ;;  %vm1395_vm7 = vcmp.le.f32.partialorder %v1394_v6, 0.7853982 }
 0x256   : > { %v1387_v58 = vxor.u32 2147483648, %v2179_v28  ;;  %v1681_v27 = vor.u32 4788187, %v1680_v30  ;;  %v1684_v14 = vcvt.s32.f32 %v1677_v25  ;;  %v1695_v29 = vadd.s32 3, %v1691_v40 }
 0x257   : > { %v1391_v3 = vsel %vm1389_vm11, %v1390_v8, %v2179_v28  ;;  %v1457_v51 = vshll.u32 %v1456_v63, 30  ;;  %v1480_v47 = vsub.s32 4, %v1456_v63  ;;  %vm1486_vm11 = vweird.f32 %v3278_v42 }
 0x258   : > { %v1388_v15 = vsel %vm1386_vm12, %v2177_v34, %v1387_v58  ;;  %v1682_v17 = vand.u32 2147483647, %v1681_v27  ;;  %v1696_v32 = vand.u32 3, %v1695_v29 }
 0x259   : > { %v1392_v12 = vsel %vm1385_vm13, %v1388_v15, %v1391_v3  ;;  %v1458_v24 = vsub.s32 %v1454_v45, %v1457_v51  ;;  %v1481_v4 = vsel %vm1396_vm6, %v1480_v47, %v1456_v63 }
 0x25a   : > { %v1393_v56 = vsel %vm1382_vm14, nan, %v1392_v12  ;;  %v1685_v41 = vmul.f32 %v1684_v14, %v1682_v17  ;;  %vm1701_vm2 = vcmp.eq.s32.totalorder %v1696_v32, 2  ;;  %vm1698_vm3 = vcmp.eq.s32.totalorder %v1696_v32, 0 }
 0x25b   : > { %1714 = vst [vmem:[%s2858_s14 + $0x40] sm:$0xff] %v1393_v56  ;;  %v1460_v55 = vsub.s32 0, %v1458_v24  ;;  %vm1697_vm4 = vcmp.lt.s32.totalorder %v1696_v32, 2  ;;  %v1483_v7 = vsel %vm1395_vm7, 0, %v1481_v4 }
 0x25c   : > { %v1686_v13 = vxor.u32 2147483648, %v1685_v41 }
 0x25d   : > { %v1927_v11 = vmin.u32 %v1460_v55, %v1458_v24 }
 0x25e   : > { %v1687_v57 = vsel %vm1604_vm15, %v1686_v13, %v1685_v41 }
 0x25f   : > { %v1690_v61 = vsel %vm1603_vm0, %v3137_v35, %v1687_v57  ;;  %v1462_v48 = vclz %v1927_v11  ;;  %v1487_v35 = vadd.s32 3, %v1483_v7 }
 0x260   : > { %2180 = vcosq.f32 %v1690_v61 }
 0x261   : > { %2182 = vsinq.f32 %v1690_v61  ;;  %v1928_v5 = vadd.s32 4294967294, %v1462_v48  ;;  %v1488_v18 = vand.u32 3, %v1487_v35 }
 0x263   : > { %vm1929_vm1 = vcmp.lt.s32.totalorder %v1928_v5, 0  ;;  %vm1493_vm8 = vcmp.eq.s32.totalorder %v1488_v18, 2  ;;  %vm1490_vm9 = vcmp.eq.s32.totalorder %v1488_v18, 0  ;;  %vm1489_vm10 = vcmp.lt.s32.totalorder %v1488_v18, 2 }
 0x264   : > { %v1465_v22 = vsel %vm1929_vm1, 0, %v1928_v5 }
 0x265   : > { %v1466_v60 = vsub.s32 32, %v1465_v22  ;;  %v1470_v21 = vsub.s32 4294967266, %v1465_v22  ;;  %v1467_v31 = vshll.u32 %v1458_v24, %v1465_v22 }
 0x267   : > { %v1468_v50 = vshrl.u32 %v1450_v19, %v1466_v60  ;;  %v1471_v43 = vadd.s32 127, %v1470_v21 }
 0x269   : > { %v1469_v44 = vor.u32 %v1468_v50, %v1467_v31  ;;  %v1472_v10 = vshll.u32 %v1471_v43, 23 }
 0x26b   : > { %v1473_v38 = vor.u32 4788187, %v1472_v10  ;;  %v1476_v36 = vcvt.s32.f32 %v1469_v44 }
 0x26d   : > { %v2181_v33 = vpop.eup %2180  ;;  %v1474_v26 = vand.u32 2147483647, %v1473_v38 }
 0x26e   : > { %v2183_v9 = vpop.eup %2182  ;;  %v1702_v2 = vxor.u32 2147483648, %v2181_v33 }
 0x26f   : > { %v1699_v49 = vxor.u32 2147483648, %v2183_v9  ;;  %v1477_v46 = vmul.f32 %v1476_v36, %v1474_v26 }
 0x270   : > { %v1703_v0 = vsel %vm1701_vm2, %v1702_v2, %v2183_v9 }
 0x271   : > { %v1700_v59 = vsel %vm1698_vm3, %v2181_v33, %v1699_v49  ;;  %v1478_v20 = vxor.u32 2147483648, %v1477_v46 }
 0x272   : > { %v1704_v62 = vsel %vm1697_vm4, %v1700_v59, %v1703_v0 }
 0x273   : > { %v1705_v39 = vsel %vm1694_vm5, nan, %v1704_v62  ;;  %v1479_v37 = vsel %vm1396_vm6, %v1478_v20, %v1477_v46 }
 0x274   : > { %1717 = vst [vmem:[%s2858_s14 + $0x58] sm:$0xff] %v1705_v39  ;;  %v1482_v54 = vsel %vm1395_vm7, %v3278_v42, %v1479_v37 }
 0x275   : > { %2184 = vcosq.f32 %v1482_v54 }
 0x276   : > { %2186 = vsinq.f32 %v1482_v54 }
 0x282   : > { %v2185_v23 = vpop.eup %2184 }
 0x283   : > { %v2187_v52 = vpop.eup %2186  ;;  %v1494_v34 = vxor.u32 2147483648, %v2185_v23 }
 0x284   : > { %v1491_v45 = vxor.u32 2147483648, %v2187_v52 }
 0x285   : > { %v1495_v6 = vsel %vm1493_vm8, %v1494_v34, %v2187_v52 }
 0x286   : > { %v1492_v28 = vsel %vm1490_vm9, %v2185_v23, %v1491_v45 }
 0x287   : > { %v1496_v8 = vsel %vm1489_vm10, %v1492_v28, %v1495_v6 }
 0x288   : > { %v1497_v25 = vsel %vm1486_vm11, nan, %v1496_v8 }
 0x289   : > { %1715 = vst [vmem:[%s2858_s14 + $0x48] sm:$0xff] %v1497_v25 }
 0x28a   : > { %2285 = shalt.err (!%p2282_p10)
}
 0x28b   : > { %s2286_s14 = scalar_lea.hbm %s3467_s12, 1536  ;;  %s2290_s6 = scalar_lea.hbm %s3516_s3, 6144 }
 0x28c   : > { %p2287_p2 = scmp.ne.s32.totalorder %s3467_s12, %s2286_s14  ;;  %p2291_p6 = scmp.lt.s32.totalorder %s3467_s12, %s3516_s3 }
 0x28d   : > { %p2292_p8 = scmp.lt.s32.totalorder %s2290_s6, %s2286_s14 }
 0x28e   : > { %p2288_p1 = pnand %p2287_p2, %p3549_p5 }
 0x28f   : > { %p2293_p3 = por %p2292_p8, %p2291_p6 }
 0x290   : > { %p2289_p4 = pneg %p2288_p1 }
 0x292   : > { %p2294_p7 = pnand %p2293_p3, %p2289_p4 }
 0x294   : > { %2297 = shalt.err (!%p2294_p7)
}
 0x295   : > { %2060 = dma.vmem_to_hbm [thread:$0]  (%p3549_p5), %s3469_s24, 1536, %s3467_s12, %s1719_s20, %s2357_s13, %s2357_s13, %s2358_s8  }
 0x296 PF: > { %p2082_p9 = scmp.ge.s32.totalorder %s2344_s18, 2  ;;  %s1768_s11 = sand.u32 1, %s2332_s15  }
 0x297   : > { %p3554_p11 = scmp.ne.s32.totalorder %s3523_s22, 0  ;;  %s1769_s26 = scalar_lea.sflag [#allocation4], %s1768_s11 }
 0x299   : > { %p2073_p12 = pnand %p2082_p9, %p3554_p11 }
 0x29b   : > { %p2074_p13 = pneg %p2073_p12 }
 0x29d   : > { %2323 = dma.done.wait (%p2074_p13), %s1769_s26, 1536  }
 0x29e   : > { %2325 = vsyncadd (%p2074_p13), %s1769_s26, 4294965760  ;;  %s1778_s7 = scalar_lea.sflag [#allocation9], %s1768_s11 }
 0x29f   : > { %2327 = dma.done.wait (%p2074_p13), %s1778_s7, 1536  }
 0x2a0   : > { %2329 = vsyncadd (%p2074_p13), %s1778_s7, 4294965760  ;;  %p22_p5 = scmp.ge.s32.totalorder %s2438_s27, 6   ;;  %s3555_s15 = smov %s2336_s16 }
 0x2a1   : > { %s3556_s16 = smov %s2340_s17  ;;  %s3557_s17 = smov %s2458_s9 }
 0x2a2   : > { %s3558_s18 = smov %s2438_s27  ;;  %24 = sbr.rel (!%p22_p5) target bundleno = 8 (0x8), region = 98 }
 0x2a7   :  { %1783 = vsyncpa [#allocation3], 1 }
 0x2a8   :  { %1785 = vsyncpa [#allocation3 + $0x1], 1 }
 0x2a9   :  { %1786 = vsyncpa [#allocation6], 1 }
 0x2aa   :  { %1787 = vsyncpa [#allocation4], 1 }
 0x2ab   :  { %1789 = vsyncpa [#allocation4 + $0x1], 1 }
 0x2ac   :  { %1790 = vsyncpa [#allocation9], 1 }
 0x2ad   :  { %1792 = vsyncpa [#allocation9 + $0x1], 1 }

</bundles_post_ra>
